<compile_context>
chip_gen: v7x
topology: tpu7x:2x2x1
jax: 0.10.0
libtpu: 0.0.40
codegen_flags: <defaults>
</compile_context>

<pallas_src>
import functools

import jax
import jax.numpy as jnp
import numpy as np
from jax import lax
from jax.experimental import pallas as pl
from jax.experimental.pallas import tpu as pltpu


# ---------------------------------------------------------------------------
# Kernel: one batch image per grid step.
# ---------------------------------------------------------------------------
def _gblock_kernel(x_ref, mask_ref, a1_ref, b1_ref, a2_ref, b2_ref,
                   w1_ref, w2_ref, wsc_ref, bnb_ref,
                   o_ref, t1_ref, t2_ref, *, Wp, L, q0):
    cout = w1_ref.shape[-1]

    mask = mask_ref[...]                      # (NPAD, 1): 1 inside image, 0 on pad ring
    x = x_ref[0]                              # (NPAD, Cin), zero-padded flattened image

    # cbn1 (eval-BN + conditional affine folded to scale/bias) + ReLU.
    # Padding positions must be exactly zero for the conv, so mask them.
    t1_ref[...] = mask * jnp.maximum(a1_ref[0] * x + b1_ref[0], 0.0)

    # conv1: 3x3 conv as 9 shifted (L, Cin) @ (Cin, Cout) matmuls (no transposes).
    acc1 = jnp.zeros((L, cout), jnp.float32)
    for dy in range(3):
        for dx in range(3):
            s = dy * Wp + dx
            acc1 = acc1 + jnp.dot(t1_ref[pl.ds(s, L), :], w1_ref[3 * dy + dx],
                                  preferred_element_type=jnp.float32)

    # cbn2 + ReLU, masked and written back into a zero-padded buffer for conv2.
    t2_ref[...] = jnp.zeros_like(t2_ref)
    mask_s = mask_ref[pl.ds(q0, L), :]
    t2_ref[pl.ds(q0, L), :] = mask_s * jnp.maximum(a2_ref[0] * acc1 + b2_ref[0], 0.0)

    # conv2 (final BatchNorm scale already folded into the weights).
    acc2 = jnp.zeros((L, cout), jnp.float32)
    for dy in range(3):
        for dx in range(3):
            s = dy * Wp + dx
            acc2 = acc2 + jnp.dot(t2_ref[pl.ds(s, L), :], w2_ref[3 * dy + dx],
                                  preferred_element_type=jnp.float32)

    # shortcut: 1x1 conv on the raw input slab, then fused add with the residual.
    sc = jnp.dot(x_ref[0, pl.ds(q0, L), :], wsc_ref[...],
                 preferred_element_type=jnp.float32)
    o_ref[0] = (acc2 + bnb_ref[...] + sc).astype(o_ref.dtype)


# ---------------------------------------------------------------------------
# Wrapper
# ---------------------------------------------------------------------------
def gblock_forward(x, y, params, *, upsample, use_bn=True, eps=1e-5):
    """GBlock forward (inference-mode BN) as one fused Pallas kernel per image.

    x: (B, Cin, H, W) float32 (NCHW, as in the PyTorch module)
    y: (B, num_conditions) float32
    """
    B, Cin, H, W = x.shape
    Cout = params["w1"].shape[0]
    learnable_sc = (Cin != Cout) or upsample

    # Nearest-neighbour 2x upsample hoisted in front of the block (exact).
    if upsample:
        x = jnp.repeat(jnp.repeat(x, 2, axis=2), 2, axis=3)
    Hu, Wu = x.shape[2], x.shape[3]
    Wp = Wu + 2                  # padded row width
    L = Hu * Wp                  # flattened output slab length
    NPAD = (Hu + 3) * Wp         # flattened padded image length (1 top + 2 bottom rows)
    q0 = Wp + 1                  # flat offset of image pixel (0, 0)

    # NCHW -> padded, flattened channel-last (B, NPAD, Cin).
    x_nhwc = jnp.transpose(x, (0, 2, 3, 1))
    x_flat = jnp.pad(x_nhwc, ((0, 0), (1, 2), (1, 1), (0, 0))).reshape(B, NPAD, Cin)

    # Interior mask (built host-side with numpy; tiny, DMA'd once).
    ii = np.arange(NPAD) // Wp
    jj = np.arange(NPAD) % Wp
    mask = ((ii >= 1) & (ii <= Hu) & (jj >= 1) & (jj <= Wu)).astype(np.float32)
    mask = jnp.asarray(mask)[:, None]                       # (NPAD, 1)

    # CBN: conditional gamma/beta + eval-mode BN folded to per-(b, c) scale/bias.
    def cbn_affine(embed_w, rmean, rvar, c):
        e = y @ embed_w.T                                   # (B, 2c)
        gamma, beta = e[:, :c], e[:, c:]
        a = (1.0 + gamma) / jnp.sqrt(rvar + eps)[None, :]   # (B, c)
        b = beta - rmean[None, :] * a
        return a[:, None, :], b[:, None, :]                 # (B, 1, c)

    a1, b1 = cbn_affine(params["embed1"], params["bn1_mean"], params["bn1_var"], Cin)
    a2, b2 = cbn_affine(params["embed2"], params["bn2_mean"], params["bn2_var"], Cout)

    # Conv weights pre-transposed to (tap, Cin, Cout) so the kernel never transposes.
    w1 = jnp.transpose(params["w1"], (2, 3, 1, 0)).reshape(9, Cin, Cout)
    w2 = jnp.transpose(params["w2"], (2, 3, 1, 0)).reshape(9, Cout, Cout)
    if use_bn:   # fold final eval-mode BatchNorm into conv2's weights + a bias
        s = 1.0 / jnp.sqrt(params["bn3_var"] + eps)
        w2 = w2 * s[None, None, :]
        bn_bias = (-params["bn3_mean"] * s)[None, :]        # (1, Cout)
    else:
        bn_bias = jnp.zeros((1, Cout), jnp.float32)
    if learnable_sc:
        wsc = jnp.transpose(params["wsc"][:, :, 0, 0], (1, 0))   # (Cin, Cout)
    else:
        wsc = jnp.eye(Cin, dtype=jnp.float32)               # identity shortcut

    kernel = functools.partial(_gblock_kernel, Wp=Wp, L=L, q0=q0)

    out_slab = pl.pallas_call(
        kernel,
        out_shape=jax.ShapeDtypeStruct((B, L, Cout), x.dtype),
        grid_spec=pltpu.PrefetchScalarGridSpec(
            num_scalar_prefetch=0,
            grid=(B,),
            in_specs=[
                pl.BlockSpec((1, NPAD, Cin), lambda b: (b, 0, 0)),   # x (padded, flat)
                pl.BlockSpec((NPAD, 1), lambda b: (0, 0)),           # interior mask
                pl.BlockSpec((1, 1, Cin), lambda b: (b, 0, 0)),      # cbn1 scale
                pl.BlockSpec((1, 1, Cin), lambda b: (b, 0, 0)),      # cbn1 bias
                pl.BlockSpec((1, 1, Cout), lambda b: (b, 0, 0)),     # cbn2 scale
                pl.BlockSpec((1, 1, Cout), lambda b: (b, 0, 0)),     # cbn2 bias
                pl.BlockSpec((9, Cin, Cout), lambda b: (0, 0, 0)),   # conv1 taps
                pl.BlockSpec((9, Cout, Cout), lambda b: (0, 0, 0)),  # conv2 taps (BN-scaled)
                pl.BlockSpec((Cin, Cout), lambda b: (0, 0)),         # conv_sc / identity
                pl.BlockSpec((1, Cout), lambda b: (0, 0)),           # folded BN bias
            ],
            out_specs=pl.BlockSpec((1, L, Cout), lambda b: (b, 0, 0)),
            scratch_shapes=[
                pltpu.VMEM((NPAD, Cin), jnp.float32),    # conv1 padded input
                pltpu.VMEM((NPAD, Cout), jnp.float32),   # conv2 padded input
            ],
        ),
        compiler_params=pltpu.CompilerParams(
            dimension_semantics=("parallel",),
        ),
    )(x_flat, mask, a1, b1, a2, b2, w1, w2, wsc, bn_bias)

    # (B, L, Cout) slab -> (B, Hu, Wu, Cout) (drop the two pad columns) -> NCHW.
    out = out_slab.reshape(B, Hu, Wp, Cout)[:, :, :Wu, :]
    return jnp.transpose(out, (0, 3, 1, 2))


# ---------------------------------------------------------------------------
# Deterministic parameter setup (plain JAX glue, mirrors the PyTorch init).
# ---------------------------------------------------------------------------
def orthogonal_init(key, out_c, in_c):
    if out_c >= in_c:
        a = jax.random.normal(key, (out_c, in_c), dtype=jnp.float32)
        q, _ = jnp.linalg.qr(a)
        return q
    a = jax.random.normal(key, (in_c, out_c), dtype=jnp.float32)
    q, _ = jnp.linalg.qr(a)
    return q.T


def spectral_normalize(w):
    # Exact top singular value (fixed point of torch's power iteration).
    return w / jnp.linalg.norm(w, ord=2)


def make_params(key, Cin, Cout, ncond):
    ks = jax.random.split(key, 11)
    w1 = spectral_normalize(orthogonal_init(ks[0], Cout, Cin * 9)).reshape(Cout, Cin, 3, 3)
    w2 = spectral_normalize(orthogonal_init(ks[1], Cout, Cout * 9)).reshape(Cout, Cout, 3, 3)
    wsc = spectral_normalize(orthogonal_init(ks[2], Cout, Cin)).reshape(Cout, Cin, 1, 1)
    embed1 = spectral_normalize(orthogonal_init(ks[3], 2 * Cin, ncond))
    embed2 = spectral_normalize(orthogonal_init(ks[4], 2 * Cout, ncond))
    # Nonzero / non-unit running stats so the BN math is actually exercised.
    return dict(
        w1=w1, w2=w2, wsc=wsc, embed1=embed1, embed2=embed2,
        bn1_mean=0.1 * jax.random.normal(ks[5], (Cin,), jnp.float32),
        bn1_var=jax.random.uniform(ks[6], (Cin,), jnp.float32, 0.5, 1.5),
        bn2_mean=0.1 * jax.random.normal(ks[7], (Cout,), jnp.float32),
        bn2_var=jax.random.uniform(ks[8], (Cout,), jnp.float32, 0.5, 1.5),
        bn3_mean=0.1 * jax.random.normal(ks[9], (Cout,), jnp.float32),
        bn3_var=jax.random.uniform(ks[10], (Cout,), jnp.float32, 0.5, 1.5),
    )


# ---------------------------------------------------------------------------
# Pure-JAX reference mirroring the PyTorch forward (eval-mode BN).
# ---------------------------------------------------------------------------
def reference_gblock(x, y, params, *, upsample, use_bn=True, eps=1e-5):
    Cin = x.shape[1]
    Cout = params["w1"].shape[0]
    learnable_sc = (Cin != Cout) or upsample

    def bn_eval(z, mean, var):
        return (z - mean[None, :, None, None]) / jnp.sqrt(var + eps)[None, :, None, None]

    def cbn(z, embed_w, mean, var):
        c = z.shape[1]
        e = y @ embed_w.T
        gamma, beta = e[:, :c], e[:, c:]
        return ((1.0 + gamma)[:, :, None, None] * bn_eval(z, mean, var)
                + beta[:, :, None, None])

    def conv(z, w, pad):
        return lax.conv_general_dilated(z, w, (1, 1), pad,
                                        dimension_numbers=("NCHW", "OIHW", "NCHW"))

    def up2(z):
        return jnp.repeat(jnp.repeat(z, 2, axis=2), 2, axis=3)

    h = jax.nn.relu(cbn(x, params["embed1"], params["bn1_mean"], params["bn1_var"]))
    h = conv(up2(h) if upsample else h, params["w1"], ((1, 1), (1, 1)))
    h = jax.nn.relu(cbn(h, params["embed2"], params["bn2_mean"], params["bn2_var"]))
    h = conv(h, params["w2"], ((1, 1), (1, 1)))
    if use_bn:
        h = bn_eval(h, params["bn3_mean"], params["bn3_var"])
    sc = x
    if learnable_sc:
        sc = conv(up2(x) if upsample else x, params["wsc"], ((0, 0), (0, 0)))
    return sc + h


if __name__ == "__main__":
    B, Cin, Cout, ncond, H, W = 2, 32, 64, 16, 8, 8
    upsample = True

    key = jax.random.PRNGKey(0)
    kx, ky, kp = jax.random.split(key, 3)
    x = jax.random.normal(kx, (B, Cin, H, W), dtype=jnp.float32)
    y = jax.random.normal(ky, (B, ncond), dtype=jnp.float32)
    params = make_params(kp, Cin, Cout, ncond)

    out = gblock_forward(x, y, params, upsample=upsample)
    out = jax.block_until_ready(out)
    assert out.shape == (B, Cout, 2 * H, 2 * W)

    ref = reference_gblock(x, y, params, upsample=upsample)
    np.testing.assert_allclose(np.asarray(out), np.asarray(ref), rtol=2e-3, atol=2e-3)

    print("KERNEL_OK")
</pallas_src>

<mosaic_0001>
module attributes {stable_mosaic.version = 11 : i64} {
  func.func @_gblock_kernel(%arg0: i32, %arg1: memref<1x342x32xf32, #tpu.memory_space<vmem>>, %arg2: memref<342x1xf32, #tpu.memory_space<vmem>>, %arg3: memref<1x1x32xf32, #tpu.memory_space<vmem>>, %arg4: memref<1x1x32xf32, #tpu.memory_space<vmem>>, %arg5: memref<1x1x64xf32, #tpu.memory_space<vmem>>, %arg6: memref<1x1x64xf32, #tpu.memory_space<vmem>>, %arg7: memref<9x32x64xf32, #tpu.memory_space<vmem>>, %arg8: memref<9x64x64xf32, #tpu.memory_space<vmem>>, %arg9: memref<32x64xf32, #tpu.memory_space<vmem>>, %arg10: memref<1x64xf32, #tpu.memory_space<vmem>>, %arg11: memref<1x288x64xf32, #tpu.memory_space<vmem>>, %arg12: memref<342x32xf32, #tpu.memory_space<vmem>>, %arg13: memref<342x64xf32, #tpu.memory_space<vmem>>) attributes {dimension_semantics = [#tpu.dimension_semantics<parallel>], iteration_bounds = array<i64: 2>, scalar_prefetch = 0 : i64, scratch_operands = 2 : i64, tpu.core_type = #tpu.core_type<tc>, window_params = [{transform_indices = @transform_0, window_bounds = array<i64: 1, 342, 32>}, {pipeline_mode = #tpu.pipeline_mode<synchronous>, transform_indices = @transform_1, window_bounds = array<i64: 342, 1>}, {transform_indices = @transform_2, window_bounds = array<i64: 1, 1, 32>}, {transform_indices = @transform_3, window_bounds = array<i64: 1, 1, 32>}, {transform_indices = @transform_4, window_bounds = array<i64: 1, 1, 64>}, {transform_indices = @transform_5, window_bounds = array<i64: 1, 1, 64>}, {pipeline_mode = #tpu.pipeline_mode<synchronous>, transform_indices = @transform_6, window_bounds = array<i64: 9, 32, 64>}, {pipeline_mode = #tpu.pipeline_mode<synchronous>, transform_indices = @transform_7, window_bounds = array<i64: 9, 64, 64>}, {pipeline_mode = #tpu.pipeline_mode<synchronous>, transform_indices = @transform_8, window_bounds = array<i64: 32, 64>}, {pipeline_mode = #tpu.pipeline_mode<synchronous>, transform_indices = @transform_9, window_bounds = array<i64: 1, 64>}, {transform_indices = @transform_10, window_bounds = array<i64: 1, 288, 64>}]} {
    %c0 = arith.constant 0 : index
    %c0_0 = arith.constant 0 : index
    %0 = vector.load %arg2[%c0, %c0_0] : memref<342x1xf32, #tpu.memory_space<vmem>>, vector<342x1xf32>
    %c0_1 = arith.constant 0 : index
    %c0_2 = arith.constant 0 : index
    %c0_3 = arith.constant 0 : index
    %1 = vector.load %arg1[%c0_1, %c0_2, %c0_3] : memref<1x342x32xf32, #tpu.memory_space<vmem>>, vector<1x342x32xf32>
    %2 = vector.shape_cast %1 : vector<1x342x32xf32> to vector<342x32xf32>
    %c0_4 = arith.constant 0 : index
    %c0_5 = arith.constant 0 : index
    %c0_6 = arith.constant 0 : index
    %3 = vector.load %arg3[%c0_4, %c0_5, %c0_6] : memref<1x1x32xf32, #tpu.memory_space<vmem>>, vector<1x1x32xf32>
    %4 = vector.shape_cast %3 : vector<1x1x32xf32> to vector<1x32xf32>
    %5 = vector.broadcast %4 : vector<1x32xf32> to vector<342x32xf32>
    %6 = arith.mulf %5, %2 : vector<342x32xf32>
    %c0_7 = arith.constant 0 : index
    %c0_8 = arith.constant 0 : index
    %c0_9 = arith.constant 0 : index
    %7 = vector.load %arg4[%c0_7, %c0_8, %c0_9] : memref<1x1x32xf32, #tpu.memory_space<vmem>>, vector<1x1x32xf32>
    %8 = vector.shape_cast %7 : vector<1x1x32xf32> to vector<1x32xf32>
    %9 = vector.broadcast %8 : vector<1x32xf32> to vector<342x32xf32>
    %10 = arith.addf %6, %9 : vector<342x32xf32>
    %cst = arith.constant 0.000000e+00 : f32
    %11 = vector.broadcast %cst : f32 to vector<342x32xf32>
    %12 = arith.maximumf %10, %11 : vector<342x32xf32>
    %13 = vector.broadcast %0 : vector<342x1xf32> to vector<342x32xf32>
    %14 = arith.mulf %13, %12 : vector<342x32xf32>
    %c0_10 = arith.constant 0 : index
    %c0_11 = arith.constant 0 : index
    %15 = vector.load %arg12[%c0_10, %c0_11] : memref<342x32xf32, #tpu.memory_space<vmem>>, vector<342x32xf32>
    tpu.vector_store %arg12[%c0_10, %c0_11], %14 {strides = array<i32>} : memref<342x32xf32, #tpu.memory_space<vmem>>, vector<342x32xf32>,
    %cst_12 = arith.constant 0.000000e+00 : f32
    %16 = vector.broadcast %cst_12 : f32 to vector<288x64xf32>
    %c0_13 = arith.constant 0 : index
    %c0_14 = arith.constant 0 : index
    %17 = vector.load %arg12[%c0_13, %c0_14] : memref<342x32xf32, #tpu.memory_space<vmem>>, vector<288x32xf32>
    %c0_15 = arith.constant 0 : index
    %c0_16 = arith.constant 0 : index
    %c0_17 = arith.constant 0 : index
    %18 = vector.load %arg7[%c0_15, %c0_16, %c0_17] : memref<9x32x64xf32, #tpu.memory_space<vmem>>, vector<1x32x64xf32>
    %19 = vector.shape_cast %18 : vector<1x32x64xf32> to vector<32x64xf32>
    %cst_18 = arith.constant dense<0.000000e+00> : vector<288x64xf32>
    %20 = tpu.matmul %17, %19, %cst_18 {dimension_numbers = #tpu.dot_dimension_numbers<[1], [0], [0], [1], [0, 0, 1, 1], [], []>} : vector<288x32xf32>, vector<32x64xf32>, vector<288x64xf32> -> vector<288x64xf32>
    %21 = arith.addf %16, %20 : vector<288x64xf32>
    %c1 = arith.constant 1 : index
    %c0_19 = arith.constant 0 : index
    %22 = vector.load %arg12[%c1, %c0_19] : memref<342x32xf32, #tpu.memory_space<vmem>>, vector<288x32xf32>
    %c1_20 = arith.constant 1 : index
    %c0_21 = arith.constant 0 : index
    %c0_22 = arith.constant 0 : index
    %23 = vector.load %arg7[%c1_20, %c0_21, %c0_22] : memref<9x32x64xf32, #tpu.memory_space<vmem>>, vector<1x32x64xf32>
    %24 = vector.shape_cast %23 : vector<1x32x64xf32> to vector<32x64xf32>
    %cst_23 = arith.constant dense<0.000000e+00> : vector<288x64xf32>
    %25 = tpu.matmul %22, %24, %cst_23 {dimension_numbers = #tpu.dot_dimension_numbers<[1], [0], [0], [1], [0, 0, 1, 1], [], []>} : vector<288x32xf32>, vector<32x64xf32>, vector<288x64xf32> -> vector<288x64xf32>
    %26 = arith.addf %21, %25 : vector<288x64xf32>
    %c2 = arith.constant 2 : index
    %c0_24 = arith.constant 0 : index
    %27 = vector.load %arg12[%c2, %c0_24] : memref<342x32xf32, #tpu.memory_space<vmem>>, vector<288x32xf32>
    %c2_25 = arith.constant 2 : index
    %c0_26 = arith.constant 0 : index
    %c0_27 = arith.constant 0 : index
    %28 = vector.load %arg7[%c2_25, %c0_26, %c0_27] : memref<9x32x64xf32, #tpu.memory_space<vmem>>, vector<1x32x64xf32>
    %29 = vector.shape_cast %28 : vector<1x32x64xf32> to vector<32x64xf32>
    %cst_28 = arith.constant dense<0.000000e+00> : vector<288x64xf32>
    %30 = tpu.matmul %27, %29, %cst_28 {dimension_numbers = #tpu.dot_dimension_numbers<[1], [0], [0], [1], [0, 0, 1, 1], [], []>} : vector<288x32xf32>, vector<32x64xf32>, vector<288x64xf32> -> vector<288x64xf32>
    %31 = arith.addf %26, %30 : vector<288x64xf32>
    %c18 = arith.constant 18 : index
    %c0_29 = arith.constant 0 : index
    %32 = vector.load %arg12[%c18, %c0_29] : memref<342x32xf32, #tpu.memory_space<vmem>>, vector<288x32xf32>
    %c3 = arith.constant 3 : index
    %c0_30 = arith.constant 0 : index
    %c0_31 = arith.constant 0 : index
    %33 = vector.load %arg7[%c3, %c0_30, %c0_31] : memref<9x32x64xf32, #tpu.memory_space<vmem>>, vector<1x32x64xf32>
    %34 = vector.shape_cast %33 : vector<1x32x64xf32> to vector<32x64xf32>
    %cst_32 = arith.constant dense<0.000000e+00> : vector<288x64xf32>
    %35 = tpu.matmul %32, %34, %cst_32 {dimension_numbers = #tpu.dot_dimension_numbers<[1], [0], [0], [1], [0, 0, 1, 1], [], []>} : vector<288x32xf32>, vector<32x64xf32>, vector<288x64xf32> -> vector<288x64xf32>
    %36 = arith.addf %31, %35 : vector<288x64xf32>
    %c19 = arith.constant 19 : index
    %c0_33 = arith.constant 0 : index
    %37 = vector.load %arg12[%c19, %c0_33] : memref<342x32xf32, #tpu.memory_space<vmem>>, vector<288x32xf32>
    %c4 = arith.constant 4 : index
    %c0_34 = arith.constant 0 : index
    %c0_35 = arith.constant 0 : index
    %38 = vector.load %arg7[%c4, %c0_34, %c0_35] : memref<9x32x64xf32, #tpu.memory_space<vmem>>, vector<1x32x64xf32>
    %39 = vector.shape_cast %38 : vector<1x32x64xf32> to vector<32x64xf32>
    %cst_36 = arith.constant dense<0.000000e+00> : vector<288x64xf32>
    %40 = tpu.matmul %37, %39, %cst_36 {dimension_numbers = #tpu.dot_dimension_numbers<[1], [0], [0], [1], [0, 0, 1, 1], [], []>} : vector<288x32xf32>, vector<32x64xf32>, vector<288x64xf32> -> vector<288x64xf32>
    %41 = arith.addf %36, %40 : vector<288x64xf32>
    %c20 = arith.constant 20 : index
    %c0_37 = arith.constant 0 : index
    %42 = vector.load %arg12[%c20, %c0_37] : memref<342x32xf32, #tpu.memory_space<vmem>>, vector<288x32xf32>
    %c5 = arith.constant 5 : index
    %c0_38 = arith.constant 0 : index
    %c0_39 = arith.constant 0 : index
    %43 = vector.load %arg7[%c5, %c0_38, %c0_39] : memref<9x32x64xf32, #tpu.memory_space<vmem>>, vector<1x32x64xf32>
    %44 = vector.shape_cast %43 : vector<1x32x64xf32> to vector<32x64xf32>
    %cst_40 = arith.constant dense<0.000000e+00> : vector<288x64xf32>
    %45 = tpu.matmul %42, %44, %cst_40 {dimension_numbers = #tpu.dot_dimension_numbers<[1], [0], [0], [1], [0, 0, 1, 1], [], []>} : vector<288x32xf32>, vector<32x64xf32>, vector<288x64xf32> -> vector<288x64xf32>
    %46 = arith.addf %41, %45 : vector<288x64xf32>
    %c36 = arith.constant 36 : index
    %c0_41 = arith.constant 0 : index
    %47 = vector.load %arg12[%c36, %c0_41] : memref<342x32xf32, #tpu.memory_space<vmem>>, vector<288x32xf32>
    %c6 = arith.constant 6 : index
    %c0_42 = arith.constant 0 : index
    %c0_43 = arith.constant 0 : index
    %48 = vector.load %arg7[%c6, %c0_42, %c0_43] : memref<9x32x64xf32, #tpu.memory_space<vmem>>, vector<1x32x64xf32>
    %49 = vector.shape_cast %48 : vector<1x32x64xf32> to vector<32x64xf32>
    %cst_44 = arith.constant dense<0.000000e+00> : vector<288x64xf32>
    %50 = tpu.matmul %47, %49, %cst_44 {dimension_numbers = #tpu.dot_dimension_numbers<[1], [0], [0], [1], [0, 0, 1, 1], [], []>} : vector<288x32xf32>, vector<32x64xf32>, vector<288x64xf32> -> vector<288x64xf32>
    %51 = arith.addf %46, %50 : vector<288x64xf32>
    %c37 = arith.constant 37 : index
    %c0_45 = arith.constant 0 : index
    %52 = vector.load %arg12[%c37, %c0_45] : memref<342x32xf32, #tpu.memory_space<vmem>>, vector<288x32xf32>
    %c7 = arith.constant 7 : index
    %c0_46 = arith.constant 0 : index
    %c0_47 = arith.constant 0 : index
    %53 = vector.load %arg7[%c7, %c0_46, %c0_47] : memref<9x32x64xf32, #tpu.memory_space<vmem>>, vector<1x32x64xf32>
    %54 = vector.shape_cast %53 : vector<1x32x64xf32> to vector<32x64xf32>
    %cst_48 = arith.constant dense<0.000000e+00> : vector<288x64xf32>
    %55 = tpu.matmul %52, %54, %cst_48 {dimension_numbers = #tpu.dot_dimension_numbers<[1], [0], [0], [1], [0, 0, 1, 1], [], []>} : vector<288x32xf32>, vector<32x64xf32>, vector<288x64xf32> -> vector<288x64xf32>
    %56 = arith.addf %51, %55 : vector<288x64xf32>
    %c38 = arith.constant 38 : index
    %c0_49 = arith.constant 0 : index
    %57 = vector.load %arg12[%c38, %c0_49] : memref<342x32xf32, #tpu.memory_space<vmem>>, vector<288x32xf32>
    %c8 = arith.constant 8 : index
    %c0_50 = arith.constant 0 : index
    %c0_51 = arith.constant 0 : index
    %58 = vector.load %arg7[%c8, %c0_50, %c0_51] : memref<9x32x64xf32, #tpu.memory_space<vmem>>, vector<1x32x64xf32>
    %59 = vector.shape_cast %58 : vector<1x32x64xf32> to vector<32x64xf32>
    %cst_52 = arith.constant dense<0.000000e+00> : vector<288x64xf32>
    %60 = tpu.matmul %57, %59, %cst_52 {dimension_numbers = #tpu.dot_dimension_numbers<[1], [0], [0], [1], [0, 0, 1, 1], [], []>} : vector<288x32xf32>, vector<32x64xf32>, vector<288x64xf32> -> vector<288x64xf32>
    %61 = arith.addf %56, %60 : vector<288x64xf32>
    %cst_53 = arith.constant 0.000000e+00 : f32
    %62 = vector.broadcast %cst_53 : f32 to vector<342x64xf32>
    %c0_54 = arith.constant 0 : index
    %c0_55 = arith.constant 0 : index
    %63 = vector.load %arg13[%c0_54, %c0_55] : memref<342x64xf32, #tpu.memory_space<vmem>>, vector<342x64xf32>
    tpu.vector_store %arg13[%c0_54, %c0_55], %62 {strides = array<i32>} : memref<342x64xf32, #tpu.memory_space<vmem>>, vector<342x64xf32>,
    %c19_56 = arith.constant 19 : index
    %c0_57 = arith.constant 0 : index
    %64 = vector.load %arg2[%c19_56, %c0_57] : memref<342x1xf32, #tpu.memory_space<vmem>>, vector<288x1xf32>
    %c0_58 = arith.constant 0 : index
    %c0_59 = arith.constant 0 : index
    %c0_60 = arith.constant 0 : index
    %65 = vector.load %arg5[%c0_58, %c0_59, %c0_60] : memref<1x1x64xf32, #tpu.memory_space<vmem>>, vector<1x1x64xf32>
    %66 = vector.shape_cast %65 : vector<1x1x64xf32> to vector<1x64xf32>
    %67 = vector.broadcast %66 : vector<1x64xf32> to vector<288x64xf32>
    %68 = arith.mulf %67, %61 : vector<288x64xf32>
    %c0_61 = arith.constant 0 : index
    %c0_62 = arith.constant 0 : index
    %c0_63 = arith.constant 0 : index
    %69 = vector.load %arg6[%c0_61, %c0_62, %c0_63] : memref<1x1x64xf32, #tpu.memory_space<vmem>>, vector<1x1x64xf32>
    %70 = vector.shape_cast %69 : vector<1x1x64xf32> to vector<1x64xf32>
    %71 = vector.broadcast %70 : vector<1x64xf32> to vector<288x64xf32>
    %72 = arith.addf %68, %71 : vector<288x64xf32>
    %cst_64 = arith.constant 0.000000e+00 : f32
    %73 = vector.broadcast %cst_64 : f32 to vector<288x64xf32>
    %74 = arith.maximumf %72, %73 : vector<288x64xf32>
    %75 = vector.broadcast %64 : vector<288x1xf32> to vector<288x64xf32>
    %76 = arith.mulf %75, %74 : vector<288x64xf32>
    %c19_65 = arith.constant 19 : index
    %c0_66 = arith.constant 0 : index
    %77 = vector.load %arg13[%c19_65, %c0_66] : memref<342x64xf32, #tpu.memory_space<vmem>>, vector<288x64xf32>
    tpu.vector_store %arg13[%c19_65, %c0_66], %76 {strides = array<i32>} : memref<342x64xf32, #tpu.memory_space<vmem>>, vector<288x64xf32>,
    %cst_67 = arith.constant 0.000000e+00 : f32
    %78 = vector.broadcast %cst_67 : f32 to vector<288x64xf32>
    %c0_68 = arith.constant 0 : index
    %c0_69 = arith.constant 0 : index
    %79 = vector.load %arg13[%c0_68, %c0_69] : memref<342x64xf32, #tpu.memory_space<vmem>>, vector<288x64xf32>
    %c0_70 = arith.constant 0 : index
    %c0_71 = arith.constant 0 : index
    %c0_72 = arith.constant 0 : index
    %80 = vector.load %arg8[%c0_70, %c0_71, %c0_72] : memref<9x64x64xf32, #tpu.memory_space<vmem>>, vector<1x64x64xf32>
    %81 = vector.shape_cast %80 : vector<1x64x64xf32> to vector<64x64xf32>
    %cst_73 = arith.constant dense<0.000000e+00> : vector<288x64xf32>
    %82 = tpu.matmul %79, %81, %cst_73 {dimension_numbers = #tpu.dot_dimension_numbers<[1], [0], [0], [1], [0, 0, 1, 1], [], []>} : vector<288x64xf32>, vector<64x64xf32>, vector<288x64xf32> -> vector<288x64xf32>
    %83 = arith.addf %78, %82 : vector<288x64xf32>
    %c1_74 = arith.constant 1 : index
    %c0_75 = arith.constant 0 : index
    %84 = vector.load %arg13[%c1_74, %c0_75] : memref<342x64xf32, #tpu.memory_space<vmem>>, vector<288x64xf32>
    %c1_76 = arith.constant 1 : index
    %c0_77 = arith.constant 0 : index
    %c0_78 = arith.constant 0 : index
    %85 = vector.load %arg8[%c1_76, %c0_77, %c0_78] : memref<9x64x64xf32, #tpu.memory_space<vmem>>, vector<1x64x64xf32>
    %86 = vector.shape_cast %85 : vector<1x64x64xf32> to vector<64x64xf32>
    %cst_79 = arith.constant dense<0.000000e+00> : vector<288x64xf32>
    %87 = tpu.matmul %84, %86, %cst_79 {dimension_numbers = #tpu.dot_dimension_numbers<[1], [0], [0], [1], [0, 0, 1, 1], [], []>} : vector<288x64xf32>, vector<64x64xf32>, vector<288x64xf32> -> vector<288x64xf32>
    %88 = arith.addf %83, %87 : vector<288x64xf32>
    %c2_80 = arith.constant 2 : index
    %c0_81 = arith.constant 0 : index
    %89 = vector.load %arg13[%c2_80, %c0_81] : memref<342x64xf32, #tpu.memory_space<vmem>>, vector<288x64xf32>
    %c2_82 = arith.constant 2 : index
    %c0_83 = arith.constant 0 : index
    %c0_84 = arith.constant 0 : index
    %90 = vector.load %arg8[%c2_82, %c0_83, %c0_84] : memref<9x64x64xf32, #tpu.memory_space<vmem>>, vector<1x64x64xf32>
    %91 = vector.shape_cast %90 : vector<1x64x64xf32> to vector<64x64xf32>
    %cst_85 = arith.constant dense<0.000000e+00> : vector<288x64xf32>
    %92 = tpu.matmul %89, %91, %cst_85 {dimension_numbers = #tpu.dot_dimension_numbers<[1], [0], [0], [1], [0, 0, 1, 1], [], []>} : vector<288x64xf32>, vector<64x64xf32>, vector<288x64xf32> -> vector<288x64xf32>
    %93 = arith.addf %88, %92 : vector<288x64xf32>
    %c18_86 = arith.constant 18 : index
    %c0_87 = arith.constant 0 : index
    %94 = vector.load %arg13[%c18_86, %c0_87] : memref<342x64xf32, #tpu.memory_space<vmem>>, vector<288x64xf32>
    %c3_88 = arith.constant 3 : index
    %c0_89 = arith.constant 0 : index
    %c0_90 = arith.constant 0 : index
    %95 = vector.load %arg8[%c3_88, %c0_89, %c0_90] : memref<9x64x64xf32, #tpu.memory_space<vmem>>, vector<1x64x64xf32>
    %96 = vector.shape_cast %95 : vector<1x64x64xf32> to vector<64x64xf32>
    %cst_91 = arith.constant dense<0.000000e+00> : vector<288x64xf32>
    %97 = tpu.matmul %94, %96, %cst_91 {dimension_numbers = #tpu.dot_dimension_numbers<[1], [0], [0], [1], [0, 0, 1, 1], [], []>} : vector<288x64xf32>, vector<64x64xf32>, vector<288x64xf32> -> vector<288x64xf32>
    %98 = arith.addf %93, %97 : vector<288x64xf32>
    %c19_92 = arith.constant 19 : index
    %c0_93 = arith.constant 0 : index
    %99 = vector.load %arg13[%c19_92, %c0_93] : memref<342x64xf32, #tpu.memory_space<vmem>>, vector<288x64xf32>
    %c4_94 = arith.constant 4 : index
    %c0_95 = arith.constant 0 : index
    %c0_96 = arith.constant 0 : index
    %100 = vector.load %arg8[%c4_94, %c0_95, %c0_96] : memref<9x64x64xf32, #tpu.memory_space<vmem>>, vector<1x64x64xf32>
    %101 = vector.shape_cast %100 : vector<1x64x64xf32> to vector<64x64xf32>
    %cst_97 = arith.constant dense<0.000000e+00> : vector<288x64xf32>
    %102 = tpu.matmul %99, %101, %cst_97 {dimension_numbers = #tpu.dot_dimension_numbers<[1], [0], [0], [1], [0, 0, 1, 1], [], []>} : vector<288x64xf32>, vector<64x64xf32>, vector<288x64xf32> -> vector<288x64xf32>
    %103 = arith.addf %98, %102 : vector<288x64xf32>
    %c20_98 = arith.constant 20 : index
    %c0_99 = arith.constant 0 : index
    %104 = vector.load %arg13[%c20_98, %c0_99] : memref<342x64xf32, #tpu.memory_space<vmem>>, vector<288x64xf32>
    %c5_100 = arith.constant 5 : index
    %c0_101 = arith.constant 0 : index
    %c0_102 = arith.constant 0 : index
    %105 = vector.load %arg8[%c5_100, %c0_101, %c0_102] : memref<9x64x64xf32, #tpu.memory_space<vmem>>, vector<1x64x64xf32>
    %106 = vector.shape_cast %105 : vector<1x64x64xf32> to vector<64x64xf32>
    %cst_103 = arith.constant dense<0.000000e+00> : vector<288x64xf32>
    %107 = tpu.matmul %104, %106, %cst_103 {dimension_numbers = #tpu.dot_dimension_numbers<[1], [0], [0], [1], [0, 0, 1, 1], [], []>} : vector<288x64xf32>, vector<64x64xf32>, vector<288x64xf32> -> vector<288x64xf32>
    %108 = arith.addf %103, %107 : vector<288x64xf32>
    %c36_104 = arith.constant 36 : index
    %c0_105 = arith.constant 0 : index
    %109 = vector.load %arg13[%c36_104, %c0_105] : memref<342x64xf32, #tpu.memory_space<vmem>>, vector<288x64xf32>
    %c6_106 = arith.constant 6 : index
    %c0_107 = arith.constant 0 : index
    %c0_108 = arith.constant 0 : index
    %110 = vector.load %arg8[%c6_106, %c0_107, %c0_108] : memref<9x64x64xf32, #tpu.memory_space<vmem>>, vector<1x64x64xf32>
    %111 = vector.shape_cast %110 : vector<1x64x64xf32> to vector<64x64xf32>
    %cst_109 = arith.constant dense<0.000000e+00> : vector<288x64xf32>
    %112 = tpu.matmul %109, %111, %cst_109 {dimension_numbers = #tpu.dot_dimension_numbers<[1], [0], [0], [1], [0, 0, 1, 1], [], []>} : vector<288x64xf32>, vector<64x64xf32>, vector<288x64xf32> -> vector<288x64xf32>
    %113 = arith.addf %108, %112 : vector<288x64xf32>
    %c37_110 = arith.constant 37 : index
    %c0_111 = arith.constant 0 : index
    %114 = vector.load %arg13[%c37_110, %c0_111] : memref<342x64xf32, #tpu.memory_space<vmem>>, vector<288x64xf32>
    %c7_112 = arith.constant 7 : index
    %c0_113 = arith.constant 0 : index
    %c0_114 = arith.constant 0 : index
    %115 = vector.load %arg8[%c7_112, %c0_113, %c0_114] : memref<9x64x64xf32, #tpu.memory_space<vmem>>, vector<1x64x64xf32>
    %116 = vector.shape_cast %115 : vector<1x64x64xf32> to vector<64x64xf32>
    %cst_115 = arith.constant dense<0.000000e+00> : vector<288x64xf32>
    %117 = tpu.matmul %114, %116, %cst_115 {dimension_numbers = #tpu.dot_dimension_numbers<[1], [0], [0], [1], [0, 0, 1, 1], [], []>} : vector<288x64xf32>, vector<64x64xf32>, vector<288x64xf32> -> vector<288x64xf32>
    %118 = arith.addf %113, %117 : vector<288x64xf32>
    %c38_116 = arith.constant 38 : index
    %c0_117 = arith.constant 0 : index
    %119 = vector.load %arg13[%c38_116, %c0_117] : memref<342x64xf32, #tpu.memory_space<vmem>>, vector<288x64xf32>
    %c8_118 = arith.constant 8 : index
    %c0_119 = arith.constant 0 : index
    %c0_120 = arith.constant 0 : index
    %120 = vector.load %arg8[%c8_118, %c0_119, %c0_120] : memref<9x64x64xf32, #tpu.memory_space<vmem>>, vector<1x64x64xf32>
    %121 = vector.shape_cast %120 : vector<1x64x64xf32> to vector<64x64xf32>
    %cst_121 = arith.constant dense<0.000000e+00> : vector<288x64xf32>
    %122 = tpu.matmul %119, %121, %cst_121 {dimension_numbers = #tpu.dot_dimension_numbers<[1], [0], [0], [1], [0, 0, 1, 1], [], []>} : vector<288x64xf32>, vector<64x64xf32>, vector<288x64xf32> -> vector<288x64xf32>
    %123 = arith.addf %118, %122 : vector<288x64xf32>
    %c0_122 = arith.constant 0 : index
    %c19_123 = arith.constant 19 : index
    %c0_124 = arith.constant 0 : index
    %124 = vector.load %arg1[%c0_122, %c19_123, %c0_124] : memref<1x342x32xf32, #tpu.memory_space<vmem>>, vector<1x288x32xf32>
    %125 = vector.shape_cast %124 : vector<1x288x32xf32> to vector<288x32xf32>
    %c0_125 = arith.constant 0 : index
    %c0_126 = arith.constant 0 : index
    %126 = vector.load %arg9[%c0_125, %c0_126] : memref<32x64xf32, #tpu.memory_space<vmem>>, vector<32x64xf32>
    %cst_127 = arith.constant dense<0.000000e+00> : vector<288x64xf32>
    %127 = tpu.matmul %125, %126, %cst_127 {dimension_numbers = #tpu.dot_dimension_numbers<[1], [0], [0], [1], [0, 0, 1, 1], [], []>} : vector<288x32xf32>, vector<32x64xf32>, vector<288x64xf32> -> vector<288x64xf32>
    %c0_128 = arith.constant 0 : index
    %c0_129 = arith.constant 0 : index
    %128 = vector.load %arg10[%c0_128, %c0_129] : memref<1x64xf32, #tpu.memory_space<vmem>>, vector<1x64xf32>
    %129 = vector.broadcast %128 : vector<1x64xf32> to vector<288x64xf32>
    %130 = arith.addf %123, %129 : vector<288x64xf32>
    %131 = arith.addf %130, %127 : vector<288x64xf32>
    %c0_130 = arith.constant 0 : index
    %c0_131 = arith.constant 0 : index
    %c0_132 = arith.constant 0 : index
    %132 = vector.load %arg11[%c0_130, %c0_131, %c0_132] : memref<1x288x64xf32, #tpu.memory_space<vmem>>, vector<1x288x64xf32>
    %133 = vector.shape_cast %132 : vector<1x288x64xf32> to vector<288x64xf32>
    %134 = vector.shape_cast %131 : vector<288x64xf32> to vector<1x288x64xf32>
    tpu.vector_store %arg11[%c0_130, %c0_131, %c0_132], %134 {strides = array<i32>} : memref<1x288x64xf32, #tpu.memory_space<vmem>>, vector<1x288x64xf32>,
    return
  }
  func.func @transform_0(%arg0: i32) -> (i32, i32, i32) {
    %c0_i32 = arith.constant 0 : i32
    %c0_i32_0 = arith.constant 0 : i32
    %c0_i32_1 = arith.constant 0 : i32
    return %arg0, %c0_i32, %c0_i32_0 : i32, i32, i32
  }
  func.func @transform_1(%arg0: i32) -> (i32, i32) {
    %c0_i32 = arith.constant 0 : i32
    %c0_i32_0 = arith.constant 0 : i32
    %c0_i32_1 = arith.constant 0 : i32
    return %c0_i32, %c0_i32_0 : i32, i32
  }
  func.func @transform_2(%arg0: i32) -> (i32, i32, i32) {
    %c0_i32 = arith.constant 0 : i32
    %c0_i32_0 = arith.constant 0 : i32
    %c0_i32_1 = arith.constant 0 : i32
    return %arg0, %c0_i32, %c0_i32_0 : i32, i32, i32
  }
  func.func @transform_3(%arg0: i32) -> (i32, i32, i32) {
    %c0_i32 = arith.constant 0 : i32
    %c0_i32_0 = arith.constant 0 : i32
    %c0_i32_1 = arith.constant 0 : i32
    return %arg0, %c0_i32, %c0_i32_0 : i32, i32, i32
  }
  func.func @transform_4(%arg0: i32) -> (i32, i32, i32) {
    %c0_i32 = arith.constant 0 : i32
    %c0_i32_0 = arith.constant 0 : i32
    %c0_i32_1 = arith.constant 0 : i32
    return %arg0, %c0_i32, %c0_i32_0 : i32, i32, i32
  }
  func.func @transform_5(%arg0: i32) -> (i32, i32, i32) {
    %c0_i32 = arith.constant 0 : i32
    %c0_i32_0 = arith.constant 0 : i32
    %c0_i32_1 = arith.constant 0 : i32
    return %arg0, %c0_i32, %c0_i32_0 : i32, i32, i32
  }
  func.func @transform_6(%arg0: i32) -> (i32, i32, i32) {
    %c0_i32 = arith.constant 0 : i32
    %c0_i32_0 = arith.constant 0 : i32
    %c0_i32_1 = arith.constant 0 : i32
    %c0_i32_2 = arith.constant 0 : i32
    return %c0_i32, %c0_i32_0, %c0_i32_1 : i32, i32, i32
  }
  func.func @transform_7(%arg0: i32) -> (i32, i32, i32) {
    %c0_i32 = arith.constant 0 : i32
    %c0_i32_0 = arith.constant 0 : i32
    %c0_i32_1 = arith.constant 0 : i32
    %c0_i32_2 = arith.constant 0 : i32
    return %c0_i32, %c0_i32_0, %c0_i32_1 : i32, i32, i32
  }
  func.func @transform_8(%arg0: i32) -> (i32, i32) {
    %c0_i32 = arith.constant 0 : i32
    %c0_i32_0 = arith.constant 0 : i32
    %c0_i32_1 = arith.constant 0 : i32
    return %c0_i32, %c0_i32_0 : i32, i32
  }
  func.func @transform_9(%arg0: i32) -> (i32, i32) {
    %c0_i32 = arith.constant 0 : i32
    %c0_i32_0 = arith.constant 0 : i32
    %c0_i32_1 = arith.constant 0 : i32
    return %c0_i32, %c0_i32_0 : i32, i32
  }
  func.func @transform_10(%arg0: i32) -> (i32, i32, i32) {
    %c0_i32 = arith.constant 0 : i32
    %c0_i32_0 = arith.constant 0 : i32
    %c0_i32_1 = arith.constant 0 : i32
    return %arg0, %c0_i32, %c0_i32_0 : i32, i32, i32
  }
}

</mosaic_0001>

<bundles_post_ra>
// kernel: tpu_custom_call.1
= control target key start
LH: loop header
LB: loop body
LE: loop exit
PB: predicated region body
PF: predicated region fallthrough
CT: control target
= control target key end

     0   :  { %s13433_s13 = smov 0   ;;  %s15795_s0 = inlined_call_operand.vmem [shape: f32[2,342,32], index: 0, kind: input, shape index: {}]   ;;  %s15796_s1 = inlined_call_operand.vmem [shape: f32[342,1], index: 1, kind: input, shape index: {}]   ;;  %s15797_s2 = inlined_call_operand.vmem [shape: f32[2,1,32], index: 2, kind: input, shape index: {}]   ;;  %s15798_s3 = inlined_call_operand.vmem [shape: f32[2,1,32], index: 3, kind: input, shape index: {}]   ;;  %s15799_s4 = inlined_call_operand.vmem [shape: f32[2,1,64], index: 4, kind: input, shape index: {}]   ;;  %s15800_s5 = inlined_call_operand.vmem [shape: f32[2,1,64], index: 5, kind: input, shape index: {}]   ;;  %s15801_s6 = inlined_call_operand.vmem [shape: f32[9,32,64], index: 6, kind: input, shape index: {}]   ;;  %s15802_s7 = inlined_call_operand.vmem [shape: f32[9,64,64], index: 7, kind: input, shape index: {}]   ;;  %s15803_s8 = inlined_call_operand.vmem [shape: f32[32,64], index: 8, kind: input, shape index: {}]   ;;  %s15804_s9 = inlined_call_operand.vmem [shape: f32[1,64], index: 9, kind: input, shape index: {}]   ;;  %s15805_s10 = inlined_call_operand.vmem [shape: f32[2,288,64], index: 10, kind: output, shape index: {}]  }
   0x1 LB: > { %s9632_s14 = sadd.s32 4294967295, %s13374_s13   ;;  %p9636_p0 = scmp.ge.s32.totalorder %s13374_s13, 1  ;;  %s13374_s13 = sphi %s13433_s13, %s20_s13  }
   0x2   : > { %p344_p1 = scmp.lt.s32.totalorder %s13374_s13, 3 }
   0x4   : > { %p345_p2 = pnand %p9636_p0, %p344_p1 }
   0x6   : > { %348 = sbr.rel (%p345_p2) target bundleno = 1892 (0x764), region = 60 }
   0xd   : > { %v418_v0 = vld [vmem:[%s15796_s1 + $0x10] sm:$0xff]  ;;  %v416_v1 = vld [vmem:[%s15796_s1] sm:$0xff]  ;;  %v13376_v2 = vmov 0   ;;  %v419_v3 = vld [vmem:[%s15796_s1 + $0x18] sm:$0xff]  ;;  %p394_p3 = scmp.lt.s32.totalorder %s9632_s14, 1  ;;  %vm903_vm0 = vcmask 261120  }
   0xe   : > { %13365 = vset.pattern.permute.xlu1 %v13376_v2  ;;  %13364 = vset.pattern.permute.xlu0 %v13376_v2  ;;  %v417_v4 = vld [vmem:[%s15796_s1 + $0x8] sm:$0xff]  ;;  %v420_v6 = vld [vmem:[%s15796_s1 + $0x20] sm:$0xff]  ;;  %v423_v7 = vld [vmem:[%s15796_s1 + $0x38] sm:$0xff]  ;;  %vm4745_vm1 = vcmask 523264  }
   0xf   : > { %657 = vperm.xlu1 %13365, %v418_v0   ;;  %647 = vperm.xlu0 %13364, %v416_v1   ;;  %v421_v5 = vld [vmem:[%s15796_s1 + $0x28] sm:$0xff]  ;;  %v422_v8 = vld [vmem:[%s15796_s1 + $0x30] sm:$0xff]  ;;  %v424_v10 = vld [vmem:[%s15796_s1 + $0x40] sm:$0xff]  ;;  %s15833_s14 = smov (!%p394_p3, %s9632_s14), 1 }
  0x10   : > { %v425_v9 = vld [vmem:[%s15796_s1 + $0x48] sm:$0xff]  ;;  %v427_v11 = vld [vmem:[%s15796_s1 + $0x58] sm:$0xff]  ;;  %v426_v12 = vld [vmem:[%s15796_s1 + $0x50] sm:$0xff]  ;;  %s13352_s11 = smul.u32 344, %s15833_s14  ;;  %s401_s23 = scalar_lea.vmem %s15797_s2, %s15833_s14 }
  0x11   : > { %v429_v13 = vld [vmem:[%s15796_s1 + $0x68] sm:$0xff]  ;;  %v428_v14 = vld [vmem:[%s15796_s1 + $0x60] sm:$0xff]  ;;  %v9643_v18 = vld [vmem:[%s15801_s6 + $0x30] sm:$0xff]  ;;  %s404_s30 = scalar_lea.vmem %s15798_s3, %s15833_s14  ;;  %s407_s12 = scalar_lea.vmem %s15799_s4, %s15833_s14 }
  0x12   : > { %v9641_v15 = vld [vmem:[%s15801_s6 + $0x20] sm:$0xff]  ;;  %v9642_v16 = vld [vmem:[%s15801_s6 + $0x28] sm:$0xff]  ;;  %v431_v19 = vld [vmem:[%s15796_s1 + $0x78] sm:$0xff]  ;;  %s13646_s20 = scalar_lea.vmem %s15795_s0, %s13352_s11  ;;  %s410_s17 = scalar_lea.vmem %s15800_s5, %s15833_s14 }
  0x13   : > { %662 = vperm.xlu1 %13365, %v419_v3   ;;  %652 = vperm.xlu0 %13364, %v417_v4   ;;  %v12472_v17 = vpack.c.bf16 %v9642_v16, %v9641_v15  ;;  %v430_v20 = vld [vmem:[%s15796_s1 + $0x70] sm:$0xff]  ;;  %v9644_v21 = vld [vmem:[%s15801_s6 + $0x38] sm:$0xff]  ;;  %v984_v23 = vld [vmem:[%s15801_s6] sm:$0xff] }
  0x14   : > { %v12476_v22 = vpack.c.bf16 %v9644_v21, %v9643_v18  ;;  %v985_v24 = vld [vmem:[%s15801_s6 + $0x8] sm:$0xff]  ;;  %v432_v26 = vld [vmem:[%s15796_s1 + $0x80] sm:$0xff]  ;;  %v435_v28 = vld [vmem:[%s15796_s1 + $0x98] sm:$0xff] }
  0x15   : > { %12473 = vmatprep.subr.bf16.mxu0 %v12472_v17  ;;  %v433_v25 = vld [vmem:[%s15796_s1 + $0x88] sm:$0xff]  ;;  %v13513_v27 = vpack.c.bf16 %v985_v24, %v984_v23  ;;  %v434_v29 = vld [vmem:[%s15796_s1 + $0x90] sm:$0xff]  ;;  %v436_v31 = vld [vmem:[%s15796_s1 + $0xa0] sm:$0xff] }
  0x16   : > { %12475 = vmatpush3.bf16.msra.mxu0 %v12472_v17  ;;  %v437_v30 = vld [vmem:[%s15796_s1 + $0xa8] sm:$0xff]  ;;  %v439_v32 = vld [vmem:[%s15796_s1 + $0xb8] sm:$0xff]  ;;  %v438_v33 = vld [vmem:[%s15796_s1 + $0xb0] sm:$0xff] }
  0x17   : > { %672 = vperm.xlu1 %13365, %v421_v5   ;;  %667 = vperm.xlu0 %13364, %v420_v6   ;;  %v441_v34 = vld [vmem:[%s15796_s1 + $0xc8] sm:$0xff]  ;;  %v440_v35 = vld [vmem:[%s15796_s1 + $0xc0] sm:$0xff]  ;;  %v443_v36 = vld [vmem:[%s15796_s1 + $0xd8] sm:$0xff] }
  0x18   : > { %12477 = vmatprep.subr.bf16.mxu0 %v12476_v22  ;;  %v442_v37 = vld [vmem:[%s15796_s1 + $0xd0] sm:$0xff]  ;;  %v445_v38 = vld [vmem:[%s15796_s1 + $0xe8] sm:$0xff]  ;;  %v444_v39 = vld [vmem:[%s15796_s1 + $0xe0] sm:$0xff] }
  0x19   : > { %v447_v40 = vld [vmem:[%s15796_s1 + $0xf8] sm:$0xff]  ;;  %v446_v41 = vld [vmem:[%s15796_s1 + $0xf0] sm:$0xff]  ;;  %v449_v42 = vld [vmem:[%s15796_s1 + $0x108] sm:$0xff] }
  0x1a   : > { %12479 = vmatpush3.bf16.msra.mxu0 %v12476_v22  ;;  %v448_v43 = vld [vmem:[%s15796_s1 + $0x100] sm:$0xff]  ;;  %v451_v44 = vld [vmem:[%s15796_s1 + $0x118] sm:$0xff]  ;;  %v450_v45 = vld [vmem:[%s15796_s1 + $0x110] sm:$0xff] }
  0x1b   : > { %682 = vperm.xlu1 %13365, %v423_v7   ;;  %677 = vperm.xlu0 %13364, %v422_v8   ;;  %v453_v46 = vld [vmem:[%s15796_s1 + $0x128] sm:$0xff]  ;;  %v452_v47 = vld [vmem:[%s15796_s1 + $0x120] sm:$0xff]  ;;  %v455_v48 = vld [vmem:[%s15796_s1 + $0x138] sm:$0xff] }
  0x1c   : > { %12481 = vmatprep.subr.bf16.mxu0 %v13513_v27  ;;  %v454_v49 = vld [vmem:[%s15796_s1 + $0x130] sm:$0xff]  ;;  %v4807_v50 = vld [vmem:[%s15796_s1 + $0x9b] sm:$0xff]  ;;  %v4808_v53 = vld [vmem:[%s15796_s1 + $0xa3] sm:$0xff] }
  0x1d   : > { %v456_v51 = vld [vmem:[%s15796_s1 + $0x140] sm:$0xff]  ;;  %v4809_v52 = vld [vmem:[%s15796_s1 + $0xab] sm:$0xff]  ;;  %v4810_v55 = vld [vmem:[%s15796_s1 + $0xb3] sm:$0xff] }
  0x1e   : > { %v4811_v54 = vld [vmem:[%s15796_s1 + $0xbb] sm:$0xff]  ;;  %v4813_v56 = vld [vmem:[%s15796_s1 + $0xcb] sm:$0xff]  ;;  %v4812_v57 = vld [vmem:[%s15796_s1 + $0xc3] sm:$0xff] }
  0x1f   : > { %692 = vperm.xlu1 %13365, %v425_v9   ;;  %687 = vperm.xlu0 %13364, %v424_v10   ;;  %v4815_v58 = vld [vmem:[%s15796_s1 + $0xdb] sm:$0xff]  ;;  %v4814_v59 = vld [vmem:[%s15796_s1 + $0xd3] sm:$0xff]  ;;  %v4817_v60 = vld [vmem:[%s15796_s1 + $0xeb] sm:$0xff] }
  0x20   : > { %v4816_v61 = vld [vmem:[%s15796_s1 + $0xe3] sm:$0xff]  ;;  %v4819_v62 = vld [vmem:[%s15796_s1 + $0xfb] sm:$0xff]  ;;  %v4818_v63 = vld [vmem:[%s15796_s1 + $0xf3] sm:$0xff] }
  0x21   : > { %v4821_v0 = vld [vmem:[%s15796_s1 + $0x10b] sm:$0xff]  ;;  %v4820_v1 = vld [vmem:[%s15796_s1 + $0x103] sm:$0xff]  ;;  %v4823_v2 = vld [vmem:[%s15796_s1 + $0x11b] sm:$0xff] }
  0x22   : > { %v4822_v3 = vld [vmem:[%s15796_s1 + $0x113] sm:$0xff]  ;;  %v4791_v4 = vld [vmem:[%s15796_s1 + $0x1b] sm:$0xff]  ;;  %v4793_v9 = vld [vmem:[%s15796_s1 + $0x2b] sm:$0xff] }
  0x23   : > { %702 = vperm.xlu1 %13365, %v427_v11   ;;  %697 = vperm.xlu0 %13364, %v426_v12   ;;  %v4790_v5 = vld [vmem:[%s15796_s1 + $0x13] sm:$0xff]  ;;  %v13659_v7 = vld [vmem:[%s401_s23] ss:$0 sm:$0xff]  ;;  %v460_v15 = vld [vmem:[%s13646_s20 + $0x8] sm:$0xff] }
  0x24   : > { %v461_v6 = vld [vmem:[%s13646_s20 + $0x10] sm:$0xff]  ;;  %v459_v8 = vld [vmem:[%s13646_s20] sm:$0xff]  ;;  %v462_v12 = vld [vmem:[%s13646_s20 + $0x18] sm:$0xff] }
  0x25   : > { %v511_v10 = vmul.f32 %v13659_v7, %v461_v6  ;;  %v509_v11 = vmul.f32 %v13659_v7, %v459_v8  ;;  %v512_v16 = vmul.f32 %v13659_v7, %v462_v12  ;;  %v4795_v21 = vld [vmem:[%s15796_s1 + $0x3b] sm:$0xff]  ;;  %v4794_v22 = vld [vmem:[%s15796_s1 + $0x33] sm:$0xff] }
  0x26   : > { %v463_v23 = vld [vmem:[%s13646_s20 + $0x20] sm:$0xff] }
  0x27   : > { %712 = vperm.xlu1 %13365, %v429_v13   ;;  %707 = vperm.xlu0 %13364, %v428_v14   ;;  %v4792_v13 = vld [vmem:[%s15796_s1 + $0x23] sm:$0xff]  ;;  %v13675_v14 = vld [vmem:[%s404_s30] ss:$0 sm:$0xff] }
  0x28   : > { %v561_v17 = vadd.f32 %v13675_v14, %v511_v10  ;;  %v559_v18 = vadd.f32 %v13675_v14, %v509_v11  ;;  %v562_v24 = vadd.f32 %v13675_v14, %v512_v16  ;;  %v472_v10 = vld [vmem:[%s13646_s20 + $0x68] sm:$0xff]  ;;  %v471_v11 = vld [vmem:[%s13646_s20 + $0x60] sm:$0xff] }
  0x29   : > { %v4803_v12 = vld [vmem:[%s15796_s1 + $0x7b] sm:$0xff] }
  0x2b   : > { %722 = vperm.xlu1 %13365, %v431_v19   ;;  %717 = vperm.xlu0 %13364, %v430_v20   ;;  %v510_v19 = vmul.f32 %v13659_v7, %v460_v15  ;;  %v464_v20 = vld [vmem:[%s13646_s20 + $0x28] sm:$0xff] }
  0x2f   : > { %732 = vperm.xlu1 %13365, %v433_v25   ;;  %727 = vperm.xlu0 %13364, %v432_v26   ;;  %v514_v25 = vmul.f32 %v13659_v7, %v464_v20  ;;  %v604_v26 = vmax.f32 %v561_v17, 0.0  ;;  %v521_v20 = vmul.f32 %v13659_v7, %v471_v11 }
  0x33   : > { %742 = vperm.xlu1 %13365, %v435_v28   ;;  %737 = vperm.xlu0 %13364, %v434_v29   ;;  %v602_v28 = vmax.f32 %v559_v18, 0.0  ;;  %v560_v29 = vadd.f32 %v13675_v14, %v510_v19  ;;  %v522_v19 = vmul.f32 %v13659_v7, %v472_v10 }
  0x37   : > { %752 = vperm.xlu1 %13365, %v437_v30   ;;  %747 = vperm.xlu0 %13364, %v436_v31   ;;  %v513_v30 = vmul.f32 %v13659_v7, %v463_v23  ;;  %v466_v31 = vld [vmem:[%s13646_s20 + $0x38] sm:$0xff] }
  0x3b   : > { %762 = vperm.xlu1 %13365, %v439_v32   ;;  %757 = vperm.xlu0 %13364, %v438_v33   ;;  %v465_v32 = vld [vmem:[%s13646_s20 + $0x30] sm:$0xff] }
  0x3c   : > { %v4797_v33 = vld [vmem:[%s15796_s1 + $0x4b] sm:$0xff] }
  0x3f   : > { %772 = vperm.xlu1 %13365, %v441_v34   ;;  %767 = vperm.xlu0 %13364, %v440_v35   ;;  %v4796_v34 = vld [vmem:[%s15796_s1 + $0x43] sm:$0xff] }
  0x43   : > { %782 = vperm.xlu1 %13365, %v443_v36   ;;  %777 = vperm.xlu0 %13364, %v442_v37   ;;  %v605_v37 = vmax.f32 %v562_v24, 0.0 }
  0x47   : > { %792 = vperm.xlu1 %13365, %v445_v38   ;;  %787 = vperm.xlu0 %13364, %v444_v39   ;;  %v564_v38 = vadd.f32 %v13675_v14, %v514_v25  ;;  %v516_v39 = vmul.f32 %v13659_v7, %v466_v31 }
  0x4b   : > { %802 = vperm.xlu1 %13365, %v447_v40   ;;  %797 = vperm.xlu0 %13364, %v446_v41   ;;  %v515_v40 = vmul.f32 %v13659_v7, %v465_v32  ;;  %v4805_v32 = vld [vmem:[%s15796_s1 + $0x8b] sm:$0xff] }
  0x4f   : > { %812 = vperm.xlu1 %13365, %v449_v42   ;;  %807 = vperm.xlu0 %13364, %v448_v43   ;;  %v603_v43 = vmax.f32 %v560_v29, 0.0  ;;  %v473_v29 = vld [vmem:[%s13646_s20 + $0x70] sm:$0xff] }
  0x53   : > { %822 = vperm.xlu1 %13365, %v451_v44   ;;  %817 = vperm.xlu0 %13364, %v450_v45   ;;  %v563_v44 = vadd.f32 %v13675_v14, %v513_v30  ;;  %v468_v45 = vld [vmem:[%s13646_s20 + $0x48] sm:$0xff] }
  0x57   : > { %832 = vperm.xlu1 %13365, %v453_v46   ;;  %827 = vperm.xlu0 %13364, %v452_v47   ;;  %v4799_v46 = vld [vmem:[%s15796_s1 + $0x5b] sm:$0xff]  ;;  %v4798_v47 = vld [vmem:[%s15796_s1 + $0x53] sm:$0xff] }
  0x5b   : > { %842 = vperm.xlu1 %13365, %v455_v48   ;;  %837 = vperm.xlu0 %13364, %v454_v49   ;;  %v467_v48 = vld [vmem:[%s13646_s20 + $0x40] sm:$0xff] }
  0x5f   : > { %5035 = vperm.xlu1 %13365, %v4807_v50   ;;  %847 = vperm.xlu0 %13364, %v456_v51   ;;  %v607_v51 = vmax.f32 %v564_v38, 0.0  ;;  %v571_v38 = vadd.f32 %v13675_v14, %v521_v20 }
  0x63   : > { %5045 = vperm.xlu1 %13365, %v4809_v52   ;;  %5040 = vperm.xlu0 %13364, %v4808_v53   ;;  %v566_v52 = vadd.f32 %v13675_v14, %v516_v39  ;;  %v565_v53 = vadd.f32 %v13675_v14, %v515_v40  ;;  %v523_v40 = vmul.f32 %v13659_v7, %v473_v29 }
  0x65   : > { %v608_v8 = vmax.f32 %v565_v53, 0.0 }
  0x67   : > { %5055 = vperm.xlu1 %13365, %v4811_v54   ;;  %5050 = vperm.xlu0 %13364, %v4810_v55   ;;  %v518_v54 = vmul.f32 %v13659_v7, %v468_v45 }
  0x6b   : > { %5065 = vperm.xlu1 %13365, %v4813_v56   ;;  %5060 = vperm.xlu0 %13364, %v4812_v57   ;;  %v606_v57 = vmax.f32 %v563_v44, 0.0 }
  0x6f   : > { %5075 = vperm.xlu1 %13365, %v4815_v58   ;;  %5070 = vperm.xlu0 %13364, %v4814_v59   ;;  %v517_v58 = vmul.f32 %v13659_v7, %v467_v48  ;;  %v470_v59 = vld [vmem:[%s13646_s20 + $0x58] sm:$0xff]  ;;  %v476_v48 = vld [vmem:[%s13646_s20 + $0x88] sm:$0xff] }
  0x73   : > { %5085 = vperm.xlu1 %13365, %v4817_v60   ;;  %5080 = vperm.xlu0 %13364, %v4816_v61   ;;  %v469_v60 = vld [vmem:[%s13646_s20 + $0x50] sm:$0xff] }
  0x74   : > { %v4801_v61 = vld [vmem:[%s15796_s1 + $0x6b] sm:$0xff] }
  0x77   : > { %5095 = vperm.xlu1 %13365, %v4819_v62   ;;  %5090 = vperm.xlu0 %13364, %v4818_v63   ;;  %v4800_v62 = vld [vmem:[%s15796_s1 + $0x63] sm:$0xff] }
  0x7b   : > { %5105 = vperm.xlu1 %13365, %v4821_v0   ;;  %5100 = vperm.xlu0 %13364, %v4820_v1   ;;  %v609_v1 = vmax.f32 %v566_v52, 0.0 }
  0x7f   : > { %5115 = vperm.xlu1 %13365, %v4823_v2   ;;  %5110 = vperm.xlu0 %13364, %v4822_v3   ;;  %v568_v2 = vadd.f32 %v13675_v14, %v518_v54  ;;  %v520_v3 = vmul.f32 %v13659_v7, %v470_v59  ;;  %v526_v59 = vmul.f32 %v13659_v7, %v476_v48  ;;  %v484_v48 = vld [vmem:[%s13646_s20 + $0xc8] sm:$0xff] }
  0x81   : > { %v611_v17 = vmax.f32 %v568_v2, 0.0  ;;  %v570_v18 = vadd.f32 %v13675_v14, %v520_v3  ;;  %v457_v3 = vld [vmem:[%s15796_s1 + $0x148] sm:$0xff]  ;;  %v576_v10 = vadd.f32 %v13675_v14, %v526_v59 }
  0x83   : > { %4955 = vperm.xlu1 %13365, %v4791_v4   ;;  %4950 = vperm.xlu0 %13364, %v4790_v5   ;;  %v519_v4 = vmul.f32 %v13659_v7, %v469_v60 }
  0x87   : > { %4965 = vperm.xlu1 %13365, %v4793_v9   ;;  %4960 = vperm.xlu0 %13364, %v4792_v13   ;;  %v567_v9 = vadd.f32 %v13675_v14, %v517_v58  ;;  %v4802_v13 = vld [vmem:[%s15796_s1 + $0x73] sm:$0xff]  ;;  %v573_v58 = vadd.f32 %v13675_v14, %v523_v40 }
  0x89   : > { %v610_v25 = vmax.f32 %v567_v9, 0.0 }
  0x8b   : > { %4975 = vperm.xlu1 %13365, %v4795_v21   ;;  %4970 = vperm.xlu0 %13364, %v4794_v22   ;;  %v986_v21 = vld [vmem:[%s15801_s6 + $0x10] sm:$0xff]  ;;  %v987_v22 = vld [vmem:[%s15801_s6 + $0x18] sm:$0xff] }
  0x8e   : > { %v658_v35 = vpop.permute.xlu1 %657  ;;  %v648_v36 = vpop.permute.xlu0 %647 }
  0x8f   : > { %v862_v41 = vmul.f32 %v658_v35, %v604_v26  ;;  %v860_v42 = vmul.f32 %v648_v36, %v602_v28  ;;  %4985 = vperm.xlu1 %13365, %v4797_v33   ;;  %4980 = vperm.xlu0 %13364, %v4796_v34   ;;  %v569_v26 = vadd.f32 %v13675_v14, %v519_v4  ;;  %v474_v28 = vld [vmem:[%s13646_s20 + $0x78] sm:$0xff]  ;;  %v4804_v33 = vld [vmem:[%s15796_s1 + $0x83] sm:$0xff]  ;;  %v4825_v4 = vld [vmem:[%s15796_s1 + $0x12b] sm:$0xff] }
  0x90   : > { %v12484_v34 = vpack.c.bf16 %v987_v22, %v986_v21  ;;  %v524_v39 = vmul.f32 %v13659_v7, %v474_v28  ;;  %v458_v21 = vld [vmem:[%s15796_s1 + $0x150] sm:$0x3f] }
  0x91   : > { %906 = vst.msk [vmem:[#allocation2 + $0x10] sm:$0xff] %vm903_vm0, %v862_v41  ;;  %904 = vst.msk [vmem:[#allocation2] sm:$0xff] %vm903_vm0, %v860_v42  ;;  %v9717_v41 = vld [vmem:[%s15801_s6 + $0x40] sm:$0xff]  ;;  %v9718_v42 = vld [vmem:[%s15801_s6 + $0x48] sm:$0xff] }
  0x92   : > { %v663_v49 = vpop.permute.xlu1 %662  ;;  %v653_v50 = vpop.permute.xlu0 %652  ;;  %v13788_v52 = vpack.c.bf16 %v9718_v42, %v9717_v41 }
  0x93   : > { %v863_v55 = vmul.f32 %v663_v49, %v605_v37  ;;  %v861_v56 = vmul.f32 %v653_v50, %v603_v43  ;;  %4995 = vperm.xlu1 %13365, %v4799_v46   ;;  %4990 = vperm.xlu0 %13364, %v4798_v47   ;;  %v572_v37 = vadd.f32 %v13675_v14, %v522_v19  ;;  %v613_v46 = vmax.f32 %v570_v18, 0.0  ;;  %v4824_v50 = vld [vmem:[%s15796_s1 + $0x123] sm:$0xff] }
  0x94   : > { %v612_v47 = vmax.f32 %v569_v26, 0.0  ;;  %v480_v18 = vld [vmem:[%s13646_s20 + $0xa8] sm:$0xff]  ;;  %v479_v19 = vld [vmem:[%s13646_s20 + $0xa0] sm:$0xff] }
  0x95   : > { %907 = vst.msk [vmem:[#allocation2 + $0x18] sm:$0xff] %vm903_vm0, %v863_v55  ;;  %905 = vst.msk [vmem:[#allocation2 + $0x8] sm:$0xff] %vm903_vm0, %v861_v56  ;;  %v615_v56 = vmax.f32 %v572_v37, 0.0  ;;  %v530_v28 = vmul.f32 %v13659_v7, %v480_v18  ;;  %v529_v29 = vmul.f32 %v13659_v7, %v479_v19 }
  0x96   : > { %v673_v63 = vpop.permute.xlu1 %672  ;;  %v668_v0 = vpop.permute.xlu0 %667 }
  0x97   : > { %v865_v5 = vmul.f32 %v673_v63, %v607_v51  ;;  %v864_v6 = vmul.f32 %v668_v0, %v606_v57  ;;  %5005 = vperm.xlu1 %13365, %v4801_v61   ;;  %5000 = vperm.xlu0 %13364, %v4800_v62   ;;  %v475_v51 = vld [vmem:[%s13646_s20 + $0x80] sm:$0xff]  ;;  %v574_v57 = vadd.f32 %v13675_v14, %v524_v39  ;;  %v614_v62 = vmax.f32 %v571_v38, 0.0  ;;  %v478_v0 = vld [vmem:[%s13646_s20 + $0x98] sm:$0xff] }
  0x98   : > { %v525_v63 = vmul.f32 %v13659_v7, %v475_v51  ;;  %v528_v11 = vmul.f32 %v13659_v7, %v478_v0  ;;  %v580_v41 = vadd.f32 %v13675_v14, %v530_v28  ;;  %v579_v42 = vadd.f32 %v13675_v14, %v529_v29  ;;  %v485_v0 = vld [vmem:[%s13646_s20 + $0xd0] sm:$0xff]  ;;  %v490_v29 = vld [vmem:[%s13646_s20 + $0xf8] sm:$0xff] }
  0x99   : > { %909 = vst.msk [vmem:[#allocation2 + $0x28] sm:$0xff] %vm903_vm0, %v865_v5  ;;  %908 = vst.msk [vmem:[#allocation2 + $0x20] sm:$0xff] %vm903_vm0, %v864_v6  ;;  %v617_v9 = vmax.f32 %v574_v57, 0.0 }
  0x9a   : > { %v683_v15 = vpop.permute.xlu1 %682  ;;  %v678_v16 = vpop.permute.xlu0 %677  ;;  %v578_v26 = vadd.f32 %v13675_v14, %v528_v11 }
  0x9b   : > { %v867_v23 = vmul.f32 %v683_v15, %v609_v1  ;;  %v866_v24 = vmul.f32 %v678_v16, %v608_v8  ;;  %5015 = vperm.xlu1 %13365, %v4803_v12   ;;  %5010 = vperm.xlu0 %13364, %v4802_v13   ;;  %v477_v1 = vld [vmem:[%s13646_s20 + $0x90] sm:$0xff]  ;;  %v616_v16 = vmax.f32 %v573_v58, 0.0 }
  0x9c   : > { %v988_v30 = vld [vmem:[#allocation2 + $0x1] sm:$0xff]  ;;  %v989_v31 = vld [vmem:[#allocation2 + $0x9] sm:$0xff]  ;;  %v990_v45 = vld [vmem:[#allocation2 + $0x11] sm:$0xff]  ;;  %v527_v12 = vmul.f32 %v13659_v7, %v477_v1  ;;  %v621_v40 = vmax.f32 %v578_v26, 0.0 }
  0x9d   : > { %911 = vst.msk [vmem:[#allocation2 + $0x38] sm:$0xff] %vm903_vm0, %v867_v23  ;;  %910 = vst.msk [vmem:[#allocation2 + $0x30] sm:$0xff] %vm903_vm0, %v866_v24  ;;  %11230 = vmatprep.mubr.msk.f32.mxu0 %vm903_vm0, %v988_v30 }
  0x9e   : > { %v693_v35 = vpop.permute.xlu1 %692  ;;  %v688_v36 = vpop.permute.xlu0 %687  ;;  %11231 = vmatmul.mubr.msk.f32.vlgmr.msra.gmra.mrb[0].mxu0 %vm903_vm0, %v989_v31 }
  0x9f   : > { %v869_v43 = vmul.f32 %v693_v35, %v611_v17  ;;  %v868_v44 = vmul.f32 %v688_v36, %v610_v25  ;;  %12483 = vmatpush3.bf16.msra.mxu0 %v13513_v27  ;;  %5025 = vperm.xlu1 %13365, %v4805_v32   ;;  %v4806_v27 = vld [vmem:[%s15796_s1 + $0x93] sm:$0xff]  ;;  %v575_v17 = vadd.f32 %v13675_v14, %v525_v63  ;;  %v619_v25 = vmax.f32 %v576_v10, 0.0 }
  0xa0   : > { %5020 = vperm.xlu0 %13364, %v4804_v33   ;;  %11233 = vmatprep.mubr.msk.f32.mxu0 %vm903_vm0, %v990_v45  ;;  %v991_v49 = vld [vmem:[#allocation2 + $0x19] sm:$0xff]  ;;  %v992_v55 = vld [vmem:[#allocation2 + $0x21] sm:$0xff]  ;;  %v577_v33 = vadd.f32 %v13675_v14, %v527_v12  ;;  %v481_v36 = vld [vmem:[%s13646_s20 + $0xb0] sm:$0xff]  ;;  %v535_v12 = vmul.f32 %v13659_v7, %v485_v0 }
  0xa1   : > { %913 = vst.msk [vmem:[#allocation2 + $0x48] sm:$0xff] %vm903_vm0, %v869_v43  ;;  %912 = vst.msk [vmem:[#allocation2 + $0x40] sm:$0xff] %vm903_vm0, %v868_v44  ;;  %12485 = vmatprep.subr.bf16.mxu0 %v12484_v34  ;;  %v618_v32 = vmax.f32 %v575_v17, 0.0 }
  0xa2   : > { %v703_v53 = vpop.permute.xlu1 %702  ;;  %v698_v54 = vpop.permute.xlu0 %697  ;;  %11234 = vmatmul.mubr.msk.f32.gmra.mrb[2].mxu0 %vm903_vm0, %v991_v49  ;;  %v483_v49 = vld [vmem:[%s13646_s20 + $0xc0] sm:$0xff]  ;;  %v585_v26 = vadd.f32 %v13675_v14, %v535_v12 }
  0xa3   : > { %v871_v60 = vmul.f32 %v703_v53, %v613_v46  ;;  %v870_v61 = vmul.f32 %v698_v54, %v612_v47  ;;  %5120 = vperm.xlu1 %13365, %v4824_v50   ;;  %11236 = vmatprep.mubr.msk.f32.mxu0 %vm903_vm0, %v992_v55  ;;  %v620_v46 = vmax.f32 %v577_v33, 0.0  ;;  %v531_v47 = vmul.f32 %v13659_v7, %v481_v36 }
  0xa4   : > { %5030 = vperm.xlu0 %13364, %v4806_v27   ;;  %v993_v2 = vld [vmem:[#allocation2 + $0x29] sm:$0xff]  ;;  %12487 = vmatpush3.bf16.msra.mxu0 %v12484_v34  ;;  %v994_v8 = vld [vmem:[#allocation2 + $0x31] sm:$0xff]  ;;  %v623_v54 = vmax.f32 %v580_v41, 0.0  ;;  %v533_v57 = vmul.f32 %v13659_v7, %v483_v49  ;;  %v628_v41 = vmax.f32 %v585_v26, 0.0 }
  0xa5   : > { %915 = vst.msk [vmem:[#allocation2 + $0x58] sm:$0xff] %vm903_vm0, %v871_v60  ;;  %914 = vst.msk [vmem:[#allocation2 + $0x50] sm:$0xff] %vm903_vm0, %v870_v61  ;;  %12489 = vmatprep.subr.bf16.mxu0 %v13788_v52  ;;  %v482_v34 = vld [vmem:[%s13646_s20 + $0xb8] sm:$0xff]  ;;  %v622_v60 = vmax.f32 %v579_v42, 0.0  ;;  %v581_v61 = vadd.f32 %v13675_v14, %v531_v47 }
  0xa6   : > { %v713_v5 = vpop.permute.xlu1 %712  ;;  %v708_v6 = vpop.permute.xlu0 %707  ;;  %11237 = vmatmul.mubr.msk.f32.gmra.mrb[4].mxu0 %vm903_vm0, %v993_v2  ;;  %v532_v43 = vmul.f32 %v13659_v7, %v482_v34 }
  0xa7   : > { %v873_v13 = vmul.f32 %v713_v5, %v615_v56  ;;  %v872_v15 = vmul.f32 %v708_v6, %v614_v62  ;;  %852 = vperm.xlu1 %13365, %v457_v3   ;;  %11239 = vmatprep.mubr.msk.f32.mxu0 %vm903_vm0, %v994_v8  ;;  %v534_v56 = vmul.f32 %v13659_v7, %v484_v48  ;;  %v486_v62 = vld [vmem:[%s13646_s20 + $0xd8] sm:$0xff]  ;;  %v624_v11 = vmax.f32 %v581_v61, 0.0 }
  0xa8   : > { %5125 = vperm.xlu0 %13364, %v4825_v4   ;;  %v995_v20 = vld [vmem:[#allocation2 + $0x39] sm:$0xff]  ;;  %v996_v24 = vld [vmem:[#allocation2 + $0x41] sm:$0xff]  ;;  %v582_v55 = vadd.f32 %v13675_v14, %v532_v43  ;;  %v583_v6 = vadd.f32 %v13675_v14, %v533_v57  ;;  %v536_v8 = vmul.f32 %v13659_v7, %v486_v62 }
  0xa9   : > { %917 = vst.msk [vmem:[#allocation2 + $0x68] sm:$0xff] %vm903_vm0, %v873_v13  ;;  %916 = vst.msk [vmem:[#allocation2 + $0x60] sm:$0xff] %vm903_vm0, %v872_v15  ;;  %v584_v5 = vadd.f32 %v13675_v14, %v534_v56  ;;  %v488_v13 = vld [vmem:[%s13646_s20 + $0xe8] sm:$0xff]  ;;  %v494_v57 = vld [vmem:[%s13646_s20 + $0x118] sm:$0xff] }
  0xaa   : > { %v723_v22 = vpop.permute.xlu1 %722  ;;  %v718_v23 = vpop.permute.xlu0 %717  ;;  %11240 = vmatmul.mubr.msk.f32.gmra.mrb[6].mxu0 %vm903_vm0, %v995_v20  ;;  %v625_v4 = vmax.f32 %v582_v55, 0.0  ;;  %v492_v43 = vld [vmem:[%s13646_s20 + $0x108] sm:$0xff] }
  0xab   : > { %v875_v30 = vmul.f32 %v723_v22, %v617_v9  ;;  %v874_v31 = vmul.f32 %v718_v23, %v616_v16  ;;  %11242 = vmatprep.mubr.msk.f32.mxu0 %vm903_vm0, %v996_v24  ;;  %v487_v16 = vld [vmem:[%s13646_s20 + $0xe0] sm:$0xff]  ;;  %v627_v20 = vmax.f32 %v584_v5, 0.0  ;;  %v586_v22 = vadd.f32 %v13675_v14, %v536_v8  ;;  %v496_v8 = vld [vmem:[%s13646_s20 + $0x128] sm:$0xff] }
  0xac   : > { %857 = vperm.xlu0 %13364, %v458_v21   ;;  %v997_v35 = vld [vmem:[#allocation2 + $0x49] sm:$0xff]  ;;  %v998_v39 = vld [vmem:[#allocation2 + $0x51] sm:$0xff]  ;;  %v626_v21 = vmax.f32 %v583_v6, 0.0  ;;  %v538_v23 = vmul.f32 %v13659_v7, %v488_v13  ;;  %v537_v28 = vmul.f32 %v13659_v7, %v487_v16 }
  0xad   : > { %919 = vst.msk [vmem:[#allocation2 + $0x78] sm:$0xff] %vm903_vm0, %v875_v30  ;;  %918 = vst.msk [vmem:[#allocation2 + $0x70] sm:$0xff] %vm903_vm0, %v874_v31  ;;  %v489_v30 = vld [vmem:[%s13646_s20 + $0xf0] sm:$0xff] }
  0xae   : > { %v733_v37 = vpop.permute.xlu1 %732  ;;  %v728_v38 = vpop.permute.xlu0 %727  ;;  %11243 = vmatmul.mubr.msk.f32.gmra.mrb[8].mxu0 %vm903_vm0, %v997_v35  ;;  %v629_v35 = vmax.f32 %v586_v22, 0.0  ;;  %v588_v36 = vadd.f32 %v13675_v14, %v538_v23  ;;  %v587_v42 = vadd.f32 %v13675_v14, %v537_v28  ;;  %v498_v23 = vld [vmem:[%s13646_s20 + $0x138] sm:$0xff] }
  0xaf   : > { %v877_v44 = vmul.f32 %v733_v37, %v619_v25  ;;  %v876_v45 = vmul.f32 %v728_v38, %v618_v32  ;;  %11245 = vmatprep.mubr.msk.f32.mxu0 %vm903_vm0, %v998_v39  ;;  %v540_v37 = vmul.f32 %v13659_v7, %v490_v29  ;;  %v539_v38 = vmul.f32 %v13659_v7, %v489_v30 }
  0xb0   : > { %v999_v50 = vld [vmem:[#allocation2 + $0x59] sm:$0xff]  ;;  %v1000_v53 = vld [vmem:[#allocation2 + $0x61] sm:$0xff]  ;;  %v631_v49 = vmax.f32 %v588_v36, 0.0  ;;  %v630_v55 = vmax.f32 %v587_v42, 0.0 }
  0xb1   : > { %921 = vst.msk [vmem:[#allocation2 + $0x88] sm:$0xff] %vm903_vm0, %v877_v44  ;;  %920 = vst.msk [vmem:[#allocation2 + $0x80] sm:$0xff] %vm903_vm0, %v876_v45  ;;  %v491_v45 = vld [vmem:[%s13646_s20 + $0x100] sm:$0xff] }
  0xb2   : > { %v743_v51 = vpop.permute.xlu1 %742  ;;  %v738_v27 = vpop.permute.xlu0 %737  ;;  %11246 = vmatmul.mubr.msk.f32.gmra.mrb[10].mxu0 %vm903_vm0, %v999_v50  ;;  %v590_v50 = vadd.f32 %v13675_v14, %v540_v37  ;;  %v541_v56 = vmul.f32 %v13659_v7, %v491_v45 }
  0xb3   : > { %v879_v58 = vmul.f32 %v743_v51, %v621_v40  ;;  %v878_v59 = vmul.f32 %v738_v27, %v620_v46  ;;  %11248 = vmatprep.mubr.msk.f32.mxu0 %vm903_vm0, %v1000_v53  ;;  %v589_v51 = vadd.f32 %v13675_v14, %v539_v38  ;;  %v542_v27 = vmul.f32 %v13659_v7, %v492_v43 }
  0xb4   : > { %v1001_v63 = vld [vmem:[#allocation2 + $0x69] sm:$0xff]  ;;  %v1002_v3 = vld [vmem:[#allocation2 + $0x71] sm:$0xff]  ;;  %v591_v5 = vadd.f32 %v13675_v14, %v541_v56 }
  0xb5   : > { %923 = vst.msk [vmem:[#allocation2 + $0x98] sm:$0xff] %vm903_vm0, %v879_v58  ;;  %922 = vst.msk [vmem:[#allocation2 + $0x90] sm:$0xff] %vm903_vm0, %v878_v59  ;;  %v493_v59 = vld [vmem:[%s13646_s20 + $0x110] sm:$0xff]  ;;  %v632_v0 = vmax.f32 %v589_v51, 0.0 }
  0xb6   : > { %v753_v1 = vpop.permute.xlu1 %752  ;;  %v748_v2 = vpop.permute.xlu0 %747  ;;  %11249 = vmatmul.mubr.msk.f32.gmra.mrb[12].mxu0 %vm903_vm0, %v1001_v63  ;;  %v633_v63 = vmax.f32 %v590_v50, 0.0  ;;  %v543_v6 = vmul.f32 %v13659_v7, %v493_v59 }
  0xb7   : > { %v881_v9 = vmul.f32 %v753_v1, %v623_v54  ;;  %v880_v10 = vmul.f32 %v748_v2, %v622_v60  ;;  %11251 = vmatprep.mubr.msk.f32.mxu0 %vm903_vm0, %v1002_v3  ;;  %v592_v1 = vadd.f32 %v13675_v14, %v542_v27  ;;  %v544_v2 = vmul.f32 %v13659_v7, %v494_v57 }
  0xb8   : > { %v1003_v15 = vld [vmem:[#allocation2 + $0x79] sm:$0xff]  ;;  %v1004_v19 = vld [vmem:[#allocation2 + $0x81] sm:$0xff]  ;;  %v593_v22 = vadd.f32 %v13675_v14, %v543_v6  ;;  %v9719_v6 = vld [vmem:[%s15801_s6 + $0x50] sm:$0xff] }
  0xb9   : > { %925 = vst.msk [vmem:[#allocation2 + $0xa8] sm:$0xff] %vm903_vm0, %v881_v9  ;;  %924 = vst.msk [vmem:[#allocation2 + $0xa0] sm:$0xff] %vm903_vm0, %v880_v10  ;;  %v495_v9 = vld [vmem:[%s13646_s20 + $0x120] sm:$0xff]  ;;  %v594_v16 = vadd.f32 %v13675_v14, %v544_v2 }
  0xba   : > { %v763_v17 = vpop.permute.xlu1 %762  ;;  %v758_v18 = vpop.permute.xlu0 %757  ;;  %11252 = vmatmul.mubr.msk.f32.gmra.mrb[14].mxu0 %vm903_vm0, %v1003_v15  ;;  %v635_v15 = vmax.f32 %v592_v1, 0.0  ;;  %v636_v36 = vmax.f32 %v593_v22, 0.0 }
  0xbb   : > { %v883_v24 = vmul.f32 %v763_v17, %v625_v4  ;;  %v882_v25 = vmul.f32 %v758_v18, %v624_v11  ;;  %11254 = vmatprep.mubr.msk.f32.mxu0 %vm903_vm0, %v1004_v19  ;;  %v546_v17 = vmul.f32 %v13659_v7, %v496_v8  ;;  %v545_v18 = vmul.f32 %v13659_v7, %v495_v9  ;;  %v9720_v8 = vld [vmem:[%s15801_s6 + $0x58] sm:$0xff] }
  0xbc   : > { %v1005_v31 = vld [vmem:[#allocation2 + $0x89] sm:$0xff]  ;;  %v1006_v34 = vld [vmem:[#allocation2 + $0x91] sm:$0xff]  ;;  %v637_v30 = vmax.f32 %v594_v16, 0.0 }
  0xbd   : > { %927 = vst.msk [vmem:[#allocation2 + $0xb8] sm:$0xff] %vm903_vm0, %v883_v24  ;;  %926 = vst.msk [vmem:[#allocation2 + $0xb0] sm:$0xff] %vm903_vm0, %v882_v25  ;;  %v497_v25 = vld [vmem:[%s13646_s20 + $0x130] sm:$0xff]  ;;  %v9758_v16 = vld [vmem:[%s15801_s6 + $0x68] sm:$0xff] }
  0xbe   : > { %v773_v32 = vpop.permute.xlu1 %772  ;;  %v768_v33 = vpop.permute.xlu0 %767  ;;  %11255 = vmatmul.mubr.msk.f32.gmra.mrb[16].mxu0 %vm903_vm0, %v1005_v31  ;;  %v596_v31 = vadd.f32 %v13675_v14, %v546_v17  ;;  %v547_v37 = vmul.f32 %v13659_v7, %v497_v25  ;;  %v953_v25 = vld [vmem:[#allocation2 + $0x28] sm:$0xff] }
  0xbf   : > { %v885_v39 = vmul.f32 %v773_v32, %v627_v20  ;;  %v884_v40 = vmul.f32 %v768_v33, %v626_v21  ;;  %11257 = vmatprep.mubr.msk.f32.mxu0 %vm903_vm0, %v1006_v34  ;;  %v634_v21 = vmax.f32 %v591_v5, 0.0  ;;  %v595_v32 = vadd.f32 %v13675_v14, %v545_v18 }
  0xc0   : > { %v1007_v44 = vld [vmem:[#allocation2 + $0x99] sm:$0xff]  ;;  %v1008_v48 = vld [vmem:[#allocation2 + $0xa1] sm:$0xff]  ;;  %v548_v33 = vmul.f32 %v13659_v7, %v498_v23  ;;  %v639_v43 = vmax.f32 %v596_v31, 0.0 }
  0xc1   : > { %929 = vst.msk [vmem:[#allocation2 + $0xc8] sm:$0xff] %vm903_vm0, %v885_v39  ;;  %928 = vst.msk [vmem:[#allocation2 + $0xc0] sm:$0xff] %vm903_vm0, %v884_v40  ;;  %v499_v39 = vld [vmem:[%s13646_s20 + $0x140] sm:$0xff] }
  0xc2   : > { %v783_v46 = vpop.permute.xlu1 %782  ;;  %v778_v47 = vpop.permute.xlu0 %777  ;;  %11258 = vmatmul.mubr.msk.f32.gmra.mrb[18].mxu0 %vm903_vm0, %v1007_v44  ;;  %v638_v44 = vmax.f32 %v595_v32, 0.0  ;;  %v598_v45 = vadd.f32 %v13675_v14, %v548_v33  ;;  %v956_v32 = vld [vmem:[#allocation2 + $0x40] sm:$0xff]  ;;  %v957_v33 = vld [vmem:[#allocation2 + $0x48] sm:$0xff] }
  0xc3   : > { %v887_v53 = vmul.f32 %v783_v46, %v629_v35  ;;  %v886_v54 = vmul.f32 %v778_v47, %v628_v41  ;;  %11260 = vmatprep.mubr.msk.f32.mxu0 %vm903_vm0, %v1008_v48  ;;  %v597_v48 = vadd.f32 %v13675_v14, %v547_v37  ;;  %v959_v37 = vld [vmem:[#allocation2 + $0x58] sm:$0xff] }
  0xc4   : > { %v1009_v58 = vld [vmem:[#allocation2 + $0xa9] sm:$0xff]  ;;  %v1010_v62 = vld [vmem:[#allocation2 + $0xb1] sm:$0xff] }
  0xc5   : > { %931 = vst.msk [vmem:[#allocation2 + $0xd8] sm:$0xff] %vm903_vm0, %v887_v53  ;;  %930 = vst.msk [vmem:[#allocation2 + $0xd0] sm:$0xff] %vm903_vm0, %v886_v54  ;;  %v641_v54 = vmax.f32 %v598_v45, 0.0  ;;  %v640_v57 = vmax.f32 %v597_v48, 0.0  ;;  %v963_v45 = vld [vmem:[#allocation2 + $0x78] sm:$0xff]  ;;  %v964_v48 = vld [vmem:[#allocation2 + $0x80] sm:$0xff] }
  0xc6   : > { %v793_v60 = vpop.permute.xlu1 %792  ;;  %v788_v61 = vpop.permute.xlu0 %787  ;;  %11261 = vmatmul.mubr.msk.f32.gmra.mrb[20].mxu0 %vm903_vm0, %v1009_v58 }
  0xc7   : > { %v889_v3 = vmul.f32 %v793_v60, %v631_v49  ;;  %v888_v4 = vmul.f32 %v788_v61, %v630_v55  ;;  %11263 = vmatprep.mubr.msk.f32.mxu0 %vm903_vm0, %v1010_v62  ;;  %v549_v49 = vmul.f32 %v13659_v7, %v499_v39 }
  0xc8   : > { %v1011_v10 = vld [vmem:[#allocation2 + $0xb9] sm:$0xff]  ;;  %v1012_v13 = vld [vmem:[#allocation2 + $0xc1] sm:$0xff] }
  0xc9   : > { %933 = vst.msk [vmem:[#allocation2 + $0xe8] sm:$0xff] %vm903_vm0, %v889_v3  ;;  %932 = vst.msk [vmem:[#allocation2 + $0xe0] sm:$0xff] %vm903_vm0, %v888_v4  ;;  %v599_v58 = vadd.f32 %v13675_v14, %v549_v49  ;;  %v965_v49 = vld [vmem:[#allocation2 + $0x88] sm:$0xff] }
  0xca   : > { %v803_v11 = vpop.permute.xlu1 %802  ;;  %v798_v12 = vpop.permute.xlu0 %797  ;;  %11264 = vmatmul.mubr.msk.f32.gmra.mrb[22].mxu0 %vm903_vm0, %v1011_v10 }
  0xcb   : > { %v891_v19 = vmul.f32 %v803_v11, %v633_v63  ;;  %v890_v20 = vmul.f32 %v798_v12, %v632_v0  ;;  %11266 = vmatprep.mubr.msk.f32.mxu0 %vm903_vm0, %v1012_v13  ;;  %v642_v0 = vmax.f32 %v599_v58, 0.0  ;;  %v948_v11 = vld [vmem:[#allocation2] sm:$0xff]  ;;  %v12492_v12 = vpack.c.bf16 %v9720_v8, %v9719_v6  ;;  %v949_v13 = vld [vmem:[#allocation2 + $0x8] sm:$0xff] }
  0xcc   : > { %v1013_v24 = vld [vmem:[#allocation2 + $0xc9] sm:$0xff]  ;;  %v1014_v29 = vld [vmem:[#allocation2 + $0xd1] sm:$0xff] }
  0xcd   : > { %935 = vst.msk [vmem:[#allocation2 + $0xf8] sm:$0xff] %vm903_vm0, %v891_v19  ;;  %934 = vst.msk [vmem:[#allocation2 + $0xf0] sm:$0xff] %vm903_vm0, %v890_v20  ;;  %v950_v19 = vld [vmem:[#allocation2 + $0x10] sm:$0xff] }
  0xce   : > { %v813_v26 = vpop.permute.xlu1 %812  ;;  %v808_v28 = vpop.permute.xlu0 %807  ;;  %11267 = vmatmul.mubr.msk.f32.gmra.mrb[24].mxu0 %vm903_vm0, %v1013_v24  ;;  %v952_v24 = vld [vmem:[#allocation2 + $0x20] sm:$0xff] }
  0xcf   : > { %v893_v34 = vmul.f32 %v813_v26, %v635_v15  ;;  %v892_v35 = vmul.f32 %v808_v28, %v634_v21  ;;  %11269 = vmatprep.mubr.msk.f32.mxu0 %vm903_vm0, %v1014_v29  ;;  %v9757_v15 = vld [vmem:[%s15801_s6 + $0x60] sm:$0xff]  ;;  %v951_v21 = vld [vmem:[#allocation2 + $0x18] sm:$0xff]  ;;  %v954_v28 = vld [vmem:[#allocation2 + $0x30] sm:$0xff] }
  0xd0   : > { %v1015_v38 = vld [vmem:[#allocation2 + $0xd9] sm:$0xff]  ;;  %v1016_v42 = vld [vmem:[#allocation2 + $0xe1] sm:$0xff]  ;;  %v13965_v20 = vpack.c.bf16 %v9758_v16, %v9757_v15 }
  0xd1   : > { %937 = vst.msk [vmem:[#allocation2 + $0x108] sm:$0xff] %vm903_vm0, %v893_v34  ;;  %936 = vst.msk [vmem:[#allocation2 + $0x100] sm:$0xff] %vm903_vm0, %v892_v35  ;;  %v955_v29 = vld [vmem:[#allocation2 + $0x38] sm:$0xff]  ;;  %v976_v8 = vld [vmem:[#allocation2 + $0xe0] sm:$0xff] }
  0xd2   : > { %v823_v40 = vpop.permute.xlu1 %822  ;;  %v818_v41 = vpop.permute.xlu0 %817  ;;  %11270 = vmatmul.mubr.msk.f32.gmra.mrb[26].mxu0 %vm903_vm0, %v1015_v38 }
  0xd3   : > { %v895_v46 = vmul.f32 %v823_v40, %v637_v30  ;;  %v894_v47 = vmul.f32 %v818_v41, %v636_v36  ;;  %11272 = vmatprep.mubr.msk.f32.mxu0 %vm903_vm0, %v1016_v42  ;;  %v958_v36 = vld [vmem:[#allocation2 + $0x50] sm:$0xff]  ;;  %v960_v40 = vld [vmem:[#allocation2 + $0x60] sm:$0xff]  ;;  %v961_v41 = vld [vmem:[#allocation2 + $0x68] sm:$0xff] }
  0xd4   : > { %v1017_v50 = vld [vmem:[#allocation2 + $0xe9] sm:$0xff]  ;;  %v1018_v53 = vld [vmem:[#allocation2 + $0xf1] sm:$0xff] }
  0xd5   : > { %939 = vst.msk [vmem:[#allocation2 + $0x118] sm:$0xff] %vm903_vm0, %v895_v46  ;;  %938 = vst.msk [vmem:[#allocation2 + $0x110] sm:$0xff] %vm903_vm0, %v894_v47  ;;  %v979_v16 = vld [vmem:[#allocation2 + $0xf8] sm:$0xff] }
  0xd6   : > { %v833_v51 = vpop.permute.xlu1 %832  ;;  %v828_v27 = vpop.permute.xlu0 %827  ;;  %11273 = vmatmul.mubr.msk.f32.gmra.mrb[28].mxu0 %vm903_vm0, %v1017_v50 }
  0xd7   : > { %v897_v55 = vmul.f32 %v833_v51, %v639_v43  ;;  %v896_v56 = vmul.f32 %v828_v27, %v638_v44  ;;  %11275 = vmatprep.mubr.msk.f32.mxu0 %vm903_vm0, %v1018_v53  ;;  %v962_v44 = vld [vmem:[#allocation2 + $0x70] sm:$0xff]  ;;  %v967_v53 = vld [vmem:[#allocation2 + $0x98] sm:$0xff] }
  0xd8   : > { %v1019_v59 = vld [vmem:[#allocation2 + $0xf9] sm:$0xff]  ;;  %v1020_v61 = vld [vmem:[#allocation2 + $0x101] sm:$0xff]  ;;  %v966_v27 = vld [vmem:[#allocation2 + $0x90] sm:$0xff] }
  0xd9   : > { %941 = vst.msk [vmem:[#allocation2 + $0x128] sm:$0xff] %vm903_vm0, %v897_v55  ;;  %940 = vst.msk [vmem:[#allocation2 + $0x120] sm:$0xff] %vm903_vm0, %v896_v56  ;;  %v968_v56 = vld [vmem:[#allocation2 + $0xa0] sm:$0xff] }
  0xda   : > { %v843_v7 = vpop.permute.xlu1 %842  ;;  %v838_v60 = vpop.permute.xlu0 %837  ;;  %11276 = vmatmul.mubr.msk.f32.gmra.mrb[30].mxu0 %vm903_vm0, %v1019_v59 }
  0xdb   : > { %v899_v62 = vmul.f32 %v843_v7, %v641_v54  ;;  %v898_v63 = vmul.f32 %v838_v60, %v640_v57  ;;  %11278 = vmatprep.mubr.msk.f32.mxu0 %vm903_vm0, %v1020_v61  ;;  %v969_v57 = vld [vmem:[#allocation2 + $0xa8] sm:$0xff]  ;;  %v970_v7 = vld [vmem:[#allocation2 + $0xb0] sm:$0xff]  ;;  %v971_v60 = vld [vmem:[#allocation2 + $0xb8] sm:$0xff] }
  0xdc   : > { %v1021_v1 = vld [vmem:[#allocation2 + $0x109] sm:$0xff]  ;;  %v1022_v3 = vld [vmem:[#allocation2 + $0x111] sm:$0xff] }
  0xdd   : > { %943 = vst.msk [vmem:[#allocation2 + $0x138] sm:$0xff] %vm903_vm0, %v899_v62  ;;  %942 = vst.msk [vmem:[#allocation2 + $0x130] sm:$0xff] %vm903_vm0, %v898_v63  ;;  %v972_v63 = vld [vmem:[#allocation2 + $0xc0] sm:$0xff] }
  0xde   : > { %v13935_v14 = vpop.permute.xlu1 %5035  ;;  %v848_v2 = vpop.permute.xlu0 %847  ;;  %11279 = vmatmul.mubr.msk.f32.gmra.mrb[32].mxu0 %vm903_vm0, %v1021_v1 }
  0xdf   : > { %v900_v4 = vmul.f32 %v848_v2, %v642_v0  ;;  %11281 = vmatprep.mubr.msk.f32.mxu0 %vm903_vm0, %v1022_v3  ;;  %v973_v0 = vld [vmem:[#allocation2 + $0xc8] sm:$0xff]  ;;  %v974_v3 = vld [vmem:[#allocation2 + $0xd0] sm:$0xff] }
  0xe0   : > { %v1023_v5 = vld [vmem:[#allocation2 + $0x119] sm:$0xff] }
  0xe1   : > { %944 = vst.msk [vmem:[#allocation2 + $0x140] sm:$0xff] %vm903_vm0, %v900_v4  ;;  %v975_v4 = vld [vmem:[#allocation2 + $0xd8] sm:$0xff] }
  0xe2   : > { %v13946_v9 = vpop.permute.xlu1 %5045  ;;  %v13948_v10 = vpop.permute.xlu0 %5040  ;;  %11282 = vmatmul.mubr.msk.f32.gmra.mrb[34].mxu0 %vm903_vm0, %v1023_v5 }
  0xe3   : > { %11292 = vmatprep.mubr.msk.f32.mxu0 %vm903_vm0, %v948_v11  ;;  %v977_v11 = vld [vmem:[#allocation2 + $0xe8] sm:$0xff] }
  0xe6   : > { %v13958_v17 = vpop.permute.xlu1 %5055  ;;  %v13960_v18 = vpop.permute.xlu0 %5050  ;;  %11293 = vmatmul.mubr.msk.f32.vlgmr.msra.gmra.mrb[0].mxu0 %vm903_vm0, %v949_v13  ;;  %v978_v13 = vld [vmem:[#allocation2 + $0xf0] sm:$0xff] }
  0xe7   : > { %12491 = vmatpush3.bf16.msra.mxu0 %v13788_v52  ;;  %11295 = vmatprep.mubr.msk.f32.mxu0 %vm903_vm0, %v950_v19 }
  0xe8   : > { %12493 = vmatprep.subr.bf16.mxu0 %v12492_v12 }
  0xea   : > { %v13967_v22 = vpop.permute.xlu1 %5065  ;;  %v13969_v23 = vpop.permute.xlu0 %5060  ;;  %11296 = vmatmul.mubr.msk.f32.gmra.mrb[2].mxu0 %vm903_vm0, %v951_v21  ;;  %v980_v21 = vld [vmem:[#allocation2 + $0x100] sm:$0xff] }
  0xeb   : > { %15806 = vst [vmem:[#allocation4_spill] sm:$0xff] %v13969_v23  ;;  %11298 = vmatprep.mubr.msk.f32.mxu0 %vm903_vm0, %v952_v24  ;;  %12495 = vmatpush3.bf16.msra.mxu0 %v12492_v12 }
  0xec   : > { %12497 = vmatprep.subr.bf16.mxu0 %v13965_v20 }
  0xee   : > { %v13974_v52 = vpop.permute.xlu1 %5075  ;;  %v13976_v26 = vpop.permute.xlu0 %5070  ;;  %11299 = vmatmul.mubr.msk.f32.gmra.mrb[4].mxu0 %vm903_vm0, %v953_v25  ;;  %v981_v25 = vld [vmem:[#allocation2 + $0x108] sm:$0xff] }
  0xef   : > { %15807 = vst [vmem:[#allocation5_spill] sm:$0xff] %v13974_v52  ;;  %15808 = vst [vmem:[#allocation6_spill] sm:$0xff] %v13976_v26  ;;  %11301 = vmatprep.mubr.msk.f32.mxu0 %vm903_vm0, %v954_v28  ;;  %v9837_v26 = vld [vmem:[%s15801_s6 + $0xa0] sm:$0xff]  ;;  %v9838_v52 = vld [vmem:[%s15801_s6 + $0xa8] sm:$0xff] }
  0xf0   : > { %v12512_v23 = vpack.c.bf16 %v9838_v52, %v9837_v26  ;;  %v2199_v52 = vld [vmem:[#allocation2 + $0x122] sm:$0xff]  ;;  %v2200_v26 = vld [vmem:[#allocation2 + $0x12a] sm:$0xff] }
  0xf2   : > { %v13980_v30 = vpop.permute.xlu1 %5085  ;;  %v13982_v31 = vpop.permute.xlu0 %5080  ;;  %11302 = vmatmul.mubr.msk.f32.gmra.mrb[6].mxu0 %vm903_vm0, %v955_v29  ;;  %v982_v29 = vld [vmem:[#allocation2 + $0x110] sm:$0xff] }
  0xf3   : > { %15809 = vst [vmem:[#allocation7_spill] sm:$0xff] %v13980_v30  ;;  %15810 = vst [vmem:[#allocation8_spill] sm:$0xff] %v13982_v31  ;;  %11304 = vmatprep.mubr.msk.f32.mxu0 %vm903_vm0, %v956_v32  ;;  %v9800_v31 = vld [vmem:[%s15801_s6 + $0x98] sm:$0xff] }
  0xf6   : > { %v13986_v34 = vpop.permute.xlu1 %5095  ;;  %v13988_v35 = vpop.permute.xlu0 %5090  ;;  %11305 = vmatmul.mubr.msk.f32.gmra.mrb[8].mxu0 %vm903_vm0, %v957_v33  ;;  %v983_v33 = vld [vmem:[#allocation2 + $0x118] sm:$0xff] }
  0xf7   : > { %15811 = vst [vmem:[#allocation9_spill] sm:$0xff] %v13986_v34  ;;  %15812 = vst [vmem:[#allocation10_spill] sm:$0xff] %v13988_v35  ;;  %11307 = vmatprep.mubr.msk.f32.mxu0 %vm903_vm0, %v958_v36  ;;  %v9759_v36 = vld [vmem:[%s15801_s6 + $0x70] sm:$0xff]  ;;  %v1770_v35 = vld [vmem:[#allocation2 + $0x11a] sm:$0xff] }
  0xf8   : > { %v9799_v34 = vld [vmem:[%s15801_s6 + $0x90] sm:$0xff] }
  0xf9   : > { %v12508_v30 = vpack.c.bf16 %v9800_v31, %v9799_v34  ;;  %v9840_v31 = vld [vmem:[%s15801_s6 + $0xb8] sm:$0xff] }
  0xfa   : > { %v13992_v38 = vpop.permute.xlu1 %5105  ;;  %v13994_v39 = vpop.permute.xlu0 %5100  ;;  %11308 = vmatmul.mubr.msk.f32.gmra.mrb[10].mxu0 %vm903_vm0, %v959_v37  ;;  %v9760_v37 = vld [vmem:[%s15801_s6 + $0x78] sm:$0xff] }
  0xfb   : > { %15813 = vst [vmem:[#allocation11_spill] sm:$0xff] %v13992_v38  ;;  %15814 = vst [vmem:[#allocation12_spill] sm:$0xff] %v13994_v39  ;;  %11310 = vmatprep.mubr.msk.f32.mxu0 %vm903_vm0, %v960_v40  ;;  %v1735_v40 = vld [vmem:[#allocation2 + $0x2] sm:$0xff]  ;;  %v1768_v39 = vld [vmem:[#allocation2 + $0x10a] sm:$0xff] }
  0xfc   : > { %v1769_v38 = vld [vmem:[#allocation2 + $0x112] sm:$0xff] }
  0xfd   : > { %v2595_v34 = vld [vmem:[#allocation2 + $0x13] sm:$0xff] }
  0xfe   : > { %v13998_v42 = vpop.permute.xlu1 %5115  ;;  %v14000_v43 = vpop.permute.xlu0 %5110  ;;  %11311 = vmatmul.mubr.msk.f32.gmra.mrb[12].mxu0 %vm903_vm0, %v961_v41 }
  0xff   : > { %15815 = vst [vmem:[#allocation13_spill] sm:$0xff] %v13998_v42  ;;  %15816 = vst [vmem:[#allocation14_spill] sm:$0xff] %v14000_v43  ;;  %11313 = vmatprep.mubr.msk.f32.mxu0 %vm903_vm0, %v962_v44  ;;  %v12500_v44 = vpack.c.bf16 %v9760_v37, %v9759_v36  ;;  %v1756_v36 = vld [vmem:[#allocation2 + $0xaa] sm:$0xff]  ;;  %v1757_v37 = vld [vmem:[#allocation2 + $0xb2] sm:$0xff] }
 0x100   : > { %v1766_v43 = vld [vmem:[#allocation2 + $0xfa] sm:$0xff]  ;;  %v1767_v42 = vld [vmem:[#allocation2 + $0x102] sm:$0xff] }
 0x102   : > { %v14004_v46 = vpop.permute.xlu1 %4955  ;;  %v14006_v47 = vpop.permute.xlu0 %4950  ;;  %11314 = vmatmul.mubr.msk.f32.gmra.mrb[14].mxu0 %vm903_vm0, %v963_v45  ;;  %v1736_v45 = vld [vmem:[#allocation2 + $0xa] sm:$0xff] }
 0x103   : > { %11316 = vmatprep.mubr.msk.f32.mxu0 %vm903_vm0, %v964_v48  ;;  %v9797_v48 = vld [vmem:[%s15801_s6 + $0x80] sm:$0xff] }
 0x106   : > { %v14010_v50 = vpop.permute.xlu1 %4965  ;;  %v14012_v51 = vpop.permute.xlu0 %4960  ;;  %11317 = vmatmul.mubr.msk.f32.gmra.mrb[16].mxu0 %vm903_vm0, %v965_v49  ;;  %v9798_v49 = vld [vmem:[%s15801_s6 + $0x88] sm:$0xff] }
 0x107   : > { %11319 = vmatprep.mubr.msk.f32.mxu0 %vm903_vm0, %v966_v27  ;;  %v14077_v27 = vld [vmem:[#allocation2 + $0x12] sm:$0xff] }
 0x10a   : > { %v14016_v54 = vpop.permute.xlu1 %4975  ;;  %v14018_v55 = vpop.permute.xlu0 %4970  ;;  %11320 = vmatmul.mubr.msk.f32.gmra.mrb[18].mxu0 %vm903_vm0, %v967_v53  ;;  %v14082_v53 = vpack.c.bf16 %v9798_v49, %v9797_v48  ;;  %v1762_v48 = vld [vmem:[#allocation2 + $0xda] sm:$0xff]  ;;  %v1763_v49 = vld [vmem:[#allocation2 + $0xe2] sm:$0xff] }
 0x10b   : > { %11322 = vmatprep.mubr.msk.f32.mxu0 %vm903_vm0, %v968_v56  ;;  %v14084_v56 = vld [vmem:[#allocation2 + $0x1a] sm:$0xff] }
 0x10e   : > { %v14022_v58 = vpop.permute.xlu1 %4985  ;;  %v14024_v59 = vpop.permute.xlu0 %4980  ;;  %11323 = vmatmul.mubr.msk.f32.gmra.mrb[20].mxu0 %vm903_vm0, %v969_v57  ;;  %v14088_v57 = vld [vmem:[#allocation2 + $0x22] sm:$0xff] }
 0x10f   : > { %11325 = vmatprep.mubr.msk.f32.mxu0 %vm903_vm0, %v970_v7  ;;  %v14097_v7 = vld [vmem:[#allocation2 + $0x32] sm:$0xff] }
 0x112   : > { %v14028_v61 = vpop.permute.xlu1 %4995  ;;  %v14030_v62 = vpop.permute.xlu0 %4990  ;;  %11326 = vmatmul.mubr.msk.f32.gmra.mrb[22].mxu0 %vm903_vm0, %v971_v60  ;;  %v14101_v60 = vld [vmem:[#allocation2 + $0x3a] sm:$0xff] }
 0x113   : > { %11328 = vmatprep.mubr.msk.f32.mxu0 %vm903_vm0, %v972_v63  ;;  %v14105_v63 = vld [vmem:[#allocation2 + $0x42] sm:$0xff] }
 0x116   : > { %v14034_v1 = vpop.permute.xlu1 %5005  ;;  %v14036_v2 = vpop.permute.xlu0 %5000  ;;  %11329 = vmatmul.mubr.msk.f32.gmra.mrb[24].mxu0 %vm903_vm0, %v973_v0  ;;  %v14109_v0 = vld [vmem:[#allocation2 + $0x4a] sm:$0xff] }
 0x117   : > { %11331 = vmatprep.mubr.msk.f32.mxu0 %vm903_vm0, %v974_v3  ;;  %v14113_v3 = vld [vmem:[#allocation2 + $0x52] sm:$0xff] }
 0x11a   : > { %v14040_v5 = vpop.permute.xlu1 %5015  ;;  %v14042_v6 = vpop.permute.xlu0 %5010  ;;  %11332 = vmatmul.mubr.msk.f32.gmra.mrb[26].mxu0 %vm903_vm0, %v975_v4  ;;  %v14117_v4 = vld [vmem:[#allocation2 + $0x5a] sm:$0xff] }
 0x11b   : > { %11334 = vmatprep.mubr.msk.f32.mxu0 %vm903_vm0, %v976_v8  ;;  %v14121_v8 = vld [vmem:[#allocation2 + $0x62] sm:$0xff] }
 0x11e   : > { %v14046_v12 = vpop.permute.xlu1 %5025  ;;  %11335 = vmatmul.mubr.msk.f32.gmra.mrb[28].mxu0 %vm903_vm0, %v977_v11  ;;  %v14125_v11 = vld [vmem:[#allocation2 + $0x6a] sm:$0xff] }
 0x11f   : > { %v14049_v15 = vpop.permute.xlu0 %5020  ;;  %11337 = vmatprep.mubr.msk.f32.mxu0 %vm903_vm0, %v978_v13  ;;  %v14129_v13 = vld [vmem:[#allocation2 + $0x72] sm:$0xff] }
 0x122   : > { %v14052_v19 = vpop.permute.xlu1 %5120  ;;  %11338 = vmatmul.mubr.msk.f32.gmra.mrb[30].mxu0 %vm903_vm0, %v979_v16  ;;  %v14133_v16 = vld [vmem:[#allocation2 + $0x7a] sm:$0xff] }
 0x123   : > { %15817 = vst [vmem:[#allocation15_spill] sm:$0xff] %v14052_v19  ;;  %v14055_v24 = vpop.permute.xlu0 %5030  ;;  %11340 = vmatprep.mubr.msk.f32.mxu0 %vm903_vm0, %v980_v21  ;;  %v14137_v21 = vld [vmem:[#allocation2 + $0x82] sm:$0xff]  ;;  %v1764_v19 = vld [vmem:[#allocation2 + $0xea] sm:$0xff] }
 0x126   : > { %v853_v28 = vpop.permute.xlu1 %852  ;;  %11341 = vmatmul.mubr.msk.f32.gmra.mrb[32].mxu0 %vm903_vm0, %v981_v25  ;;  %v14141_v25 = vld [vmem:[#allocation2 + $0x8a] sm:$0xff] }
 0x127   : > { %v14059_v32 = vpop.permute.xlu0 %5125  ;;  %11343 = vmatprep.mubr.msk.f32.mxu0 %vm903_vm0, %v982_v29  ;;  %v1753_v28 = vld [vmem:[#allocation2 + $0x92] sm:$0xff]  ;;  %v1754_v29 = vld [vmem:[#allocation2 + $0x9a] sm:$0xff] }
 0x128   : > { %15818 = vst [vmem:[#allocation16_spill] sm:$0xff] %v14059_v32  ;;  %v1765_v32 = vld [vmem:[#allocation2 + $0xf2] sm:$0xff] }
 0x12a   : > { %11344 = vmatmul.mubr.msk.f32.gmra.mrb[34].mxu0 %vm903_vm0, %v983_v33  ;;  %v1755_v33 = vld [vmem:[#allocation2 + $0xa2] sm:$0xff] }
 0x12b   : > { %v858_v41 = vpop.permute.xlu0 %857  ;;  %11354 = vmatprep.mubr.msk.f32.mxu0 %vm903_vm0, %v1735_v40  ;;  %v1758_v40 = vld [vmem:[#allocation2 + $0xba] sm:$0xff] }
 0x12c   : > { %v1759_v41 = vld [vmem:[#allocation2 + $0xc2] sm:$0xff] }
 0x12e   : > { %11355 = vmatmul.mubr.msk.f32.vlgmr.msra.gmra.mrb[0].mxu0 %vm903_vm0, %v1736_v45  ;;  %v1761_v45 = vld [vmem:[#allocation2 + $0xd2] sm:$0xff] }
 0x12f   : > { %12499 = vmatpush3.bf16.msra.mxu0 %v13965_v20  ;;  %11357 = vmatprep.mubr.msk.f32.mxu0 %vm903_vm0, %v14077_v27  ;;  %v14093_v20 = vld [vmem:[#allocation2 + $0x2a] sm:$0xff] }
 0x130   : > { %12501 = vmatprep.subr.bf16.mxu0 %v12500_v44 }
 0x132   : > { %11358 = vmatmul.mubr.msk.f32.gmra.mrb[2].mxu0 %vm903_vm0, %v14084_v56 }
 0x133   : > { %11360 = vmatprep.mubr.msk.f32.mxu0 %vm903_vm0, %v14088_v57  ;;  %12503 = vmatpush3.bf16.msra.mxu0 %v12500_v44  ;;  %v1760_v44 = vld [vmem:[#allocation2 + $0xca] sm:$0xff] }
 0x134   : > { %12505 = vmatprep.subr.bf16.mxu0 %v14082_v53 }
 0x136   : > { %11361 = vmatmul.mubr.msk.f32.gmra.mrb[4].mxu0 %vm903_vm0, %v14093_v20 }
 0x137   : > { %11363 = vmatprep.mubr.msk.f32.mxu0 %vm903_vm0, %v14097_v7 }
 0x13a   : > { %11364 = vmatmul.mubr.msk.f32.gmra.mrb[6].mxu0 %vm903_vm0, %v14101_v60 }
 0x13b   : > { %11366 = vmatprep.mubr.msk.f32.mxu0 %vm903_vm0, %v14105_v63 }
 0x13e   : > { %11367 = vmatmul.mubr.msk.f32.gmra.mrb[8].mxu0 %vm903_vm0, %v14109_v0 }
 0x13f   : > { %11369 = vmatprep.mubr.msk.f32.mxu0 %vm903_vm0, %v14113_v3 }
 0x142   : > { %11370 = vmatmul.mubr.msk.f32.gmra.mrb[10].mxu0 %vm903_vm0, %v14117_v4 }
 0x143   : > { %11372 = vmatprep.mubr.msk.f32.mxu0 %vm903_vm0, %v14121_v8 }
 0x146   : > { %11373 = vmatmul.mubr.msk.f32.gmra.mrb[12].mxu0 %vm903_vm0, %v14125_v11 }
 0x147   : > { %11375 = vmatprep.mubr.msk.f32.mxu0 %vm903_vm0, %v14129_v13 }
 0x14a   : > { %11376 = vmatmul.mubr.msk.f32.gmra.mrb[14].mxu0 %vm903_vm0, %v14133_v16 }
 0x14b   : > { %11378 = vmatprep.mubr.msk.f32.mxu0 %vm903_vm0, %v14137_v21 }
 0x14e   : > { %11379 = vmatmul.mubr.msk.f32.gmra.mrb[16].mxu0 %vm903_vm0, %v14141_v25 }
 0x14f   : > { %11381 = vmatprep.mubr.msk.f32.mxu0 %vm903_vm0, %v1753_v28 }
 0x152   : > { %11382 = vmatmul.mubr.msk.f32.gmra.mrb[18].mxu0 %vm903_vm0, %v1754_v29 }
 0x153   : > { %11384 = vmatprep.mubr.msk.f32.mxu0 %vm903_vm0, %v1755_v33 }
 0x156   : > { %11385 = vmatmul.mubr.msk.f32.gmra.mrb[20].mxu0 %vm903_vm0, %v1756_v36 }
 0x157   : > { %11387 = vmatprep.mubr.msk.f32.mxu0 %vm903_vm0, %v1757_v37 }
 0x15a   : > { %11388 = vmatmul.mubr.msk.f32.gmra.mrb[22].mxu0 %vm903_vm0, %v1758_v40 }
 0x15b   : > { %11390 = vmatprep.mubr.msk.f32.mxu0 %vm903_vm0, %v1759_v41 }
 0x15e   : > { %11391 = vmatmul.mubr.msk.f32.gmra.mrb[24].mxu0 %vm903_vm0, %v1760_v44 }
 0x15f   : > { %11393 = vmatprep.mubr.msk.f32.mxu0 %vm903_vm0, %v1761_v45 }
 0x162   : > { %11394 = vmatmul.mubr.msk.f32.gmra.mrb[26].mxu0 %vm903_vm0, %v1762_v48 }
 0x163   : > { %11396 = vmatprep.mubr.msk.f32.mxu0 %vm903_vm0, %v1763_v49 }
 0x166   : > { %11397 = vmatmul.mubr.msk.f32.gmra.mrb[28].mxu0 %vm903_vm0, %v1764_v19 }
 0x167   : > { %11399 = vmatprep.mubr.msk.f32.mxu0 %vm903_vm0, %v1765_v32 }
 0x16a   : > { %11400 = vmatmul.mubr.msk.f32.gmra.mrb[30].mxu0 %vm903_vm0, %v1766_v43 }
 0x16b   : > { %11402 = vmatprep.mubr.msk.f32.mxu0 %vm903_vm0, %v1767_v42 }
 0x16e   : > { %11403 = vmatmul.mubr.msk.f32.gmra.mrb[32].mxu0 %vm903_vm0, %v1768_v39 }
 0x16f   : > { %11405 = vmatprep.mubr.msk.f32.mxu0 %vm903_vm0, %v1769_v38 }
 0x172   : > { %11406 = vmatmul.mubr.msk.f32.gmra.mrb[34].mxu0 %vm903_vm0, %v1770_v35 }
 0x173   : > { %11416 = vmatprep.mubr.msk.f32.mxu0 %vm903_vm0, %v14077_v27  ;;  %v2599_v27 = vld [vmem:[#allocation2 + $0x33] sm:$0xff] }
 0x176   : > { %11417 = vmatmul.mubr.msk.f32.vlgmr.msra.gmra.mrb[0].mxu0 %vm903_vm0, %v14084_v56  ;;  %v2601_v56 = vld [vmem:[#allocation2 + $0x43] sm:$0xff] }
 0x177   : > { %12507 = vmatpush3.bf16.msra.mxu0 %v14082_v53  ;;  %11419 = vmatprep.mubr.msk.f32.mxu0 %vm903_vm0, %v14088_v57  ;;  %v2600_v53 = vld [vmem:[#allocation2 + $0x3b] sm:$0xff]  ;;  %v2603_v57 = vld [vmem:[#allocation2 + $0x53] sm:$0xff] }
 0x178   : > { %12509 = vmatprep.subr.bf16.mxu0 %v12508_v30 }
 0x17a   : > { %11420 = vmatmul.mubr.msk.f32.gmra.mrb[2].mxu0 %vm903_vm0, %v14093_v20  ;;  %v2604_v20 = vld [vmem:[#allocation2 + $0x5b] sm:$0xff] }
 0x17b   : > { %11422 = vmatprep.mubr.msk.f32.mxu0 %vm903_vm0, %v14097_v7  ;;  %12511 = vmatpush3.bf16.msra.mxu0 %v12508_v30  ;;  %v9839_v30 = vld [vmem:[%s15801_s6 + $0xb0] sm:$0xff]  ;;  %v2605_v7 = vld [vmem:[#allocation2 + $0x63] sm:$0xff] }
 0x17c   : > { %12513 = vmatprep.subr.bf16.mxu0 %v12512_v23 }
 0x17e   : > { %11423 = vmatmul.mubr.msk.f32.gmra.mrb[4].mxu0 %vm903_vm0, %v14101_v60  ;;  %v2606_v60 = vld [vmem:[#allocation2 + $0x6b] sm:$0xff] }
 0x17f   : > { %11425 = vmatprep.mubr.msk.f32.mxu0 %vm903_vm0, %v14105_v63  ;;  %v2607_v63 = vld [vmem:[#allocation2 + $0x73] sm:$0xff] }
 0x182   : > { %11426 = vmatmul.mubr.msk.f32.gmra.mrb[6].mxu0 %vm903_vm0, %v14109_v0  ;;  %v2608_v0 = vld [vmem:[#allocation2 + $0x7b] sm:$0xff] }
 0x183   : > { %11428 = vmatprep.mubr.msk.f32.mxu0 %vm903_vm0, %v14113_v3  ;;  %v2609_v3 = vld [vmem:[#allocation2 + $0x83] sm:$0xff] }
 0x186   : > { %11429 = vmatmul.mubr.msk.f32.gmra.mrb[8].mxu0 %vm903_vm0, %v14117_v4  ;;  %v2610_v4 = vld [vmem:[#allocation2 + $0x8b] sm:$0xff] }
 0x187   : > { %11431 = vmatprep.mubr.msk.f32.mxu0 %vm903_vm0, %v14121_v8  ;;  %v2611_v8 = vld [vmem:[#allocation2 + $0x93] sm:$0xff] }
 0x18a   : > { %11432 = vmatmul.mubr.msk.f32.gmra.mrb[10].mxu0 %vm903_vm0, %v14125_v11  ;;  %v2612_v11 = vld [vmem:[#allocation2 + $0x9b] sm:$0xff] }
 0x18b   : > { %11434 = vmatprep.mubr.msk.f32.mxu0 %vm903_vm0, %v14129_v13  ;;  %v2613_v13 = vld [vmem:[#allocation2 + $0xa3] sm:$0xff] }
 0x18e   : > { %11435 = vmatmul.mubr.msk.f32.gmra.mrb[12].mxu0 %vm903_vm0, %v14133_v16  ;;  %v2614_v16 = vld [vmem:[#allocation2 + $0xab] sm:$0xff] }
 0x18f   : > { %11437 = vmatprep.mubr.msk.f32.mxu0 %vm903_vm0, %v14137_v21  ;;  %v2615_v21 = vld [vmem:[#allocation2 + $0xb3] sm:$0xff] }
 0x192   : > { %11438 = vmatmul.mubr.msk.f32.gmra.mrb[14].mxu0 %vm903_vm0, %v14141_v25  ;;  %v2616_v25 = vld [vmem:[#allocation2 + $0xbb] sm:$0xff] }
 0x193   : > { %11440 = vmatprep.mubr.msk.f32.mxu0 %vm903_vm0, %v1753_v28  ;;  %v2617_v28 = vld [vmem:[#allocation2 + $0xc3] sm:$0xff] }
 0x196   : > { %11441 = vmatmul.mubr.msk.f32.gmra.mrb[16].mxu0 %vm903_vm0, %v1754_v29  ;;  %v2618_v29 = vld [vmem:[#allocation2 + $0xcb] sm:$0xff] }
 0x197   : > { %11443 = vmatprep.mubr.msk.f32.mxu0 %vm903_vm0, %v1755_v33  ;;  %v2619_v33 = vld [vmem:[#allocation2 + $0xd3] sm:$0xff] }
 0x19a   : > { %11444 = vmatmul.mubr.msk.f32.gmra.mrb[18].mxu0 %vm903_vm0, %v1756_v36  ;;  %v2620_v36 = vld [vmem:[#allocation2 + $0xdb] sm:$0xff] }
 0x19b   : > { %11446 = vmatprep.mubr.msk.f32.mxu0 %vm903_vm0, %v1757_v37  ;;  %v2621_v37 = vld [vmem:[#allocation2 + $0xe3] sm:$0xff] }
 0x19e   : > { %11447 = vmatmul.mubr.msk.f32.gmra.mrb[20].mxu0 %vm903_vm0, %v1758_v40  ;;  %v2622_v40 = vld [vmem:[#allocation2 + $0xeb] sm:$0xff] }
 0x19f   : > { %11449 = vmatprep.mubr.msk.f32.mxu0 %vm903_vm0, %v1759_v41  ;;  %v2623_v41 = vld [vmem:[#allocation2 + $0xf3] sm:$0xff] }
 0x1a2   : > { %11450 = vmatmul.mubr.msk.f32.gmra.mrb[22].mxu0 %vm903_vm0, %v1760_v44  ;;  %v2624_v44 = vld [vmem:[#allocation2 + $0xfb] sm:$0xff] }
 0x1a3   : > { %11452 = vmatprep.mubr.msk.f32.mxu0 %vm903_vm0, %v1761_v45  ;;  %v2625_v45 = vld [vmem:[#allocation2 + $0x103] sm:$0xff] }
 0x1a6   : > { %11453 = vmatmul.mubr.msk.f32.gmra.mrb[24].mxu0 %vm903_vm0, %v1762_v48  ;;  %v2626_v48 = vld [vmem:[#allocation2 + $0x10b] sm:$0xff] }
 0x1a7   : > { %11455 = vmatprep.mubr.msk.f32.mxu0 %vm903_vm0, %v1763_v49  ;;  %v2627_v49 = vld [vmem:[#allocation2 + $0x113] sm:$0xff] }
 0x1aa   : > { %11456 = vmatmul.mubr.msk.f32.gmra.mrb[26].mxu0 %vm903_vm0, %v1764_v19 }
 0x1ab   : > { %11458 = vmatprep.mubr.msk.f32.mxu0 %vm903_vm0, %v1765_v32  ;;  %v2598_v32 = vld [vmem:[#allocation2 + $0x2b] sm:$0xff] }
 0x1ae   : > { %11459 = vmatmul.mubr.msk.f32.gmra.mrb[28].mxu0 %vm903_vm0, %v1766_v43  ;;  %v2597_v43 = vld [vmem:[#allocation2 + $0x23] sm:$0xff] }
 0x1af   : > { %11461 = vmatprep.mubr.msk.f32.mxu0 %vm903_vm0, %v1767_v42  ;;  %v9878_v42 = vld [vmem:[%s15801_s6 + $0xc8] sm:$0xff] }
 0x1b2   : > { %11462 = vmatmul.mubr.msk.f32.gmra.mrb[30].mxu0 %vm903_vm0, %v1768_v39  ;;  %v2596_v39 = vld [vmem:[#allocation2 + $0x1b] sm:$0xff] }
 0x1b3   : > { %11464 = vmatprep.mubr.msk.f32.mxu0 %vm903_vm0, %v1769_v38  ;;  %v12516_v38 = vpack.c.bf16 %v9840_v31, %v9839_v30  ;;  %v2630_v30 = vld [vmem:[#allocation2 + $0x12b] sm:$0xff] }
 0x1b4   : > { %v9879_v31 = vld [vmem:[%s15801_s6 + $0xd0] sm:$0xff] }
 0x1b6   : > { %11465 = vmatmul.mubr.msk.f32.gmra.mrb[32].mxu0 %vm903_vm0, %v1770_v35  ;;  %v9877_v35 = vld [vmem:[%s15801_s6 + $0xc0] sm:$0xff] }
 0x1b7   : > { %11467 = vmatprep.mubr.msk.f32.mxu0 %vm903_vm0, %v2199_v52  ;;  %v14243_v19 = vpack.c.bf16 %v9878_v42, %v9877_v35  ;;  %v2628_v52 = vld [vmem:[#allocation2 + $0x11b] sm:$0xff] }
 0x1b8   : > { %v3026_v35 = vld [vmem:[#allocation2 + $0x1c] sm:$0xff] }
 0x1b9   : > { %v9917_v42 = vld [vmem:[%s15801_s6 + $0xe0] sm:$0xff] }
 0x1ba   : > { %11468 = vmatmul.mubr.msk.f32.gmra.mrb[34].mxu0 %vm903_vm0, %v2200_v26  ;;  %v2629_v26 = vld [vmem:[#allocation2 + $0x123] sm:$0xff] }
 0x1bb   : > { %11478 = vmatprep.mubr.msk.f32.mxu0 %vm903_vm0, %v2595_v34  ;;  %v9880_v34 = vld [vmem:[%s15801_s6 + $0xd8] sm:$0xff] }
 0x1be   : > { %11479 = vmatmul.mubr.msk.f32.vlgmr.msra.gmra.mrb[0].mxu0 %vm903_vm0, %v2596_v39  ;;  %v12524_v39 = vpack.c.bf16 %v9880_v34, %v9879_v31  ;;  %v3060_v31 = vld [vmem:[#allocation2 + $0x12c] sm:$0xff] }
 0x1bf   : > { %12515 = vmatpush3.bf16.msra.mxu0 %v12512_v23  ;;  %11481 = vmatprep.mubr.msk.f32.mxu0 %vm903_vm0, %v2597_v43  ;;  %v2602_v23 = vld [vmem:[#allocation2 + $0x4b] sm:$0xff] }
 0x1c0   : > { %12517 = vmatprep.subr.bf16.mxu0 %v12516_v38  ;;  %v9918_v43 = vld [vmem:[%s15801_s6 + $0xe8] sm:$0xff]  ;;  %v9919_v34 = vld [vmem:[%s15801_s6 + $0xf0] sm:$0xff] }
 0x1c2   : > { %11482 = vmatmul.mubr.msk.f32.gmra.mrb[2].mxu0 %vm903_vm0, %v2598_v32  ;;  %v14293_v32 = vld [vmem:[#allocation2 + $0x24] sm:$0xff] }
 0x1c3   : > { %11484 = vmatprep.mubr.msk.f32.mxu0 %vm903_vm0, %v2599_v27  ;;  %12519 = vmatpush3.bf16.msra.mxu0 %v12516_v38  ;;  %v3025_v38 = vld [vmem:[#allocation2 + $0x14] sm:$0xff]  ;;  %v14298_v27 = vpack.c.bf16 %v9918_v43, %v9917_v42  ;;  %v9958_v42 = vld [vmem:[%s15801_s6 + $0x108] sm:$0xff] }
 0x1c4   : > { %12521 = vmatprep.subr.bf16.mxu0 %v14243_v19 }
 0x1c6   : > { %11485 = vmatmul.mubr.msk.f32.gmra.mrb[4].mxu0 %vm903_vm0, %v2600_v53  ;;  %v14300_v53 = vld [vmem:[#allocation2 + $0x2c] sm:$0xff] }
 0x1c7   : > { %11487 = vmatprep.mubr.msk.f32.mxu0 %vm903_vm0, %v2601_v56  ;;  %v14304_v56 = vld [vmem:[#allocation2 + $0x34] sm:$0xff] }
 0x1ca   : > { %11488 = vmatmul.mubr.msk.f32.gmra.mrb[6].mxu0 %vm903_vm0, %v2602_v23  ;;  %v14313_v23 = vld [vmem:[#allocation2 + $0x44] sm:$0xff] }
 0x1cb   : > { %11490 = vmatprep.mubr.msk.f32.mxu0 %vm903_vm0, %v2603_v57  ;;  %v14317_v57 = vld [vmem:[#allocation2 + $0x4c] sm:$0xff] }
 0x1ce   : > { %11491 = vmatmul.mubr.msk.f32.gmra.mrb[8].mxu0 %vm903_vm0, %v2604_v20  ;;  %v14321_v20 = vld [vmem:[#allocation2 + $0x54] sm:$0xff] }
 0x1cf   : > { %11493 = vmatprep.mubr.msk.f32.mxu0 %vm903_vm0, %v2605_v7  ;;  %v14325_v7 = vld [vmem:[#allocation2 + $0x5c] sm:$0xff] }
 0x1d2   : > { %11494 = vmatmul.mubr.msk.f32.gmra.mrb[10].mxu0 %vm903_vm0, %v2606_v60  ;;  %v14329_v60 = vld [vmem:[#allocation2 + $0x64] sm:$0xff] }
 0x1d3   : > { %11496 = vmatprep.mubr.msk.f32.mxu0 %vm903_vm0, %v2607_v63  ;;  %v14333_v63 = vld [vmem:[#allocation2 + $0x6c] sm:$0xff] }
 0x1d6   : > { %11497 = vmatmul.mubr.msk.f32.gmra.mrb[12].mxu0 %vm903_vm0, %v2608_v0  ;;  %v14337_v0 = vld [vmem:[#allocation2 + $0x74] sm:$0xff] }
 0x1d7   : > { %11499 = vmatprep.mubr.msk.f32.mxu0 %vm903_vm0, %v2609_v3  ;;  %v14341_v3 = vld [vmem:[#allocation2 + $0x7c] sm:$0xff] }
 0x1da   : > { %11500 = vmatmul.mubr.msk.f32.gmra.mrb[14].mxu0 %vm903_vm0, %v2610_v4  ;;  %v14345_v4 = vld [vmem:[#allocation2 + $0x84] sm:$0xff] }
 0x1db   : > { %11502 = vmatprep.mubr.msk.f32.mxu0 %vm903_vm0, %v2611_v8  ;;  %v14349_v8 = vld [vmem:[#allocation2 + $0x8c] sm:$0xff] }
 0x1de   : > { %11503 = vmatmul.mubr.msk.f32.gmra.mrb[16].mxu0 %vm903_vm0, %v2612_v11  ;;  %v14353_v11 = vld [vmem:[#allocation2 + $0x94] sm:$0xff] }
 0x1df   : > { %11505 = vmatprep.mubr.msk.f32.mxu0 %vm903_vm0, %v2613_v13  ;;  %v14357_v13 = vld [vmem:[#allocation2 + $0x9c] sm:$0xff] }
 0x1e2   : > { %11506 = vmatmul.mubr.msk.f32.gmra.mrb[18].mxu0 %vm903_vm0, %v2614_v16  ;;  %v3043_v16 = vld [vmem:[#allocation2 + $0xa4] sm:$0xff] }
 0x1e3   : > { %11508 = vmatprep.mubr.msk.f32.mxu0 %vm903_vm0, %v2615_v21  ;;  %v3044_v21 = vld [vmem:[#allocation2 + $0xac] sm:$0xff] }
 0x1e6   : > { %11509 = vmatmul.mubr.msk.f32.gmra.mrb[20].mxu0 %vm903_vm0, %v2616_v25  ;;  %v3045_v25 = vld [vmem:[#allocation2 + $0xb4] sm:$0xff] }
 0x1e7   : > { %11511 = vmatprep.mubr.msk.f32.mxu0 %vm903_vm0, %v2617_v28  ;;  %v3046_v28 = vld [vmem:[#allocation2 + $0xbc] sm:$0xff] }
 0x1ea   : > { %11512 = vmatmul.mubr.msk.f32.gmra.mrb[22].mxu0 %vm903_vm0, %v2618_v29  ;;  %v3047_v29 = vld [vmem:[#allocation2 + $0xc4] sm:$0xff] }
 0x1eb   : > { %11514 = vmatprep.mubr.msk.f32.mxu0 %vm903_vm0, %v2619_v33  ;;  %v3048_v33 = vld [vmem:[#allocation2 + $0xcc] sm:$0xff] }
 0x1ee   : > { %11515 = vmatmul.mubr.msk.f32.gmra.mrb[24].mxu0 %vm903_vm0, %v2620_v36  ;;  %v3049_v36 = vld [vmem:[#allocation2 + $0xd4] sm:$0xff] }
 0x1ef   : > { %11517 = vmatprep.mubr.msk.f32.mxu0 %vm903_vm0, %v2621_v37  ;;  %v3050_v37 = vld [vmem:[#allocation2 + $0xdc] sm:$0xff] }
 0x1f2   : > { %11518 = vmatmul.mubr.msk.f32.gmra.mrb[26].mxu0 %vm903_vm0, %v2622_v40  ;;  %v3051_v40 = vld [vmem:[#allocation2 + $0xe4] sm:$0xff] }
 0x1f3   : > { %11520 = vmatprep.mubr.msk.f32.mxu0 %vm903_vm0, %v2623_v41  ;;  %v3052_v41 = vld [vmem:[#allocation2 + $0xec] sm:$0xff] }
 0x1f6   : > { %11521 = vmatmul.mubr.msk.f32.gmra.mrb[28].mxu0 %vm903_vm0, %v2624_v44  ;;  %v3053_v44 = vld [vmem:[#allocation2 + $0xf4] sm:$0xff] }
 0x1f7   : > { %11523 = vmatprep.mubr.msk.f32.mxu0 %vm903_vm0, %v2625_v45  ;;  %v3054_v45 = vld [vmem:[#allocation2 + $0xfc] sm:$0xff] }
 0x1fa   : > { %11524 = vmatmul.mubr.msk.f32.gmra.mrb[30].mxu0 %vm903_vm0, %v2626_v48  ;;  %v3055_v48 = vld [vmem:[#allocation2 + $0x104] sm:$0xff] }
 0x1fb   : > { %11526 = vmatprep.mubr.msk.f32.mxu0 %vm903_vm0, %v2627_v49  ;;  %v3056_v49 = vld [vmem:[#allocation2 + $0x10c] sm:$0xff] }
 0x1fe   : > { %11527 = vmatmul.mubr.msk.f32.gmra.mrb[32].mxu0 %vm903_vm0, %v2628_v52  ;;  %v3057_v52 = vld [vmem:[#allocation2 + $0x114] sm:$0xff] }
 0x1ff   : > { %11529 = vmatprep.mubr.msk.f32.mxu0 %vm903_vm0, %v2629_v26  ;;  %v3058_v26 = vld [vmem:[#allocation2 + $0x11c] sm:$0xff] }
 0x202   : > { %11530 = vmatmul.mubr.msk.f32.gmra.mrb[34].mxu0 %vm903_vm0, %v2630_v30  ;;  %v3059_v30 = vld [vmem:[#allocation2 + $0x124] sm:$0xff] }
 0x203   : > { %11540 = vmatprep.mubr.msk.f32.mxu0 %vm903_vm0, %v3025_v38  ;;  %v9920_v38 = vld [vmem:[%s15801_s6 + $0xf8] sm:$0xff] }
 0x206   : > { %11541 = vmatmul.mubr.msk.f32.vlgmr.msra.gmra.mrb[0].mxu0 %vm903_vm0, %v3026_v35  ;;  %v9957_v35 = vld [vmem:[%s15801_s6 + $0x100] sm:$0xff] }
 0x207   : > { %12523 = vmatpush3.bf16.msra.mxu0 %v14243_v19  ;;  %11543 = vmatprep.mubr.msk.f32.mxu0 %vm903_vm0, %v14293_v32  ;;  %v14309_v19 = vld [vmem:[#allocation2 + $0x3c] sm:$0xff]  ;;  %v12536_v43 = vpack.c.bf16 %v9958_v42, %v9957_v35 }
 0x208   : > { %12525 = vmatprep.subr.bf16.mxu0 %v12524_v39  ;;  %v3915_v35 = vld [vmem:[#allocation2 + $0x115] sm:$0xff]  ;;  %v3916_v42 = vld [vmem:[#allocation2 + $0x11d] sm:$0xff] }
 0x20a   : > { %11544 = vmatmul.mubr.msk.f32.gmra.mrb[2].mxu0 %vm903_vm0, %v14300_v53 }
 0x20b   : > { %11546 = vmatprep.mubr.msk.f32.mxu0 %vm903_vm0, %v14304_v56  ;;  %12527 = vmatpush3.bf16.msra.mxu0 %v12524_v39  ;;  %v12532_v39 = vpack.c.bf16 %v9920_v38, %v9919_v34  ;;  %v3912_v34 = vld [vmem:[#allocation2 + $0xfd] sm:$0xff]  ;;  %v3913_v38 = vld [vmem:[#allocation2 + $0x105] sm:$0xff] }
 0x20c   : > { %12529 = vmatprep.subr.bf16.mxu0 %v14298_v27 }
 0x20e   : > { %11547 = vmatmul.mubr.msk.f32.gmra.mrb[4].mxu0 %vm903_vm0, %v14309_v19 }
 0x20f   : > { %11549 = vmatprep.mubr.msk.f32.mxu0 %vm903_vm0, %v14313_v23 }
 0x212   : > { %11550 = vmatmul.mubr.msk.f32.gmra.mrb[6].mxu0 %vm903_vm0, %v14317_v57 }
 0x213   : > { %11552 = vmatprep.mubr.msk.f32.mxu0 %vm903_vm0, %v14321_v20 }
 0x216   : > { %11553 = vmatmul.mubr.msk.f32.gmra.mrb[8].mxu0 %vm903_vm0, %v14325_v7 }
 0x217   : > { %11555 = vmatprep.mubr.msk.f32.mxu0 %vm903_vm0, %v14329_v60 }
 0x21a   : > { %11556 = vmatmul.mubr.msk.f32.gmra.mrb[10].mxu0 %vm903_vm0, %v14333_v63 }
 0x21b   : > { %11558 = vmatprep.mubr.msk.f32.mxu0 %vm903_vm0, %v14337_v0 }
 0x21e   : > { %11559 = vmatmul.mubr.msk.f32.gmra.mrb[12].mxu0 %vm903_vm0, %v14341_v3 }
 0x21f   : > { %11561 = vmatprep.mubr.msk.f32.mxu0 %vm903_vm0, %v14345_v4 }
 0x222   : > { %11562 = vmatmul.mubr.msk.f32.gmra.mrb[14].mxu0 %vm903_vm0, %v14349_v8 }
 0x223   : > { %11564 = vmatprep.mubr.msk.f32.mxu0 %vm903_vm0, %v14353_v11 }
 0x226   : > { %11565 = vmatmul.mubr.msk.f32.gmra.mrb[16].mxu0 %vm903_vm0, %v14357_v13 }
 0x227   : > { %11567 = vmatprep.mubr.msk.f32.mxu0 %vm903_vm0, %v3043_v16 }
 0x22a   : > { %11568 = vmatmul.mubr.msk.f32.gmra.mrb[18].mxu0 %vm903_vm0, %v3044_v21 }
 0x22b   : > { %11570 = vmatprep.mubr.msk.f32.mxu0 %vm903_vm0, %v3045_v25 }
 0x22e   : > { %11571 = vmatmul.mubr.msk.f32.gmra.mrb[20].mxu0 %vm903_vm0, %v3046_v28 }
 0x22f   : > { %11573 = vmatprep.mubr.msk.f32.mxu0 %vm903_vm0, %v3047_v29 }
 0x232   : > { %11574 = vmatmul.mubr.msk.f32.gmra.mrb[22].mxu0 %vm903_vm0, %v3048_v33 }
 0x233   : > { %11576 = vmatprep.mubr.msk.f32.mxu0 %vm903_vm0, %v3049_v36 }
 0x236   : > { %11577 = vmatmul.mubr.msk.f32.gmra.mrb[24].mxu0 %vm903_vm0, %v3050_v37 }
 0x237   : > { %11579 = vmatprep.mubr.msk.f32.mxu0 %vm903_vm0, %v3051_v40 }
 0x23a   : > { %11580 = vmatmul.mubr.msk.f32.gmra.mrb[26].mxu0 %vm903_vm0, %v3052_v41 }
 0x23b   : > { %11582 = vmatprep.mubr.msk.f32.mxu0 %vm903_vm0, %v3053_v44 }
 0x23e   : > { %11583 = vmatmul.mubr.msk.f32.gmra.mrb[28].mxu0 %vm903_vm0, %v3054_v45 }
 0x23f   : > { %11585 = vmatprep.mubr.msk.f32.mxu0 %vm903_vm0, %v3055_v48 }
 0x242   : > { %11586 = vmatmul.mubr.msk.f32.gmra.mrb[30].mxu0 %vm903_vm0, %v3056_v49 }
 0x243   : > { %11588 = vmatprep.mubr.msk.f32.mxu0 %vm903_vm0, %v3057_v52 }
 0x246   : > { %11589 = vmatmul.mubr.msk.f32.gmra.mrb[32].mxu0 %vm903_vm0, %v3058_v26 }
 0x247   : > { %11591 = vmatprep.mubr.msk.f32.mxu0 %vm903_vm0, %v3059_v30 }
 0x24a   : > { %11592 = vmatmul.mubr.msk.f32.gmra.mrb[34].mxu0 %vm903_vm0, %v3060_v31 }
 0x24b   : > { %11602 = vmatprep.mubr.msk.f32.mxu0 %vm903_vm0, %v14293_v32  ;;  %v3489_v32 = vld [vmem:[#allocation2 + $0x134] sm:$0xff] }
 0x24e   : > { %11603 = vmatmul.mubr.msk.f32.vlgmr.msra.gmra.mrb[0].mxu0 %vm903_vm0, %v14300_v53  ;;  %v9959_v53 = vld [vmem:[%s15801_s6 + $0x110] sm:$0xff] }
 0x24f   : > { %12531 = vmatpush3.bf16.msra.mxu0 %v14298_v27  ;;  %11605 = vmatprep.mubr.msk.f32.mxu0 %vm903_vm0, %v14304_v56  ;;  %v3490_v27 = vld [vmem:[#allocation2 + $0x13c] sm:$0xff] }
 0x250   : > { %12533 = vmatprep.subr.bf16.mxu0 %v12532_v39  ;;  %v9960_v56 = vld [vmem:[%s15801_s6 + $0x118] sm:$0xff] }
 0x252   : > { %11606 = vmatmul.mubr.msk.f32.gmra.mrb[2].mxu0 %vm903_vm0, %v14309_v19  ;;  %v3885_v19 = vld [vmem:[#allocation2 + $0x25] sm:$0xff] }
 0x253   : > { %11608 = vmatprep.mubr.msk.f32.mxu0 %vm903_vm0, %v14313_v23  ;;  %12535 = vmatpush3.bf16.msra.mxu0 %v12532_v39  ;;  %v12540_v23 = vpack.c.bf16 %v9960_v56, %v9959_v53  ;;  %v3914_v39 = vld [vmem:[#allocation2 + $0x10d] sm:$0xff]  ;;  %v3920_v53 = vld [vmem:[#allocation2 + $0x13d] sm:$0xff] }
 0x254   : > { %12537 = vmatprep.subr.bf16.mxu0 %v12536_v43  ;;  %v4315_v56 = vld [vmem:[#allocation2 + $0x26] sm:$0xff] }
 0x256   : > { %11609 = vmatmul.mubr.msk.f32.gmra.mrb[4].mxu0 %vm903_vm0, %v14317_v57  ;;  %v3886_v57 = vld [vmem:[#allocation2 + $0x2d] sm:$0xff] }
 0x257   : > { %11611 = vmatprep.mubr.msk.f32.mxu0 %vm903_vm0, %v14321_v20  ;;  %v3887_v20 = vld [vmem:[#allocation2 + $0x35] sm:$0xff] }
 0x25a   : > { %11612 = vmatmul.mubr.msk.f32.gmra.mrb[6].mxu0 %vm903_vm0, %v14325_v7  ;;  %v3888_v7 = vld [vmem:[#allocation2 + $0x3d] sm:$0xff] }
 0x25b   : > { %11614 = vmatprep.mubr.msk.f32.mxu0 %vm903_vm0, %v14329_v60  ;;  %v3889_v60 = vld [vmem:[#allocation2 + $0x45] sm:$0xff] }
 0x25e   : > { %11615 = vmatmul.mubr.msk.f32.gmra.mrb[8].mxu0 %vm903_vm0, %v14333_v63  ;;  %v3890_v63 = vld [vmem:[#allocation2 + $0x4d] sm:$0xff] }
 0x25f   : > { %11617 = vmatprep.mubr.msk.f32.mxu0 %vm903_vm0, %v14337_v0  ;;  %v3891_v0 = vld [vmem:[#allocation2 + $0x55] sm:$0xff] }
 0x262   : > { %11618 = vmatmul.mubr.msk.f32.gmra.mrb[10].mxu0 %vm903_vm0, %v14341_v3  ;;  %v3892_v3 = vld [vmem:[#allocation2 + $0x5d] sm:$0xff] }
 0x263   : > { %11620 = vmatprep.mubr.msk.f32.mxu0 %vm903_vm0, %v14345_v4  ;;  %v3893_v4 = vld [vmem:[#allocation2 + $0x65] sm:$0xff] }
 0x266   : > { %11621 = vmatmul.mubr.msk.f32.gmra.mrb[12].mxu0 %vm903_vm0, %v14349_v8  ;;  %v9999_v8 = vld [vmem:[%s15802_s7 + $0x40] sm:$0xff] }
 0x267   : > { %11623 = vmatprep.mubr.msk.f32.mxu0 %vm903_vm0, %v14353_v11  ;;  %v10000_v11 = vld [vmem:[%s15802_s7 + $0x48] sm:$0xff] }
 0x26a   : > { %11624 = vmatmul.mubr.msk.f32.gmra.mrb[14].mxu0 %vm903_vm0, %v14357_v13  ;;  %v14465_v13 = vpack.c.bf16 %v10000_v11, %v9999_v8  ;;  %v4326_v8 = vld [vmem:[#allocation2 + $0x7e] sm:$0xff]  ;;  %v4327_v11 = vld [vmem:[#allocation2 + $0x86] sm:$0xff] }
 0x26b   : > { %11626 = vmatprep.mubr.msk.f32.mxu0 %vm903_vm0, %v3043_v16  ;;  %v3894_v16 = vld [vmem:[#allocation2 + $0x6d] sm:$0xff] }
 0x26c   : > { %12696 = vmatprep.subr.bf16.mxu1 %v14465_v13 }
 0x26d   : > { %12700 = vmatpush3.bf16.msra.mxu1 %v14465_v13 }
 0x26e   : > { %11627 = vmatmul.mubr.msk.f32.gmra.mrb[16].mxu0 %vm903_vm0, %v3044_v21  ;;  %v3895_v21 = vld [vmem:[#allocation2 + $0x75] sm:$0xff] }
 0x26f   : > { %11629 = vmatprep.mubr.msk.f32.mxu0 %vm903_vm0, %v3045_v25  ;;  %v3896_v25 = vld [vmem:[#allocation2 + $0x7d] sm:$0xff] }
 0x272   : > { %11630 = vmatmul.mubr.msk.f32.gmra.mrb[18].mxu0 %vm903_vm0, %v3046_v28  ;;  %v3897_v28 = vld [vmem:[#allocation2 + $0x85] sm:$0xff] }
 0x273   : > { %11632 = vmatprep.mubr.msk.f32.mxu0 %vm903_vm0, %v3047_v29  ;;  %v3898_v29 = vld [vmem:[#allocation2 + $0x8d] sm:$0xff] }
 0x276   : > { %11633 = vmatmul.mubr.msk.f32.gmra.mrb[20].mxu0 %vm903_vm0, %v3048_v33  ;;  %v3899_v33 = vld [vmem:[#allocation2 + $0x95] sm:$0xff] }
 0x277   : > { %11635 = vmatprep.mubr.msk.f32.mxu0 %vm903_vm0, %v3049_v36  ;;  %v3900_v36 = vld [vmem:[#allocation2 + $0x9d] sm:$0xff] }
 0x27a   : > { %11636 = vmatmul.mubr.msk.f32.gmra.mrb[22].mxu0 %vm903_vm0, %v3050_v37  ;;  %v3901_v37 = vld [vmem:[#allocation2 + $0xa5] sm:$0xff] }
 0x27b   : > { %11638 = vmatprep.mubr.msk.f32.mxu0 %vm903_vm0, %v3051_v40  ;;  %v3902_v40 = vld [vmem:[#allocation2 + $0xad] sm:$0xff] }
 0x27e   : > { %11639 = vmatmul.mubr.msk.f32.gmra.mrb[24].mxu0 %vm903_vm0, %v3052_v41  ;;  %v3903_v41 = vld [vmem:[#allocation2 + $0xb5] sm:$0xff] }
 0x27f   : > { %11641 = vmatprep.mubr.msk.f32.mxu0 %vm903_vm0, %v3053_v44  ;;  %v3904_v44 = vld [vmem:[#allocation2 + $0xbd] sm:$0xff] }
 0x282   : > { %11642 = vmatmul.mubr.msk.f32.gmra.mrb[26].mxu0 %vm903_vm0, %v3054_v45  ;;  %v3905_v45 = vld [vmem:[#allocation2 + $0xc5] sm:$0xff] }
 0x283   : > { %11644 = vmatprep.mubr.msk.f32.mxu0 %vm903_vm0, %v3055_v48  ;;  %v3906_v48 = vld [vmem:[#allocation2 + $0xcd] sm:$0xff] }
 0x286   : > { %11645 = vmatmul.mubr.msk.f32.gmra.mrb[28].mxu0 %vm903_vm0, %v3056_v49  ;;  %v3907_v49 = vld [vmem:[#allocation2 + $0xd5] sm:$0xff] }
 0x287   : > { %11647 = vmatprep.mubr.msk.f32.mxu0 %vm903_vm0, %v3057_v52  ;;  %v3908_v52 = vld [vmem:[#allocation2 + $0xdd] sm:$0xff] }
 0x28a   : > { %11648 = vmatmul.mubr.msk.f32.gmra.mrb[30].mxu0 %vm903_vm0, %v3058_v26  ;;  %v3909_v26 = vld [vmem:[#allocation2 + $0xe5] sm:$0xff] }
 0x28b   : > { %11650 = vmatprep.mubr.msk.f32.mxu0 %vm903_vm0, %v3059_v30  ;;  %v3910_v30 = vld [vmem:[#allocation2 + $0xed] sm:$0xff] }
 0x28e   : > { %11651 = vmatmul.mubr.msk.f32.gmra.mrb[32].mxu0 %vm903_vm0, %v3060_v31  ;;  %v3911_v31 = vld [vmem:[#allocation2 + $0xf5] sm:$0xff] }
 0x28f   : > { %11653 = vmatprep.mubr.msk.f32.mxu0 %vm903_vm0, %v3489_v32  ;;  %v3918_v32 = vld [vmem:[#allocation2 + $0x12d] sm:$0xff] }
 0x292   : > { %11654 = vmatmul.mubr.msk.f32.gmra.mrb[34].mxu0 %vm903_vm0, %v3490_v27  ;;  %v3919_v27 = vld [vmem:[#allocation2 + $0x135] sm:$0xff] }
 0x293   : > { %11664 = vmatprep.mubr.msk.f32.mxu0 %vm903_vm0, %v3885_v19  ;;  %v4316_v19 = vld [vmem:[#allocation2 + $0x2e] sm:$0xff] }
 0x296   : > { %11665 = vmatmul.mubr.msk.f32.vlgmr.msra.gmra.mrb[0].mxu0 %vm903_vm0, %v3886_v57  ;;  %v4318_v57 = vld [vmem:[#allocation2 + $0x3e] sm:$0xff] }
 0x297   : > { %12539 = vmatpush3.bf16.msra.mxu0 %v12536_v43  ;;  %11667 = vmatprep.mubr.msk.f32.mxu0 %vm903_vm0, %v3887_v20  ;;  %v3917_v43 = vld [vmem:[#allocation2 + $0x125] sm:$0xff] }
 0x298   : > { %12541 = vmatprep.subr.bf16.mxu0 %v12540_v23  ;;  %v4319_v20 = vld [vmem:[#allocation2 + $0x46] sm:$0xff] }
 0x29a   : > { %11668 = vmatmul.mubr.msk.f32.gmra.mrb[2].mxu0 %vm903_vm0, %v3888_v7  ;;  %v4320_v7 = vld [vmem:[#allocation2 + $0x4e] sm:$0xff] }
 0x29b   : > { %11670 = vmatprep.mubr.msk.f32.mxu0 %vm903_vm0, %v3889_v60  ;;  %12543 = vmatpush3.bf16.msra.mxu0 %v12540_v23  ;;  %v4317_v23 = vld [vmem:[#allocation2 + $0x36] sm:$0xff] }
 0x29c   : > { %12545 = vmatprep.subr.bf16.mxu0 %v14465_v13  ;;  %v4321_v60 = vld [vmem:[#allocation2 + $0x56] sm:$0xff] }
 0x29e   : > { %11671 = vmatmul.mubr.msk.f32.gmra.mrb[4].mxu0 %vm903_vm0, %v3890_v63  ;;  %v4322_v63 = vld [vmem:[#allocation2 + $0x5e] sm:$0xff] }
 0x29f   : > { %11673 = vmatprep.mubr.msk.f32.mxu0 %vm903_vm0, %v3891_v0  ;;  %v4323_v0 = vld [vmem:[#allocation2 + $0x66] sm:$0xff] }
 0x2a2   : > { %11674 = vmatmul.mubr.msk.f32.gmra.mrb[6].mxu0 %vm903_vm0, %v3892_v3  ;;  %v4324_v3 = vld [vmem:[#allocation2 + $0x6e] sm:$0xff] }
 0x2a3   : > { %11676 = vmatprep.mubr.msk.f32.mxu0 %vm903_vm0, %v3893_v4  ;;  %v4325_v4 = vld [vmem:[#allocation2 + $0x76] sm:$0xff] }
 0x2a6   : > { %11677 = vmatmul.mubr.msk.f32.gmra.mrb[8].mxu0 %vm903_vm0, %v3894_v16  ;;  %v4329_v16 = vld [vmem:[#allocation2 + $0x96] sm:$0xff] }
 0x2a7   : > { %11679 = vmatprep.mubr.msk.f32.mxu0 %vm903_vm0, %v3895_v21  ;;  %v4330_v21 = vld [vmem:[#allocation2 + $0x9e] sm:$0xff] }
 0x2aa   : > { %11680 = vmatmul.mubr.msk.f32.gmra.mrb[10].mxu0 %vm903_vm0, %v3896_v25  ;;  %v4331_v25 = vld [vmem:[#allocation2 + $0xa6] sm:$0xff] }
 0x2ab   : > { %11682 = vmatprep.mubr.msk.f32.mxu0 %vm903_vm0, %v3897_v28  ;;  %v4332_v28 = vld [vmem:[#allocation2 + $0xae] sm:$0xff] }
 0x2ae   : > { %11683 = vmatmul.mubr.msk.f32.gmra.mrb[12].mxu0 %vm903_vm0, %v3898_v29  ;;  %v4333_v29 = vld [vmem:[#allocation2 + $0xb6] sm:$0xff] }
 0x2af   : > { %11685 = vmatprep.mubr.msk.f32.mxu0 %vm903_vm0, %v3899_v33  ;;  %v4334_v33 = vld [vmem:[#allocation2 + $0xbe] sm:$0xff] }
 0x2b2   : > { %11686 = vmatmul.mubr.msk.f32.gmra.mrb[14].mxu0 %vm903_vm0, %v3900_v36  ;;  %v4335_v36 = vld [vmem:[#allocation2 + $0xc6] sm:$0xff] }
 0x2b3   : > { %11688 = vmatprep.mubr.msk.f32.mxu0 %vm903_vm0, %v3901_v37  ;;  %v4336_v37 = vld [vmem:[#allocation2 + $0xce] sm:$0xff] }
 0x2b6   : > { %11689 = vmatmul.mubr.msk.f32.gmra.mrb[16].mxu0 %vm903_vm0, %v3902_v40  ;;  %v4337_v40 = vld [vmem:[#allocation2 + $0xd6] sm:$0xff] }
 0x2b7   : > { %11691 = vmatprep.mubr.msk.f32.mxu0 %vm903_vm0, %v3903_v41  ;;  %v4338_v41 = vld [vmem:[#allocation2 + $0xde] sm:$0xff] }
 0x2ba   : > { %11692 = vmatmul.mubr.msk.f32.gmra.mrb[18].mxu0 %vm903_vm0, %v3904_v44  ;;  %v4339_v44 = vld [vmem:[#allocation2 + $0xe6] sm:$0xff] }
 0x2bb   : > { %11694 = vmatprep.mubr.msk.f32.mxu0 %vm903_vm0, %v3905_v45  ;;  %v4340_v45 = vld [vmem:[#allocation2 + $0xee] sm:$0xff] }
 0x2be   : > { %11695 = vmatmul.mubr.msk.f32.gmra.mrb[20].mxu0 %vm903_vm0, %v3906_v48  ;;  %v4341_v48 = vld [vmem:[#allocation2 + $0xf6] sm:$0xff] }
 0x2bf   : > { %11697 = vmatprep.mubr.msk.f32.mxu0 %vm903_vm0, %v3907_v49  ;;  %v4342_v49 = vld [vmem:[#allocation2 + $0xfe] sm:$0xff] }
 0x2c2   : > { %11698 = vmatmul.mubr.msk.f32.gmra.mrb[22].mxu0 %vm903_vm0, %v3908_v52  ;;  %v4343_v52 = vld [vmem:[#allocation2 + $0x106] sm:$0xff] }
 0x2c3   : > { %11700 = vmatprep.mubr.msk.f32.mxu0 %vm903_vm0, %v3909_v26  ;;  %v4344_v26 = vld [vmem:[#allocation2 + $0x10e] sm:$0xff] }
 0x2c6   : > { %11701 = vmatmul.mubr.msk.f32.gmra.mrb[24].mxu0 %vm903_vm0, %v3910_v30  ;;  %v4345_v30 = vld [vmem:[#allocation2 + $0x116] sm:$0xff] }
 0x2c7   : > { %11703 = vmatprep.mubr.msk.f32.mxu0 %vm903_vm0, %v3911_v31  ;;  %v4346_v31 = vld [vmem:[#allocation2 + $0x11e] sm:$0xff] }
 0x2ca   : > { %11704 = vmatmul.mubr.msk.f32.gmra.mrb[26].mxu0 %vm903_vm0, %v3912_v34  ;;  %v4347_v34 = vld [vmem:[#allocation2 + $0x126] sm:$0xff] }
 0x2cb   : > { %11706 = vmatprep.mubr.msk.f32.mxu0 %vm903_vm0, %v3913_v38  ;;  %v4348_v38 = vld [vmem:[#allocation2 + $0x12e] sm:$0xff] }
 0x2ce   : > { %11707 = vmatmul.mubr.msk.f32.gmra.mrb[28].mxu0 %vm903_vm0, %v3914_v39  ;;  %v4349_v39 = vld [vmem:[#allocation2 + $0x136] sm:$0xff] }
 0x2cf   : > { %11709 = vmatprep.mubr.msk.f32.mxu0 %vm903_vm0, %v3915_v35  ;;  %v4350_v35 = vld [vmem:[#allocation2 + $0x13e] sm:$0xff] }
 0x2d2   : > { %11710 = vmatmul.mubr.msk.f32.gmra.mrb[30].mxu0 %vm903_vm0, %v3916_v42  ;;  %v13377_v42 = vmov 0.0  }
 0x2d3   : > { %11712 = vmatprep.mubr.msk.f32.mxu0 %vm903_vm0, %v3917_v43  ;;  %4749 = vst.msk [vmem:[#allocation3 + $0x18] sm:$0xff] %vm4745_vm1, %v13377_v42  ;;  %4750 = vst.msk [vmem:[#allocation3 + $0x20] sm:$0xff] %vm4745_vm1, %v13377_v42  ;;  %v10001_v43 = vld [vmem:[%s15802_s7 + $0x50] sm:$0xff] }
 0x2d4   : > { %4746 = vst.msk [vmem:[#allocation3] sm:$0xff] %vm4745_vm1, %v13377_v42  ;;  %4747 = vst.msk [vmem:[#allocation3 + $0x8] sm:$0xff] %vm4745_vm1, %v13377_v42 }
 0x2d5   : > { %4748 = vst.msk [vmem:[#allocation3 + $0x10] sm:$0xff] %vm4745_vm1, %v13377_v42  ;;  %4751 = vst.msk [vmem:[#allocation3 + $0x28] sm:$0xff] %vm4745_vm1, %v13377_v42 }
 0x2d6   : > { %11713 = vmatmul.mubr.msk.f32.gmra.mrb[32].mxu0 %vm903_vm0, %v3918_v32  ;;  %4752 = vst.msk [vmem:[#allocation3 + $0x30] sm:$0xff] %vm4745_vm1, %v13377_v42  ;;  %4753 = vst.msk [vmem:[#allocation3 + $0x38] sm:$0xff] %vm4745_vm1, %v13377_v42  ;;  %v10002_v32 = vld [vmem:[%s15802_s7 + $0x58] sm:$0xff] }
 0x2d7   : > { %11715 = vmatprep.mubr.msk.f32.mxu0 %vm903_vm0, %v3919_v27  ;;  %4754 = vst.msk [vmem:[#allocation3 + $0x40] sm:$0xff] %vm4745_vm1, %v13377_v42  ;;  %4755 = vst.msk [vmem:[#allocation3 + $0x48] sm:$0xff] %vm4745_vm1, %v13377_v42  ;;  %v12548_v27 = vpack.c.bf16 %v10002_v32, %v10001_v43 }
 0x2d8   : > { %4756 = vst.msk [vmem:[#allocation3 + $0x50] sm:$0xff] %vm4745_vm1, %v13377_v42  ;;  %4757 = vst.msk [vmem:[#allocation3 + $0x58] sm:$0xff] %vm4745_vm1, %v13377_v42 }
 0x2d9   : > { %4758 = vst.msk [vmem:[#allocation3 + $0x60] sm:$0xff] %vm4745_vm1, %v13377_v42  ;;  %4759 = vst.msk [vmem:[#allocation3 + $0x68] sm:$0xff] %vm4745_vm1, %v13377_v42  ;;  %12697 = vmatprep.subr.bf16.mxu1 %v12548_v27 }
 0x2da   : > { %11716 = vmatmul.mubr.msk.f32.gmra.mrb[34].mxu0 %vm903_vm0, %v3920_v53  ;;  %4760 = vst.msk [vmem:[#allocation3 + $0x70] sm:$0xff] %vm4745_vm1, %v13377_v42  ;;  %4761 = vst.msk [vmem:[#allocation3 + $0x78] sm:$0xff] %vm4745_vm1, %v13377_v42  ;;  %v10003_v53 = vld [vmem:[%s15802_s7 + $0x60] sm:$0xff]  ;;  %12701 = vmatpush3.bf16.msra.mxu1 %v12548_v27 }
 0x2db   : > { %11726 = vmatprep.mubr.msk.f32.mxu0 %vm903_vm0, %v4315_v56  ;;  %4762 = vst.msk [vmem:[#allocation3 + $0x80] sm:$0xff] %vm4745_vm1, %v13377_v42  ;;  %4763 = vst.msk [vmem:[#allocation3 + $0x88] sm:$0xff] %vm4745_vm1, %v13377_v42  ;;  %v10004_v56 = vld [vmem:[%s15802_s7 + $0x68] sm:$0xff] }
 0x2dc   : > { %4764 = vst.msk [vmem:[#allocation3 + $0x90] sm:$0xff] %vm4745_vm1, %v13377_v42  ;;  %4765 = vst.msk [vmem:[#allocation3 + $0x98] sm:$0xff] %vm4745_vm1, %v13377_v42 }
 0x2dd   : > { %4766 = vst.msk [vmem:[#allocation3 + $0xa0] sm:$0xff] %vm4745_vm1, %v13377_v42  ;;  %4767 = vst.msk [vmem:[#allocation3 + $0xa8] sm:$0xff] %vm4745_vm1, %v13377_v42 }
 0x2de   : > { %11727 = vmatmul.mubr.msk.f32.vlgmr.msra.gmra.mrb[0].mxu0 %vm903_vm0, %v4316_v19  ;;  %4768 = vst.msk [vmem:[#allocation3 + $0xb0] sm:$0xff] %vm4745_vm1, %v13377_v42  ;;  %4769 = vst.msk [vmem:[#allocation3 + $0xb8] sm:$0xff] %vm4745_vm1, %v13377_v42  ;;  %v12552_v19 = vpack.c.bf16 %v10004_v56, %v10003_v53 }
 0x2df   : > { %11729 = vmatprep.mubr.msk.f32.mxu0 %vm903_vm0, %v4317_v23  ;;  %12547 = vmatpush3.bf16.msra.mxu0 %v14465_v13  ;;  %v4328_v13 = vld [vmem:[#allocation2 + $0x8e] sm:$0xff]  ;;  %4770 = vst.msk [vmem:[#allocation3 + $0xc0] sm:$0xff] %vm4745_vm1, %v13377_v42  ;;  %4771 = vst.msk [vmem:[#allocation3 + $0xc8] sm:$0xff] %vm4745_vm1, %v13377_v42 }
 0x2e0   : > { %4772 = vst.msk [vmem:[#allocation3 + $0xd0] sm:$0xff] %vm4745_vm1, %v13377_v42  ;;  %4773 = vst.msk [vmem:[#allocation3 + $0xd8] sm:$0xff] %vm4745_vm1, %v13377_v42  ;;  %12549 = vmatprep.subr.bf16.mxu0 %v12548_v27  ;;  %12698 = vmatprep.subr.bf16.mxu1 %v12552_v19  ;;  %v10005_v23 = vld [vmem:[%s15802_s7 + $0x70] sm:$0xff] }
 0x2e1   : > { %4774 = vst.msk [vmem:[#allocation3 + $0xe0] sm:$0xff] %vm4745_vm1, %v13377_v42  ;;  %4775 = vst.msk [vmem:[#allocation3 + $0xe8] sm:$0xff] %vm4745_vm1, %v13377_v42  ;;  %12702 = vmatpush3.bf16.msra.mxu1 %v12552_v19 }
 0x2e2   : > { %11730 = vmatmul.mubr.msk.f32.gmra.mrb[2].mxu0 %vm903_vm0, %v4318_v57  ;;  %4776 = vst.msk [vmem:[#allocation3 + $0xf0] sm:$0xff] %vm4745_vm1, %v13377_v42  ;;  %4777 = vst.msk [vmem:[#allocation3 + $0xf8] sm:$0xff] %vm4745_vm1, %v13377_v42  ;;  %v10006_v57 = vld [vmem:[%s15802_s7 + $0x78] sm:$0xff] }
 0x2e3   : > { %11732 = vmatprep.mubr.msk.f32.mxu0 %vm903_vm0, %v4319_v20  ;;  %4778 = vst.msk [vmem:[#allocation3 + $0x100] sm:$0xff] %vm4745_vm1, %v13377_v42  ;;  %4779 = vst.msk [vmem:[#allocation3 + $0x108] sm:$0xff] %vm4745_vm1, %v13377_v42  ;;  %12551 = vmatpush3.bf16.msra.mxu0 %v12548_v27  ;;  %v12556_v20 = vpack.c.bf16 %v10006_v57, %v10005_v23 }
 0x2e4   : > { %4780 = vst.msk [vmem:[#allocation3 + $0x110] sm:$0xff] %vm4745_vm1, %v13377_v42  ;;  %4781 = vst.msk [vmem:[#allocation3 + $0x118] sm:$0xff] %vm4745_vm1, %v13377_v42  ;;  %12553 = vmatprep.subr.bf16.mxu0 %v12552_v19 }
 0x2e5   : > { %4782 = vst.msk [vmem:[#allocation3 + $0x120] sm:$0xff] %vm4745_vm1, %v13377_v42  ;;  %4783 = vst.msk [vmem:[#allocation3 + $0x128] sm:$0xff] %vm4745_vm1, %v13377_v42  ;;  %12699 = vmatprep.subr.bf16.mxu1 %v12556_v20 }
 0x2e6   : > { %11733 = vmatmul.mubr.msk.f32.gmra.mrb[4].mxu0 %vm903_vm0, %v4320_v7  ;;  %4784 = vst.msk [vmem:[#allocation3 + $0x130] sm:$0xff] %vm4745_vm1, %v13377_v42  ;;  %4785 = vst.msk [vmem:[#allocation3 + $0x138] sm:$0xff] %vm4745_vm1, %v13377_v42  ;;  %v5244_v7 = vld [vmem:[#allocation3 + $0x1] sm:$0xff]  ;;  %12703 = vmatpush3.bf16.msra.mxu1 %v12556_v20 }
 0x2e7   : > { %11735 = vmatprep.mubr.msk.f32.mxu0 %vm903_vm0, %v4321_v60  ;;  %4786 = vst.msk [vmem:[#allocation3 + $0x140] sm:$0xff] %vm4745_vm1, %v13377_v42  ;;  %12555 = vmatpush3.bf16.msra.mxu0 %v12552_v19  ;;  %v5245_v60 = vld [vmem:[#allocation3 + $0x9] sm:$0xff] }
 0x2e8   : > { %12557 = vmatprep.subr.bf16.mxu0 %v12556_v20 }
 0x2ea   : > { %11736 = vmatmul.mubr.msk.f32.gmra.mrb[6].mxu0 %vm903_vm0, %v4322_v63  ;;  %v5236_v63 = vld [vmem:[%s15802_s7] sm:$0xff] }
 0x2eb   : > { %11738 = vmatprep.mubr.msk.f32.mxu0 %vm903_vm0, %v4323_v0  ;;  %12559 = vmatpush3.bf16.msra.mxu0 %v12556_v20  ;;  %v5237_v0 = vld [vmem:[%s15802_s7 + $0x8] sm:$0xff] }
 0x2ee   : > { %11739 = vmatmul.mubr.msk.f32.gmra.mrb[8].mxu0 %vm903_vm0, %v4324_v3  ;;  %v14601_v3 = vpack.c.bf16 %v5237_v0, %v5236_v63 }
 0x2ef   : > { %11741 = vmatprep.mubr.msk.f32.mxu0 %vm903_vm0, %v4325_v4  ;;  %v14612_v4 = vld [vmem:[%s407_s12] ss:$0 sm:$0xff]  ;;  %s13353_s12 = smul.u32 288, %s15833_s14 }
 0x2f0   : > { %12561 = vmatprep.subr.bf16.mxu1 %v14601_v3 }
 0x2f1   : > { %s15663_s19 = scalar_lea.vmem %s15805_s10, %s13353_s12 }
 0x2f2   : > { %11742 = vmatmul.mubr.msk.f32.gmra.mrb[10].mxu0 %vm903_vm0, %v4326_v8 }
 0x2f3   : > { %11744 = vmatprep.mubr.msk.f32.mxu0 %vm903_vm0, %v4327_v11  ;;  %v14614_v11 = vld [vmem:[%s410_s17] ss:$0 sm:$0xff] }
 0x2f6   : > { %11745 = vmatmul.mubr.msk.f32.gmra.mrb[12].mxu0 %vm903_vm0, %v4328_v13 }
 0x2f7   : > { %11747 = vmatprep.mubr.msk.f32.mxu0 %vm903_vm0, %v4329_v16 }
 0x2fa   : > { %11748 = vmatmul.mubr.msk.f32.gmra.mrb[14].mxu0 %vm903_vm0, %v4330_v21 }
 0x2fb   : > { %11750 = vmatprep.mubr.msk.f32.mxu0 %vm903_vm0, %v4331_v25 }
 0x2fe   : > { %11751 = vmatmul.mubr.msk.f32.gmra.mrb[16].mxu0 %vm903_vm0, %v4332_v28 }
 0x2ff   : > { %11753 = vmatprep.mubr.msk.f32.mxu0 %vm903_vm0, %v4333_v29 }
 0x302   : > { %11754 = vmatmul.mubr.msk.f32.gmra.mrb[18].mxu0 %vm903_vm0, %v4334_v33 }
 0x303   : > { %11756 = vmatprep.mubr.msk.f32.mxu0 %vm903_vm0, %v4335_v36 }
 0x306   : > { %11757 = vmatmul.mubr.msk.f32.gmra.mrb[20].mxu0 %vm903_vm0, %v4336_v37 }
 0x307   : > { %11759 = vmatprep.mubr.msk.f32.mxu0 %vm903_vm0, %v4337_v40 }
 0x30a   : > { %11760 = vmatmul.mubr.msk.f32.gmra.mrb[22].mxu0 %vm903_vm0, %v4338_v41 }
 0x30b   : > { %11762 = vmatprep.mubr.msk.f32.mxu0 %vm903_vm0, %v4339_v44 }
 0x30e   : > { %11763 = vmatmul.mubr.msk.f32.gmra.mrb[24].mxu0 %vm903_vm0, %v4340_v45 }
 0x30f   : > { %11765 = vmatprep.mubr.msk.f32.mxu0 %vm903_vm0, %v4341_v48 }
 0x312   : > { %11766 = vmatmul.mubr.msk.f32.gmra.mrb[26].mxu0 %vm903_vm0, %v4342_v49 }
 0x313   : > { %11768 = vmatprep.mubr.msk.f32.mxu0 %vm903_vm0, %v4343_v52 }
 0x316   : > { %11769 = vmatmul.mubr.msk.f32.gmra.mrb[28].mxu0 %vm903_vm0, %v4344_v26 }
 0x317   : > { %11771 = vmatprep.mubr.msk.f32.mxu0 %vm903_vm0, %v4345_v30 }
 0x31a   : > { %11772 = vmatmul.mubr.msk.f32.gmra.mrb[30].mxu0 %vm903_vm0, %v4346_v31 }
 0x31b   : > { %11774 = vmatprep.mubr.msk.f32.mxu0 %vm903_vm0, %v4347_v34 }
 0x31e   : > { %11775 = vmatmul.mubr.msk.f32.gmra.mrb[32].mxu0 %vm903_vm0, %v4348_v38 }
 0x31f   : > { %11777 = vmatprep.mubr.msk.f32.mxu0 %vm903_vm0, %v4349_v39 }
 0x322   : > { %11778 = vmatmul.mubr.msk.f32.gmra.mrb[34].mxu0 %vm903_vm0, %v4350_v35 }
 0x323   : > { %11796 = vmatprep.mubr.msk.f32.mxu0 %vm4745_vm1, %v5244_v7 }
 0x326   : > { %11797 = vmatmul.mubr.msk.f32.vlgmr.msra.gmra.mrb[36].mxu0 %vm4745_vm1, %v5245_v60 }
 0x3b1   : > { %v11728_v8 = vpop.f32.mrb[0].mxu0 }
 0x3b2   : > { %v4834_v13 = vmul.f32 %v11728_v8, %v14612_v4  ;;  %v4530_v16 = vpop.f32.mrb[1].mxu0 }
 0x3b3   : > { %v4833_v21 = vmul.f32 %v14612_v4, %v4530_v16 }
 0x3b4   : > { %v4877_v25 = vadd.f32 %v14614_v11, %v4834_v13 }
 0x3b5   : > { %v4876_v28 = vadd.f32 %v14614_v11, %v4833_v21  ;;  %v11731_v29 = vpop.f32.mrb[2].mxu0 }
 0x3b6   : > { %v4913_v33 = vmax.f32 %v4877_v25, 0.0  ;;  %v4836_v36 = vmul.f32 %v11731_v29, %v14612_v4  ;;  %v4540_v37 = vpop.f32.mrb[3].mxu0 }
 0x3b7   : > { %v4912_v40 = vmax.f32 %v4876_v28, 0.0  ;;  %v4835_v41 = vmul.f32 %v14612_v4, %v4540_v37 }
 0x3b8   : > { %v5129_v44 = vmul.f32 %v14004_v46, %v4913_v33  ;;  %v4879_v45 = vadd.f32 %v14614_v11, %v4836_v36 }
 0x3b9   : > { %v5128_v48 = vmul.f32 %v14006_v47, %v4912_v40  ;;  %v4878_v49 = vadd.f32 %v14614_v11, %v4835_v41  ;;  %v11734_v52 = vpop.f32.mrb[4].mxu0 }
 0x3ba   : > { %5165 = vst.msk [vmem:[#allocation3 + $0x1b] sm:$0xff] %vm4745_vm1, %v5129_v44  ;;  %v4915_v26 = vmax.f32 %v4879_v45, 0.0  ;;  %v4838_v30 = vmul.f32 %v11734_v52, %v14612_v4  ;;  %v4550_v31 = vpop.f32.mrb[5].mxu0 }
 0x3bb   : > { %5164 = vst.msk [vmem:[#allocation3 + $0x13] sm:$0xff] %vm4745_vm1, %v5128_v48  ;;  %v4914_v34 = vmax.f32 %v4878_v49, 0.0  ;;  %v4837_v38 = vmul.f32 %v14612_v4, %v4550_v31 }
 0x3bc   : > { %v5131_v46 = vmul.f32 %v14010_v50, %v4915_v26  ;;  %v4881_v39 = vadd.f32 %v14614_v11, %v4838_v30 }
 0x3bd   : > { %v5130_v47 = vmul.f32 %v14012_v51, %v4914_v34  ;;  %v4880_v35 = vadd.f32 %v14614_v11, %v4837_v38  ;;  %v11737_v42 = vpop.f32.mrb[6].mxu0 }
 0x3be   : > { %5167 = vst.msk [vmem:[#allocation3 + $0x2b] sm:$0xff] %vm4745_vm1, %v5131_v46  ;;  %v4917_v43 = vmax.f32 %v4881_v39, 0.0  ;;  %v4840_v32 = vmul.f32 %v11737_v42, %v14612_v4  ;;  %v4560_v27 = vpop.f32.mrb[7].mxu0 }
 0x3bf   : > { %5166 = vst.msk [vmem:[#allocation3 + $0x23] sm:$0xff] %vm4745_vm1, %v5130_v47  ;;  %v4916_v53 = vmax.f32 %v4880_v35, 0.0  ;;  %v4839_v56 = vmul.f32 %v14612_v4, %v4560_v27 }
 0x3c0   : > { %v5133_v50 = vmul.f32 %v14016_v54, %v4917_v43  ;;  %v4883_v19 = vadd.f32 %v14614_v11, %v4840_v32 }
 0x3c1   : > { %v5132_v51 = vmul.f32 %v14018_v55, %v4916_v53  ;;  %v4882_v23 = vadd.f32 %v14614_v11, %v4839_v56  ;;  %v11740_v57 = vpop.f32.mrb[8].mxu0 }
 0x3c2   : > { %5169 = vst.msk [vmem:[#allocation3 + $0x3b] sm:$0xff] %vm4745_vm1, %v5133_v50  ;;  %v4919_v20 = vmax.f32 %v4883_v19, 0.0  ;;  %v4842_v7 = vmul.f32 %v11740_v57, %v14612_v4  ;;  %v4570_v60 = vpop.f32.mrb[9].mxu0  ;;  %v5246_v63 = vld [vmem:[#allocation3 + $0x11] sm:$0xff]  ;;  %v5247_v0 = vld [vmem:[#allocation3 + $0x19] sm:$0xff] }
 0x3c3   : > { %5168 = vst.msk [vmem:[#allocation3 + $0x33] sm:$0xff] %vm4745_vm1, %v5132_v51  ;;  %v4918_v8 = vmax.f32 %v4882_v23, 0.0  ;;  %v4841_v54 = vmul.f32 %v14612_v4, %v4570_v60  ;;  %11799 = vmatprep.mubr.msk.f32.mxu0 %vm4745_vm1, %v5246_v63 }
 0x3c4   : > { %v5135_v55 = vmul.f32 %v14022_v58, %v4919_v20  ;;  %v4885_v13 = vadd.f32 %v14614_v11, %v4842_v7  ;;  %11800 = vmatmul.mubr.msk.f32.gmra.mrb[38].mxu0 %vm4745_vm1, %v5247_v0 }
 0x3c5   : > { %v5134_v16 = vmul.f32 %v14024_v59, %v4918_v8  ;;  %v4884_v21 = vadd.f32 %v14614_v11, %v4841_v54  ;;  %v11743_v25 = vpop.f32.mrb[10].mxu0 }
 0x3c6   : > { %5171 = vst.msk [vmem:[#allocation3 + $0x4b] sm:$0xff] %vm4745_vm1, %v5135_v55  ;;  %v4921_v28 = vmax.f32 %v4885_v13, 0.0  ;;  %v4844_v29 = vmul.f32 %v11743_v25, %v14612_v4  ;;  %v4580_v33 = vpop.f32.mrb[11].mxu0  ;;  %v5248_v36 = vld [vmem:[#allocation3 + $0x21] sm:$0xff]  ;;  %v5249_v37 = vld [vmem:[#allocation3 + $0x29] sm:$0xff] }
 0x3c7   : > { %5170 = vst.msk [vmem:[#allocation3 + $0x43] sm:$0xff] %vm4745_vm1, %v5134_v16  ;;  %v4920_v58 = vmax.f32 %v4884_v21, 0.0  ;;  %v4843_v40 = vmul.f32 %v14612_v4, %v4580_v33  ;;  %11802 = vmatprep.mubr.msk.f32.mxu0 %vm4745_vm1, %v5248_v36 }
 0x3c8   : > { %v5137_v59 = vmul.f32 %v14028_v61, %v4921_v28  ;;  %v4887_v41 = vadd.f32 %v14614_v11, %v4844_v29  ;;  %11803 = vmatmul.mubr.msk.f32.gmra.mrb[40].mxu0 %vm4745_vm1, %v5249_v37 }
 0x3c9   : > { %v5136_v44 = vmul.f32 %v14030_v62, %v4920_v58  ;;  %v4886_v45 = vadd.f32 %v14614_v11, %v4843_v40  ;;  %v11746_v48 = vpop.f32.mrb[12].mxu0 }
 0x3ca   : > { %5173 = vst.msk [vmem:[#allocation3 + $0x5b] sm:$0xff] %vm4745_vm1, %v5137_v59  ;;  %v4923_v49 = vmax.f32 %v4887_v41, 0.0  ;;  %v4846_v52 = vmul.f32 %v11746_v48, %v14612_v4  ;;  %v4590_v26 = vpop.f32.mrb[13].mxu0  ;;  %v5250_v30 = vld [vmem:[#allocation3 + $0x31] sm:$0xff]  ;;  %v5251_v31 = vld [vmem:[#allocation3 + $0x39] sm:$0xff] }
 0x3cb   : > { %5172 = vst.msk [vmem:[#allocation3 + $0x53] sm:$0xff] %vm4745_vm1, %v5136_v44  ;;  %v4922_v61 = vmax.f32 %v4886_v45, 0.0  ;;  %v4845_v34 = vmul.f32 %v14612_v4, %v4590_v26  ;;  %11805 = vmatprep.mubr.msk.f32.mxu0 %vm4745_vm1, %v5250_v30 }
 0x3cc   : > { %v5139_v62 = vmul.f32 %v14034_v1, %v4923_v49  ;;  %v4889_v38 = vadd.f32 %v14614_v11, %v4846_v52  ;;  %11806 = vmatmul.mubr.msk.f32.gmra.mrb[42].mxu0 %vm4745_vm1, %v5251_v31 }
 0x3cd   : > { %v5138_v46 = vmul.f32 %v14036_v2, %v4922_v61  ;;  %v4888_v39 = vadd.f32 %v14614_v11, %v4845_v34  ;;  %v11749_v47 = vpop.f32.mrb[14].mxu0 }
 0x3ce   : > { %5175 = vst.msk [vmem:[#allocation3 + $0x6b] sm:$0xff] %vm4745_vm1, %v5139_v62  ;;  %v4925_v35 = vmax.f32 %v4889_v38, 0.0  ;;  %v4848_v42 = vmul.f32 %v11749_v47, %v14612_v4  ;;  %v4600_v43 = vpop.f32.mrb[15].mxu0  ;;  %v5252_v32 = vld [vmem:[#allocation3 + $0x41] sm:$0xff]  ;;  %v5253_v27 = vld [vmem:[#allocation3 + $0x49] sm:$0xff] }
 0x3cf   : > { %5174 = vst.msk [vmem:[#allocation3 + $0x63] sm:$0xff] %vm4745_vm1, %v5138_v46  ;;  %v4924_v1 = vmax.f32 %v4888_v39, 0.0  ;;  %v4847_v53 = vmul.f32 %v14612_v4, %v4600_v43  ;;  %11808 = vmatprep.mubr.msk.f32.mxu0 %vm4745_vm1, %v5252_v32 }
 0x3d0   : > { %v5141_v2 = vmul.f32 %v14040_v5, %v4925_v35  ;;  %v4891_v56 = vadd.f32 %v14614_v11, %v4848_v42  ;;  %11809 = vmatmul.mubr.msk.f32.gmra.mrb[44].mxu0 %vm4745_vm1, %v5253_v27 }
 0x3d1   : > { %v5140_v50 = vmul.f32 %v14042_v6, %v4924_v1  ;;  %v4890_v19 = vadd.f32 %v14614_v11, %v4847_v53  ;;  %v11752_v51 = vpop.f32.mrb[16].mxu0 }
 0x3d2   : > { %5177 = vst.msk [vmem:[#allocation3 + $0x7b] sm:$0xff] %vm4745_vm1, %v5141_v2  ;;  %v4927_v23 = vmax.f32 %v4891_v56, 0.0  ;;  %v4850_v57 = vmul.f32 %v11752_v51, %v14612_v4  ;;  %v4610_v20 = vpop.f32.mrb[17].mxu0  ;;  %v5254_v7 = vld [vmem:[#allocation3 + $0x51] sm:$0xff]  ;;  %v5255_v60 = vld [vmem:[#allocation3 + $0x59] sm:$0xff] }
 0x3d3   : > { %5176 = vst.msk [vmem:[#allocation3 + $0x73] sm:$0xff] %vm4745_vm1, %v5140_v50  ;;  %v4926_v5 = vmax.f32 %v4890_v19, 0.0  ;;  %v4849_v63 = vmul.f32 %v14612_v4, %v4610_v20  ;;  %11811 = vmatprep.mubr.msk.f32.mxu0 %vm4745_vm1, %v5254_v7  ;;  %v5239_v56 = vld [vmem:[%s15802_s7 + $0x18] sm:$0xff]  ;;  %v15819_v51 = vld [vmem:[#allocation4_spill] sm:$0xff] }
 0x3d4   : > { %v5143_v6 = vmul.f32 %v14046_v12, %v4927_v23  ;;  %v4893_v0 = vadd.f32 %v14614_v11, %v4850_v57  ;;  %11812 = vmatmul.mubr.msk.f32.gmra.mrb[46].mxu0 %vm4745_vm1, %v5255_v60 }
 0x3d5   : > { %v5142_v8 = vmul.f32 %v14049_v15, %v4926_v5  ;;  %v4892_v54 = vadd.f32 %v14614_v11, %v4849_v63  ;;  %v11755_v55 = vpop.f32.mrb[18].mxu0 }
 0x3d6   : > { %5179 = vst.msk [vmem:[#allocation3 + $0x8b] sm:$0xff] %vm4745_vm1, %v5143_v6  ;;  %v4929_v13 = vmax.f32 %v4893_v0, 0.0  ;;  %v4852_v16 = vmul.f32 %v11755_v55, %v14612_v4  ;;  %v4620_v21 = vpop.f32.mrb[19].mxu0  ;;  %v5256_v25 = vld [vmem:[#allocation3 + $0x61] sm:$0xff]  ;;  %v5257_v28 = vld [vmem:[#allocation3 + $0x69] sm:$0xff] }
 0x3d7   : > { %5178 = vst.msk [vmem:[#allocation3 + $0x83] sm:$0xff] %vm4745_vm1, %v5142_v8  ;;  %v4928_v12 = vmax.f32 %v4892_v54, 0.0  ;;  %v4851_v29 = vmul.f32 %v14612_v4, %v4620_v21  ;;  %11814 = vmatprep.mubr.msk.f32.mxu0 %vm4745_vm1, %v5256_v25  ;;  %v5240_v54 = vld [vmem:[%s15802_s7 + $0x20] sm:$0xff]  ;;  %v5241_v55 = vld [vmem:[%s15802_s7 + $0x28] sm:$0xff] }
 0x3d8   : > { %v5145_v15 = vmul.f32 %v13935_v14, %v4929_v13  ;;  %v4895_v33 = vadd.f32 %v14614_v11, %v4852_v16  ;;  %11815 = vmatmul.mubr.msk.f32.gmra.mrb[48].mxu0 %vm4745_vm1, %v5257_v28  ;;  %v15820_v13 = vld [vmem:[#allocation5_spill] sm:$0xff]  ;;  %v15821_v25 = vld [vmem:[#allocation6_spill] sm:$0xff] }
 0x3d9   : > { %v5144_v36 = vmul.f32 %v14055_v24, %v4928_v12  ;;  %v4894_v37 = vadd.f32 %v14614_v11, %v4851_v29  ;;  %v11758_v58 = vpop.f32.mrb[20].mxu0 }
 0x3da   : > { %5181 = vst.msk [vmem:[#allocation3 + $0x9b] sm:$0xff] %vm4745_vm1, %v5145_v15  ;;  %v4931_v40 = vmax.f32 %v4895_v33, 0.0  ;;  %v4854_v59 = vmul.f32 %v11758_v58, %v14612_v4  ;;  %v4630_v41 = vpop.f32.mrb[21].mxu0  ;;  %v5258_v44 = vld [vmem:[#allocation3 + $0x71] sm:$0xff]  ;;  %v5259_v45 = vld [vmem:[#allocation3 + $0x79] sm:$0xff] }
 0x3db   : > { %5180 = vst.msk [vmem:[#allocation3 + $0x93] sm:$0xff] %vm4745_vm1, %v5144_v36  ;;  %v4930_v14 = vmax.f32 %v4894_v37, 0.0  ;;  %v4853_v48 = vmul.f32 %v14612_v4, %v4630_v41  ;;  %11817 = vmatprep.mubr.msk.f32.mxu0 %vm4745_vm1, %v5258_v44  ;;  %v5243_v44 = vld [vmem:[%s15802_s7 + $0x38] sm:$0xff] }
 0x3dc   : > { %v5147_v24 = vmul.f32 %v13946_v9, %v4931_v40  ;;  %v4897_v49 = vadd.f32 %v14614_v11, %v4854_v59  ;;  %11818 = vmatmul.mubr.msk.f32.gmra.mrb[50].mxu0 %vm4745_vm1, %v5259_v45  ;;  %v12568_v40 = vpack.c.bf16 %v5241_v55, %v5240_v54  ;;  %v15822_v45 = vld [vmem:[#allocation7_spill] sm:$0xff] }
 0x3dd   : > { %v5146_v52 = vmul.f32 %v13948_v10, %v4930_v14  ;;  %v4896_v26 = vadd.f32 %v14614_v11, %v4853_v48  ;;  %v11761_v30 = vpop.f32.mrb[22].mxu0 }
 0x3de   : > { %5183 = vst.msk [vmem:[#allocation3 + $0xab] sm:$0xff] %vm4745_vm1, %v5147_v24  ;;  %v4933_v31 = vmax.f32 %v4897_v49, 0.0  ;;  %v4856_v61 = vmul.f32 %v11761_v30, %v14612_v4  ;;  %v4640_v34 = vpop.f32.mrb[23].mxu0  ;;  %v5260_v62 = vld [vmem:[#allocation3 + $0x81] sm:$0xff]  ;;  %v5261_v38 = vld [vmem:[#allocation3 + $0x89] sm:$0xff]  ;;  %v15823_v24 = vld [vmem:[#allocation8_spill] sm:$0xff] }
 0x3df   : > { %5182 = vst.msk [vmem:[#allocation3 + $0xa3] sm:$0xff] %vm4745_vm1, %v5146_v52  ;;  %v4932_v9 = vmax.f32 %v4896_v26, 0.0  ;;  %v4855_v46 = vmul.f32 %v14612_v4, %v4640_v34  ;;  %11820 = vmatprep.mubr.msk.f32.mxu0 %vm4745_vm1, %v5260_v62 }
 0x3e0   : > { %v5149_v10 = vmul.f32 %v13958_v17, %v4933_v31  ;;  %v4899_v39 = vadd.f32 %v14614_v11, %v4856_v61  ;;  %11821 = vmatmul.mubr.msk.f32.gmra.mrb[52].mxu0 %vm4745_vm1, %v5261_v38 }
 0x3e1   : > { %v5148_v47 = vmul.f32 %v13960_v18, %v4932_v9  ;;  %v4898_v35 = vadd.f32 %v14614_v11, %v4855_v46  ;;  %v11764_v42 = vpop.f32.mrb[24].mxu0  ;;  %v5238_v18 = vld [vmem:[%s15802_s7 + $0x10] sm:$0xff] }
 0x3e2   : > { %5185 = vst.msk [vmem:[#allocation3 + $0xbb] sm:$0xff] %vm4745_vm1, %v5149_v10  ;;  %v4935_v43 = vmax.f32 %v4899_v39, 0.0  ;;  %v4858_v32 = vmul.f32 %v11764_v42, %v14612_v4  ;;  %v4650_v27 = vpop.f32.mrb[25].mxu0  ;;  %v5262_v1 = vld [vmem:[#allocation3 + $0x91] sm:$0xff]  ;;  %v5263_v53 = vld [vmem:[#allocation3 + $0x99] sm:$0xff]  ;;  %v12564_v0 = vpack.c.bf16 %v5239_v56, %v5238_v18  ;;  %v10079_v10 = vld [vmem:[%s15802_s7 + $0x80] sm:$0xff] }
 0x3e3   : > { %5184 = vst.msk [vmem:[#allocation3 + $0xb3] sm:$0xff] %vm4745_vm1, %v5148_v47  ;;  %v4934_v17 = vmax.f32 %v4898_v35, 0.0  ;;  %v4857_v2 = vmul.f32 %v14612_v4, %v4650_v27  ;;  %11823 = vmatprep.mubr.msk.f32.mxu0 %vm4745_vm1, %v5262_v1  ;;  %v10080_v39 = vld [vmem:[%s15802_s7 + $0x88] sm:$0xff]  ;;  %v15824_v47 = vld [vmem:[#allocation9_spill] sm:$0xff] }
 0x3e4   : > { %v5151_v50 = vmul.f32 %v13967_v22, %v4935_v43  ;;  %v4901_v19 = vadd.f32 %v14614_v11, %v4858_v32  ;;  %11824 = vmatmul.mubr.msk.f32.gmra.mrb[54].mxu0 %vm4745_vm1, %v5263_v53  ;;  %v15825_v43 = vld [vmem:[#allocation10_spill] sm:$0xff] }
 0x3e5   : > { %v5150_v23 = vmul.f32 %v15819_v51, %v4934_v17  ;;  %v4900_v57 = vadd.f32 %v14614_v11, %v4857_v2  ;;  %v11767_v20 = vpop.f32.mrb[26].mxu0 }
 0x3e6   : > { %5187 = vst.msk [vmem:[#allocation3 + $0xcb] sm:$0xff] %vm4745_vm1, %v5151_v50  ;;  %v4937_v7 = vmax.f32 %v4901_v19, 0.0  ;;  %v4860_v60 = vmul.f32 %v11767_v20, %v14612_v4  ;;  %v4660_v5 = vpop.f32.mrb[27].mxu0  ;;  %v5264_v63 = vld [vmem:[#allocation3 + $0xa1] sm:$0xff]  ;;  %v5265_v6 = vld [vmem:[#allocation3 + $0xa9] sm:$0xff]  ;;  %v12576_v50 = vpack.c.bf16 %v10080_v39, %v10079_v10 }
 0x3e7   : > { %5186 = vst.msk [vmem:[#allocation3 + $0xc3] sm:$0xff] %vm4745_vm1, %v5150_v23  ;;  %v4936_v22 = vmax.f32 %v4900_v57, 0.0  ;;  %v4859_v8 = vmul.f32 %v14612_v4, %v4660_v5  ;;  %11826 = vmatprep.mubr.msk.f32.mxu1 %vm4745_vm1, %v5264_v63  ;;  %v15826_v23 = vld [vmem:[#allocation11_spill] sm:$0xff]  ;;  %v10123_v10 = vld [vmem:[%s15802_s7 + $0xc0] sm:$0xff] }
 0x3e8   : > { %v5153_v16 = vmul.f32 %v15820_v13, %v4937_v7  ;;  %v4903_v21 = vadd.f32 %v14614_v11, %v4860_v60  ;;  %11827 = vmatmul.mubr.msk.f32.vlgmr.msra.gmra.mrb[0].mxu1 %vm4745_vm1, %v5265_v6  ;;  %v15827_v7 = vld [vmem:[#allocation12_spill] sm:$0xff]  ;;  %v10124_v39 = vld [vmem:[%s15802_s7 + $0xc8] sm:$0xff] }
 0x3e9   : > { %v5152_v28 = vmul.f32 %v15821_v25, %v4936_v22  ;;  %v4902_v12 = vadd.f32 %v14614_v11, %v4859_v8  ;;  %12563 = vmatpush3.bf16.msra.mxu1 %v14601_v3  ;;  %v11770_v29 = vpop.f32.mrb[28].mxu0  ;;  %v5242_v3 = vld [vmem:[%s15802_s7 + $0x30] sm:$0xff] }
 0x3ea   : > { %5189 = vst.msk [vmem:[#allocation3 + $0xdb] sm:$0xff] %vm4745_vm1, %v5153_v16  ;;  %v4939_v15 = vmax.f32 %v4903_v21, 0.0  ;;  %v4862_v33 = vmul.f32 %v11770_v29, %v14612_v4  ;;  %v4670_v36 = vpop.f32.mrb[29].mxu0  ;;  %v5266_v37 = vld [vmem:[#allocation3 + $0xb1] sm:$0xff]  ;;  %v5267_v58 = vld [vmem:[#allocation3 + $0xb9] sm:$0xff]  ;;  %12565 = vmatprep.subr.bf16.mxu1 %v12564_v0  ;;  %v12572_v38 = vpack.c.bf16 %v5243_v44, %v5242_v3 }
 0x3eb   : > { %5188 = vst.msk [vmem:[#allocation3 + $0xd3] sm:$0xff] %vm4745_vm1, %v5152_v28  ;;  %v4938_v59 = vmax.f32 %v4902_v12, 0.0  ;;  %v4861_v41 = vmul.f32 %v14612_v4, %v4670_v36  ;;  %11829 = vmatprep.mubr.msk.f32.mxu1 %vm4745_vm1, %v5266_v37  ;;  %v15828_v16 = vld [vmem:[#allocation13_spill] sm:$0xff]  ;;  %v15829_v28 = vld [vmem:[#allocation14_spill] sm:$0xff]  ;;  %v15830_v37 = vld [vmem:[#allocation16_spill] sm:$0xff] }
 0x3ec   : > { %v5155_v14 = vmul.f32 %v15822_v45, %v4939_v15  ;;  %v4905_v48 = vadd.f32 %v14614_v11, %v4862_v33  ;;  %11830 = vmatmul.mubr.msk.f32.gmra.mrb[2].mxu1 %vm4745_vm1, %v5267_v58  ;;  %v5200_v45 = vld [vmem:[#allocation3] sm:$0xff] }
 0x3ed   : > { %v5154_v49 = vmul.f32 %v15823_v24, %v4938_v59  ;;  %v4904_v52 = vadd.f32 %v14614_v11, %v4861_v41  ;;  %v11773_v26 = vpop.f32.mrb[30].mxu0  ;;  %12567 = vmatpush3.bf16.msra.mxu1 %v12564_v0  ;;  %v5201_v24 = vld [vmem:[#allocation3 + $0x8] sm:$0xff] }
 0x3ee   : > { %5191 = vst.msk [vmem:[#allocation3 + $0xeb] sm:$0xff] %vm4745_vm1, %v5155_v14  ;;  %v4941_v30 = vmax.f32 %v4905_v48, 0.0  ;;  %v4864_v31 = vmul.f32 %v11773_v26, %v14612_v4  ;;  %v4680_v61 = vpop.f32.mrb[31].mxu0  ;;  %v5268_v34 = vld [vmem:[#allocation3 + $0xc1] sm:$0xff]  ;;  %v5269_v62 = vld [vmem:[#allocation3 + $0xc9] sm:$0xff]  ;;  %12569 = vmatprep.subr.bf16.mxu1 %v12568_v40  ;;  %v10081_v14 = vld [vmem:[%s15802_s7 + $0x90] sm:$0xff] }
 0x3ef   : > { %5190 = vst.msk [vmem:[#allocation3 + $0xe3] sm:$0xff] %vm4745_vm1, %v5154_v49  ;;  %v4940_v9 = vmax.f32 %v4904_v52, 0.0  ;;  %v4863_v46 = vmul.f32 %v14612_v4, %v4680_v61  ;;  %11832 = vmatprep.mubr.msk.f32.mxu1 %vm4745_vm1, %v5268_v34  ;;  %v10082_v48 = vld [vmem:[%s15802_s7 + $0x98] sm:$0xff]  ;;  %v10083_v52 = vld [vmem:[%s15802_s7 + $0xa0] sm:$0xff]  ;;  %v10084_v26 = vld [vmem:[%s15802_s7 + $0xa8] sm:$0xff] }
 0x3f0   : > { %v5157_v35 = vmul.f32 %v15824_v47, %v4941_v30  ;;  %v4907_v42 = vadd.f32 %v14614_v11, %v4864_v31  ;;  %11833 = vmatmul.mubr.msk.f32.gmra.mrb[4].mxu1 %vm4745_vm1, %v5269_v62  ;;  %v12580_v49 = vpack.c.bf16 %v10082_v48, %v10081_v14  ;;  %v5202_v30 = vld [vmem:[#allocation3 + $0x10] sm:$0xff]  ;;  %v12584_v31 = vpack.c.bf16 %v10084_v26, %v10083_v52  ;;  %v5203_v61 = vld [vmem:[#allocation3 + $0x18] sm:$0xff]  ;;  %v10086_v62 = vld [vmem:[%s15802_s7 + $0xb8] sm:$0xff] }
 0x3f1   : > { %v5156_v32 = vmul.f32 %v15825_v43, %v4940_v9  ;;  %v4906_v27 = vadd.f32 %v14614_v11, %v4863_v46  ;;  %v11776_v1 = vpop.f32.mrb[32].mxu0  ;;  %12571 = vmatpush3.bf16.msra.mxu1 %v12568_v40  ;;  %v15831_v40 = vld [vmem:[#allocation15_spill] sm:$0xff]  ;;  %v10085_v34 = vld [vmem:[%s15802_s7 + $0xb0] sm:$0xff]  ;;  %v5205_v46 = vld [vmem:[#allocation3 + $0x28] sm:$0xff] }
 0x3f2   : > { %5193 = vst.msk [vmem:[#allocation3 + $0xfb] sm:$0xff] %vm4745_vm1, %v5157_v35  ;;  %v4943_v53 = vmax.f32 %v4907_v42, 0.0  ;;  %v4866_v17 = vmul.f32 %v11776_v1, %v14612_v4  ;;  %v4690_v2 = vpop.f32.mrb[33].mxu0  ;;  %v5270_v18 = vld [vmem:[#allocation3 + $0xd1] sm:$0xff]  ;;  %v5271_v56 = vld [vmem:[#allocation3 + $0xd9] sm:$0xff]  ;;  %12573 = vmatprep.subr.bf16.mxu1 %v12572_v38  ;;  %v12588_v9 = vpack.c.bf16 %v10086_v62, %v10085_v34  ;;  %v14850_v35 = vpack.c.bf16 %v10124_v39, %v10123_v10  ;;  %v10167_v14 = vld [vmem:[%s15802_s7 + $0x100] sm:$0xff] }
 0x3f3   : > { %5192 = vst.msk [vmem:[#allocation3 + $0xf3] sm:$0xff] %vm4745_vm1, %v5156_v32  ;;  %v4942_v19 = vmax.f32 %v4906_v27, 0.0  ;;  %v4865_v51 = vmul.f32 %v14612_v4, %v4690_v2  ;;  %11835 = vmatprep.mubr.msk.f32.mxu1 %vm4745_vm1, %v5270_v18  ;;  %v5206_v47 = vld [vmem:[#allocation3 + $0x30] sm:$0xff]  ;;  %v5207_v42 = vld [vmem:[#allocation3 + $0x38] sm:$0xff]  ;;  %v5208_v43 = vld [vmem:[#allocation3 + $0x40] sm:$0xff] }
 0x3f4   : > { %v5159_v57 = vmul.f32 %v15826_v23, %v4943_v53  ;;  %v4909_v20 = vadd.f32 %v14614_v11, %v4866_v17  ;;  %11836 = vmatmul.mubr.msk.f32.gmra.mrb[6].mxu1 %vm4745_vm1, %v5271_v56  ;;  %v5209_v32 = vld [vmem:[#allocation3 + $0x48] sm:$0xff]  ;;  %v5210_v27 = vld [vmem:[#allocation3 + $0x50] sm:$0xff]  ;;  %v5211_v1 = vld [vmem:[#allocation3 + $0x58] sm:$0xff] }
 0x3f5   : > { %v5158_v60 = vmul.f32 %v15827_v7, %v4942_v19  ;;  %v4908_v5 = vadd.f32 %v14614_v11, %v4865_v51  ;;  %v11779_v63 = vpop.f32.mrb[34].mxu0  ;;  %12575 = vmatpush3.bf16.msra.mxu1 %v12572_v38  ;;  %v5204_v38 = vld [vmem:[#allocation3 + $0x20] sm:$0xff]  ;;  %v5213_v18 = vld [vmem:[#allocation3 + $0x68] sm:$0xff]  ;;  %v5214_v56 = vld [vmem:[#allocation3 + $0x70] sm:$0xff] }
 0x3f6   : > { %5195 = vst.msk [vmem:[#allocation3 + $0x10b] sm:$0xff] %vm4745_vm1, %v5159_v57  ;;  %v4945_v6 = vmax.f32 %v4909_v20, 0.0  ;;  %v4868_v0 = vmul.f32 %v11779_v63, %v14612_v4  ;;  %v4700_v22 = vpop.f32.mrb[35].mxu0  ;;  %v5272_v8 = vld [vmem:[#allocation3 + $0xe1] sm:$0xff]  ;;  %v5273_v54 = vld [vmem:[#allocation3 + $0xe9] sm:$0xff]  ;;  %12577 = vmatprep.subr.bf16.mxu1 %v12576_v50  ;;  %v5219_v57 = vld [vmem:[#allocation3 + $0x98] sm:$0xff] }
 0x3f7   : > { %5194 = vst.msk [vmem:[#allocation3 + $0x103] sm:$0xff] %vm4745_vm1, %v5158_v60  ;;  %v4944_v55 = vmax.f32 %v4908_v5, 0.0  ;;  %v4867_v13 = vmul.f32 %v14612_v4, %v4700_v22  ;;  %11838 = vmatprep.mubr.msk.f32.mxu1 %vm4745_vm1, %v5272_v8  ;;  %v5212_v53 = vld [vmem:[#allocation3 + $0x60] sm:$0xff]  ;;  %v5217_v51 = vld [vmem:[#allocation3 + $0x88] sm:$0xff]  ;;  %v5218_v23 = vld [vmem:[#allocation3 + $0x90] sm:$0xff] }
 0x3f8   : > { %v5161_v21 = vmul.f32 %v15828_v16, %v4945_v6  ;;  %v4911_v25 = vadd.f32 %v14614_v11, %v4868_v0  ;;  %11839 = vmatmul.mubr.msk.f32.gmra.mrb[8].mxu1 %vm4745_vm1, %v5273_v54  ;;  %v5216_v19 = vld [vmem:[#allocation3 + $0x80] sm:$0xff]  ;;  %v5221_v7 = vld [vmem:[#allocation3 + $0xa8] sm:$0xff]  ;;  %v5222_v60 = vld [vmem:[#allocation3 + $0xb0] sm:$0xff] }
 0x3f9   : > { %v5160_v12 = vmul.f32 %v15829_v28, %v4944_v55  ;;  %v4910_v29 = vadd.f32 %v14614_v11, %v4867_v13  ;;  %v14859_v17 = vpop.f32.mrb[36].mxu0  ;;  %v5220_v20 = vld [vmem:[#allocation3 + $0xa0] sm:$0xff]  ;;  %v5223_v5 = vld [vmem:[#allocation3 + $0xb8] sm:$0xff]  ;;  %v5225_v6 = vld [vmem:[#allocation3 + $0xc8] sm:$0xff] }
 0x3fa   : > { %5197 = vst.msk [vmem:[#allocation3 + $0x11b] sm:$0xff] %vm4745_vm1, %v5161_v21  ;;  %v4947_v15 = vmax.f32 %v4911_v25, 0.0  ;;  %v5274_v33 = vld [vmem:[#allocation3 + $0xf1] sm:$0xff]  ;;  %v5275_v36 = vld [vmem:[#allocation3 + $0xf9] sm:$0xff]  ;;  %v14861_v2 = vpop.f32.mrb[37].mxu0  ;;  %v5229_v54 = vld [vmem:[#allocation3 + $0xe8] sm:$0xff] }
 0x3fb   : > { %5196 = vst.msk [vmem:[#allocation3 + $0x113] sm:$0xff] %vm4745_vm1, %v5160_v12  ;;  %v4946_v4 = vmax.f32 %v4910_v29, 0.0  ;;  %11841 = vmatprep.mubr.msk.f32.mxu1 %vm4745_vm1, %v5274_v33  ;;  %v5224_v63 = vld [vmem:[#allocation3 + $0xc0] sm:$0xff]  ;;  %v5226_v0 = vld [vmem:[#allocation3 + $0xd0] sm:$0xff]  ;;  %v5227_v22 = vld [vmem:[#allocation3 + $0xd8] sm:$0xff] }
 0x3fc   : > { %v5163_v58 = vmul.f32 %v15830_v37, %v4947_v15  ;;  %11842 = vmatmul.mubr.msk.f32.gmra.mrb[10].mxu1 %vm4745_vm1, %v5275_v36  ;;  %v5228_v8 = vld [vmem:[#allocation3 + $0xe0] sm:$0xff]  ;;  %v5230_v55 = vld [vmem:[#allocation3 + $0xf0] sm:$0xff]  ;;  %v5231_v13 = vld [vmem:[#allocation3 + $0xf8] sm:$0xff] }
 0x3fd   : > { %v5162_v59 = vmul.f32 %v15831_v40, %v4946_v4  ;;  %v5995_v28 = vld [vmem:[#allocation3 + $0x2] sm:$0xff]  ;;  %v10125_v29 = vld [vmem:[%s15802_s7 + $0xd0] sm:$0xff]  ;;  %v5996_v33 = vld [vmem:[#allocation3 + $0xa] sm:$0xff] }
 0x3fe   : > { %5199 = vst.msk [vmem:[#allocation3 + $0x12b] sm:$0xff] %vm4745_vm1, %v5163_v58  ;;  %v5276_v41 = vld [vmem:[#allocation3 + $0x101] sm:$0xff]  ;;  %v5277_v11 = vld [vmem:[#allocation3 + $0x109] sm:$0xff]  ;;  %v14900_v58 = vld [vmem:[#allocation3 + $0x12] sm:$0xff] }
 0x3ff   : > { %5198 = vst.msk [vmem:[#allocation3 + $0x123] sm:$0xff] %vm4745_vm1, %v5162_v59  ;;  %11844 = vmatprep.mubr.msk.f32.mxu1 %vm4745_vm1, %v5276_v41  ;;  %v5232_v16 = vld [vmem:[#allocation3 + $0x100] sm:$0xff]  ;;  %v5233_v21 = vld [vmem:[#allocation3 + $0x108] sm:$0xff]  ;;  %v10128_v37 = vld [vmem:[%s15802_s7 + $0xe8] sm:$0xff] }
 0x400   : > { %11845 = vmatmul.mubr.msk.f32.gmra.mrb[12].mxu1 %vm4745_vm1, %v5277_v11  ;;  %v10126_v15 = vld [vmem:[%s15802_s7 + $0xd8] sm:$0xff]  ;;  %v10127_v4 = vld [vmem:[%s15802_s7 + $0xe0] sm:$0xff]  ;;  %v10129_v41 = vld [vmem:[%s15802_s7 + $0xf0] sm:$0xff] }
 0x401   : > { %v12596_v36 = vpack.c.bf16 %v10126_v15, %v10125_v29  ;;  %v12600_v40 = vpack.c.bf16 %v10128_v37, %v10127_v4  ;;  %v14905_v59 = vld [vmem:[#allocation3 + $0x1a] sm:$0xff]  ;;  %v10168_v48 = vld [vmem:[%s15802_s7 + $0x108] sm:$0xff]  ;;  %v14939_v26 = vld [vmem:[#allocation3 + $0x42] sm:$0xff] }
 0x402   : > { %v5278_v3 = vld [vmem:[#allocation3 + $0x111] sm:$0xff]  ;;  %v5279_v44 = vld [vmem:[#allocation3 + $0x119] sm:$0xff]  ;;  %v14956_v34 = vld [vmem:[#allocation3 + $0x62] sm:$0xff] }
 0x403   : > { %11847 = vmatprep.mubr.msk.f32.mxu1 %vm4745_vm1, %v5278_v3  ;;  %v5234_v25 = vld [vmem:[#allocation3 + $0x110] sm:$0xff]  ;;  %v5235_v12 = vld [vmem:[#allocation3 + $0x118] sm:$0xff]  ;;  %v10130_v11 = vld [vmem:[%s15802_s7 + $0xf8] sm:$0xff] }
 0x404   : > { %11848 = vmatmul.mubr.msk.f32.gmra.mrb[14].mxu1 %vm4745_vm1, %v5279_v44  ;;  %v14915_v3 = vld [vmem:[#allocation3 + $0x22] sm:$0xff]  ;;  %v12604_v44 = vpack.c.bf16 %v10130_v11, %v10129_v41  ;;  %v14935_v52 = vld [vmem:[#allocation3 + $0x3a] sm:$0xff]  ;;  %v14960_v62 = vld [vmem:[#allocation3 + $0x6a] sm:$0xff] }
 0x405   : > { %11866 = vmatprep.mubr.msk.f32.mxu1 %vm4745_vm1, %v5200_v45  ;;  %v14919_v45 = vld [vmem:[#allocation3 + $0x2a] sm:$0xff]  ;;  %v14980_v39 = vld [vmem:[#allocation3 + $0x92] sm:$0xff] }
 0x406   : > { %v14976_v10 = vld [vmem:[#allocation3 + $0x8a] sm:$0xff] }
 0x407   : > { %v10212_v29 = vld [vmem:[%s15802_s7 + $0x148] sm:$0xff] }
 0x408   : > { %11867 = vmatmul.mubr.msk.f32.vlgmr.msra.gmra.mrb[16].mxu1 %vm4745_vm1, %v5201_v24  ;;  %v14929_v24 = vld [vmem:[#allocation3 + $0x32] sm:$0xff] }
 0x409   : > { %12579 = vmatpush3.bf16.msra.mxu1 %v12576_v50  ;;  %11869 = vmatprep.mubr.msk.f32.mxu1 %vm4745_vm1, %v5202_v30  ;;  %v5215_v50 = vld [vmem:[#allocation3 + $0x78] sm:$0xff]  ;;  %v14944_v30 = vld [vmem:[#allocation3 + $0x4a] sm:$0xff] }
 0x40a   : > { %12581 = vmatprep.subr.bf16.mxu1 %v12580_v49 }
 0x40c   : > { %11870 = vmatmul.mubr.msk.f32.gmra.mrb[18].mxu1 %vm4745_vm1, %v5203_v61  ;;  %v14952_v61 = vld [vmem:[#allocation3 + $0x5a] sm:$0xff] }
 0x40d   : > { %11872 = vmatprep.mubr.msk.f32.mxu1 %vm4745_vm1, %v5204_v38  ;;  %12583 = vmatpush3.bf16.msra.mxu1 %v12580_v49  ;;  %v14933_v49 = vpack.c.bf16 %v10168_v48, %v10167_v14  ;;  %v14964_v38 = vld [vmem:[#allocation3 + $0x72] sm:$0xff]  ;;  %v6463_v48 = vld [vmem:[#allocation3 + $0x122] sm:$0xff] }
 0x40e   : > { %12585 = vmatprep.subr.bf16.mxu1 %v12584_v31 }
 0x410   : > { %11873 = vmatmul.mubr.msk.f32.gmra.mrb[20].mxu1 %vm4745_vm1, %v5205_v46  ;;  %v14972_v46 = vld [vmem:[#allocation3 + $0x82] sm:$0xff] }
 0x411   : > { %11875 = vmatprep.mubr.msk.f32.mxu1 %vm4745_vm1, %v5206_v47  ;;  %12587 = vmatpush3.bf16.msra.mxu1 %v12584_v31  ;;  %v14948_v31 = vld [vmem:[#allocation3 + $0x52] sm:$0xff]  ;;  %v14984_v47 = vld [vmem:[#allocation3 + $0x9a] sm:$0xff] }
 0x412   : > { %12589 = vmatprep.subr.bf16.mxu1 %v12588_v9 }
 0x414   : > { %11876 = vmatmul.mubr.msk.f32.gmra.mrb[22].mxu1 %vm4745_vm1, %v5207_v42  ;;  %v14992_v42 = vld [vmem:[#allocation3 + $0xaa] sm:$0xff] }
 0x415   : > { %11878 = vmatprep.mubr.msk.f32.mxu1 %vm4745_vm1, %v5208_v43  ;;  %12591 = vmatpush3.bf16.msra.mxu1 %v12588_v9  ;;  %v14968_v9 = vld [vmem:[#allocation3 + $0x7a] sm:$0xff]  ;;  %v14996_v43 = vld [vmem:[#allocation3 + $0xb2] sm:$0xff] }
 0x416   : > { %12593 = vmatprep.subr.bf16.mxu1 %v14850_v35 }
 0x418   : > { %11879 = vmatmul.mubr.msk.f32.gmra.mrb[24].mxu1 %vm4745_vm1, %v5209_v32  ;;  %v15000_v32 = vld [vmem:[#allocation3 + $0xba] sm:$0xff] }
 0x419   : > { %11881 = vmatprep.mubr.msk.f32.mxu1 %vm4745_vm1, %v5210_v27  ;;  %v15004_v27 = vld [vmem:[#allocation3 + $0xc2] sm:$0xff] }
 0x41c   : > { %11882 = vmatmul.mubr.msk.f32.gmra.mrb[26].mxu1 %vm4745_vm1, %v5211_v1  ;;  %v15008_v1 = vld [vmem:[#allocation3 + $0xca] sm:$0xff] }
 0x41d   : > { %11884 = vmatprep.mubr.msk.f32.mxu1 %vm4745_vm1, %v5212_v53  ;;  %v15012_v53 = vld [vmem:[#allocation3 + $0xd2] sm:$0xff] }
 0x420   : > { %11885 = vmatmul.mubr.msk.f32.gmra.mrb[28].mxu1 %vm4745_vm1, %v5213_v18  ;;  %v15016_v18 = vld [vmem:[#allocation3 + $0xda] sm:$0xff] }
 0x421   : > { %11887 = vmatprep.mubr.msk.f32.mxu1 %vm4745_vm1, %v5214_v56  ;;  %v15020_v56 = vld [vmem:[#allocation3 + $0xe2] sm:$0xff] }
 0x424   : > { %11888 = vmatmul.mubr.msk.f32.gmra.mrb[30].mxu1 %vm4745_vm1, %v5215_v50  ;;  %v15024_v50 = vld [vmem:[#allocation3 + $0xea] sm:$0xff] }
 0x425   : > { %11890 = vmatprep.mubr.msk.f32.mxu1 %vm4745_vm1, %v5216_v19  ;;  %v15028_v19 = vld [vmem:[#allocation3 + $0xf2] sm:$0xff] }
 0x428   : > { %11891 = vmatmul.mubr.msk.f32.gmra.mrb[32].mxu1 %vm4745_vm1, %v5217_v51  ;;  %v15032_v51 = vld [vmem:[#allocation3 + $0xfa] sm:$0xff] }
 0x429   : > { %11893 = vmatprep.mubr.msk.f32.mxu1 %vm4745_vm1, %v5218_v23  ;;  %v15036_v23 = vld [vmem:[#allocation3 + $0x102] sm:$0xff] }
 0x42c   : > { %11894 = vmatmul.mubr.msk.f32.gmra.mrb[34].mxu1 %vm4745_vm1, %v5219_v57  ;;  %v15040_v57 = vld [vmem:[#allocation3 + $0x10a] sm:$0xff] }
 0x42d   : > { %11896 = vmatprep.mubr.msk.f32.mxu1 %vm4745_vm1, %v5220_v20  ;;  %v15044_v20 = vld [vmem:[#allocation3 + $0x112] sm:$0xff] }
 0x430   : > { %11897 = vmatmul.mubr.msk.f32.gmra.mrb[0].mxu1 %vm4745_vm1, %v5221_v7  ;;  %v15048_v7 = vld [vmem:[#allocation3 + $0x11a] sm:$0xff] }
 0x431   : > { %11899 = vmatprep.mubr.msk.f32.mxu1 %vm4745_vm1, %v5222_v60  ;;  %v10169_v60 = vld [vmem:[%s15802_s7 + $0x110] sm:$0xff] }
 0x434   : > { %11900 = vmatmul.mubr.msk.f32.gmra.mrb[2].mxu1 %vm4745_vm1, %v5223_v5  ;;  %v10170_v5 = vld [vmem:[%s15802_s7 + $0x118] sm:$0xff] }
 0x435   : > { %11902 = vmatprep.mubr.msk.f32.mxu1 %vm4745_vm1, %v5224_v63  ;;  %v12612_v63 = vpack.c.bf16 %v10170_v5, %v10169_v60  ;;  %v6881_v60 = vld [vmem:[#allocation3 + $0xa3] sm:$0xff]  ;;  %v6882_v5 = vld [vmem:[#allocation3 + $0xab] sm:$0xff] }
 0x438   : > { %11903 = vmatmul.mubr.msk.f32.gmra.mrb[4].mxu1 %vm4745_vm1, %v5225_v6 }
 0x439   : > { %11905 = vmatprep.mubr.msk.f32.mxu1 %vm4745_vm1, %v5226_v0  ;;  %v10171_v0 = vld [vmem:[%s15802_s7 + $0x120] sm:$0xff] }
 0x43c   : > { %11906 = vmatmul.mubr.msk.f32.gmra.mrb[6].mxu1 %vm4745_vm1, %v5227_v22  ;;  %v10172_v22 = vld [vmem:[%s15802_s7 + $0x128] sm:$0xff] }
 0x43d   : > { %11908 = vmatprep.mubr.msk.f32.mxu1 %vm4745_vm1, %v5228_v8 }
 0x440   : > { %11909 = vmatmul.mubr.msk.f32.gmra.mrb[8].mxu1 %vm4745_vm1, %v5229_v54  ;;  %v12616_v54 = vpack.c.bf16 %v10172_v22, %v10171_v0  ;;  %v6884_v0 = vld [vmem:[#allocation3 + $0xbb] sm:$0xff]  ;;  %v6885_v22 = vld [vmem:[#allocation3 + $0xc3] sm:$0xff] }
 0x441   : > { %11911 = vmatprep.mubr.msk.f32.mxu1 %vm4745_vm1, %v5230_v55 }
 0x444   : > { %11912 = vmatmul.mubr.msk.f32.gmra.mrb[10].mxu1 %vm4745_vm1, %v5231_v13  ;;  %v10173_v13 = vld [vmem:[%s15802_s7 + $0x130] sm:$0xff] }
 0x445   : > { %11914 = vmatprep.mubr.msk.f32.mxu1 %vm4745_vm1, %v5232_v16  ;;  %v10174_v16 = vld [vmem:[%s15802_s7 + $0x138] sm:$0xff] }
 0x448   : > { %11915 = vmatmul.mubr.msk.f32.gmra.mrb[12].mxu1 %vm4745_vm1, %v5233_v21 }
 0x449   : > { %11917 = vmatprep.mubr.msk.f32.mxu1 %vm4745_vm1, %v5234_v25  ;;  %v12620_v25 = vpack.c.bf16 %v10174_v16, %v10173_v13  ;;  %v6887_v13 = vld [vmem:[#allocation3 + $0xd3] sm:$0xff]  ;;  %v6888_v16 = vld [vmem:[#allocation3 + $0xdb] sm:$0xff] }
 0x44c   : > { %11918 = vmatmul.mubr.msk.f32.gmra.mrb[14].mxu1 %vm4745_vm1, %v5235_v12  ;;  %v10211_v12 = vld [vmem:[%s15802_s7 + $0x140] sm:$0xff] }
 0x44d   : > { %11936 = vmatprep.mubr.msk.f32.mxu1 %vm4745_vm1, %v5995_v28 }
 0x450   : > { %11937 = vmatmul.mubr.msk.f32.vlgmr.msra.gmra.mrb[16].mxu1 %vm4745_vm1, %v5996_v33  ;;  %v12624_v33 = vpack.c.bf16 %v10212_v29, %v10211_v12  ;;  %v6890_v12 = vld [vmem:[#allocation3 + $0xeb] sm:$0xff]  ;;  %v6891_v29 = vld [vmem:[#allocation3 + $0xf3] sm:$0xff] }
 0x451   : > { %12595 = vmatpush3.bf16.msra.mxu1 %v14850_v35  ;;  %11939 = vmatprep.mubr.msk.f32.mxu1 %vm4745_vm1, %v14900_v58  ;;  %v14988_v35 = vld [vmem:[#allocation3 + $0xa2] sm:$0xff] }
 0x452   : > { %12597 = vmatprep.subr.bf16.mxu1 %v12596_v36 }
 0x454   : > { %11940 = vmatmul.mubr.msk.f32.gmra.mrb[18].mxu1 %vm4745_vm1, %v14905_v59 }
 0x455   : > { %11942 = vmatprep.mubr.msk.f32.mxu1 %vm4745_vm1, %v14915_v3  ;;  %12599 = vmatpush3.bf16.msra.mxu1 %v12596_v36 }
 0x456   : > { %12601 = vmatprep.subr.bf16.mxu1 %v12600_v40 }
 0x458   : > { %11943 = vmatmul.mubr.msk.f32.gmra.mrb[20].mxu1 %vm4745_vm1, %v14919_v45 }
 0x459   : > { %11945 = vmatprep.mubr.msk.f32.mxu1 %vm4745_vm1, %v14929_v24  ;;  %12603 = vmatpush3.bf16.msra.mxu1 %v12600_v40 }
 0x45a   : > { %12605 = vmatprep.subr.bf16.mxu1 %v12604_v44 }
 0x45c   : > { %11946 = vmatmul.mubr.msk.f32.gmra.mrb[22].mxu1 %vm4745_vm1, %v14935_v52 }
 0x45d   : > { %11948 = vmatprep.mubr.msk.f32.mxu1 %vm4745_vm1, %v14939_v26  ;;  %12607 = vmatpush3.bf16.msra.mxu1 %v12604_v44 }
 0x45e   : > { %12609 = vmatprep.subr.bf16.mxu1 %v14933_v49 }
 0x460   : > { %11949 = vmatmul.mubr.msk.f32.gmra.mrb[24].mxu1 %vm4745_vm1, %v14944_v30 }
 0x461   : > { %11951 = vmatprep.mubr.msk.f32.mxu1 %vm4745_vm1, %v14948_v31 }
 0x464   : > { %11952 = vmatmul.mubr.msk.f32.gmra.mrb[26].mxu1 %vm4745_vm1, %v14952_v61 }
 0x465   : > { %11954 = vmatprep.mubr.msk.f32.mxu1 %vm4745_vm1, %v14956_v34 }
 0x468   : > { %11955 = vmatmul.mubr.msk.f32.gmra.mrb[28].mxu1 %vm4745_vm1, %v14960_v62 }
 0x469   : > { %11957 = vmatprep.mubr.msk.f32.mxu1 %vm4745_vm1, %v14964_v38 }
 0x46c   : > { %11958 = vmatmul.mubr.msk.f32.gmra.mrb[30].mxu1 %vm4745_vm1, %v14968_v9 }
 0x46d   : > { %11960 = vmatprep.mubr.msk.f32.mxu1 %vm4745_vm1, %v14972_v46 }
 0x470   : > { %11961 = vmatmul.mubr.msk.f32.gmra.mrb[32].mxu1 %vm4745_vm1, %v14976_v10 }
 0x471   : > { %11963 = vmatprep.mubr.msk.f32.mxu1 %vm4745_vm1, %v14980_v39 }
 0x474   : > { %11964 = vmatmul.mubr.msk.f32.gmra.mrb[34].mxu1 %vm4745_vm1, %v14984_v47 }
 0x475   : > { %11966 = vmatprep.mubr.msk.f32.mxu1 %vm4745_vm1, %v14988_v35 }
 0x478   : > { %11967 = vmatmul.mubr.msk.f32.gmra.mrb[0].mxu1 %vm4745_vm1, %v14992_v42 }
 0x479   : > { %11969 = vmatprep.mubr.msk.f32.mxu1 %vm4745_vm1, %v14996_v43 }
 0x47c   : > { %11970 = vmatmul.mubr.msk.f32.gmra.mrb[2].mxu1 %vm4745_vm1, %v15000_v32 }
 0x47d   : > { %11972 = vmatprep.mubr.msk.f32.mxu1 %vm4745_vm1, %v15004_v27 }
 0x480   : > { %11973 = vmatmul.mubr.msk.f32.gmra.mrb[4].mxu1 %vm4745_vm1, %v15008_v1 }
 0x481   : > { %11975 = vmatprep.mubr.msk.f32.mxu1 %vm4745_vm1, %v15012_v53 }
 0x484   : > { %11976 = vmatmul.mubr.msk.f32.gmra.mrb[6].mxu1 %vm4745_vm1, %v15016_v18 }
 0x485   : > { %11978 = vmatprep.mubr.msk.f32.mxu1 %vm4745_vm1, %v15020_v56 }
 0x488   : > { %11979 = vmatmul.mubr.msk.f32.gmra.mrb[8].mxu1 %vm4745_vm1, %v15024_v50 }
 0x489   : > { %11981 = vmatprep.mubr.msk.f32.mxu1 %vm4745_vm1, %v15028_v19 }
 0x48c   : > { %11982 = vmatmul.mubr.msk.f32.gmra.mrb[10].mxu1 %vm4745_vm1, %v15032_v51 }
 0x48d   : > { %11984 = vmatprep.mubr.msk.f32.mxu1 %vm4745_vm1, %v15036_v23 }
 0x490   : > { %11985 = vmatmul.mubr.msk.f32.gmra.mrb[12].mxu1 %vm4745_vm1, %v15040_v57 }
 0x491   : > { %11987 = vmatprep.mubr.msk.f32.mxu1 %vm4745_vm1, %v15044_v20 }
 0x494   : > { %11988 = vmatmul.mubr.msk.f32.gmra.mrb[14].mxu1 %vm4745_vm1, %v15048_v7 }
 0x495   : > { %12006 = vmatprep.mubr.msk.f32.mxu1 %vm4745_vm1, %v14900_v58 }
 0x497   : > { %v15060_v6 = vpop.f32.mrb[38].mxu0 }
 0x498   : > { %v15068_v8 = vpop.f32.mrb[39].mxu0  ;;  %12007 = vmatmul.mubr.msk.f32.vlgmr.msra.gmra.mrb[16].mxu1 %vm4745_vm1, %v14905_v59 }
 0x499   : > { %12611 = vmatpush3.bf16.msra.mxu1 %v14933_v49  ;;  %12009 = vmatprep.mubr.msk.f32.mxu1 %vm4745_vm1, %v14915_v3  ;;  %v10213_v49 = vld [vmem:[%s15802_s7 + $0x150] sm:$0xff] }
 0x49a   : > { %12613 = vmatprep.subr.bf16.mxu1 %v12612_v63 }
 0x49b   : > { %v15075_v55 = vpop.f32.mrb[40].mxu0 }
 0x49c   : > { %v15083_v21 = vpop.f32.mrb[41].mxu0  ;;  %12010 = vmatmul.mubr.msk.f32.gmra.mrb[18].mxu1 %vm4745_vm1, %v14919_v45 }
 0x49d   : > { %12012 = vmatprep.mubr.msk.f32.mxu1 %vm4745_vm1, %v14929_v24  ;;  %12615 = vmatpush3.bf16.msra.mxu1 %v12612_v63  ;;  %v6464_v24 = vld [vmem:[#allocation3 + $0x12a] sm:$0xff]  ;;  %v6883_v63 = vld [vmem:[#allocation3 + $0xb3] sm:$0xff] }
 0x49e   : > { %12617 = vmatprep.subr.bf16.mxu1 %v12616_v54 }
 0x49f   : > { %v15089_v28 = vpop.f32.mrb[42].mxu0 }
 0x4a0   : > { %v15097_v15 = vpop.f32.mrb[43].mxu0  ;;  %12013 = vmatmul.mubr.msk.f32.gmra.mrb[20].mxu1 %vm4745_vm1, %v14935_v52  ;;  %v10214_v52 = vld [vmem:[%s15802_s7 + $0x158] sm:$0xff] }
 0x4a1   : > { %12015 = vmatprep.mubr.msk.f32.mxu1 %vm4745_vm1, %v14939_v26  ;;  %12619 = vmatpush3.bf16.msra.mxu1 %v12616_v54  ;;  %v6863_v26 = vld [vmem:[#allocation3 + $0x13] sm:$0xff]  ;;  %v6886_v54 = vld [vmem:[#allocation3 + $0xcb] sm:$0xff] }
 0x4a2   : > { %12621 = vmatprep.subr.bf16.mxu1 %v12620_v25 }
 0x4a3   : > { %v15103_v36 = vpop.f32.mrb[44].mxu0 }
 0x4a4   : > { %v15105_v4 = vpop.f32.mrb[45].mxu0  ;;  %12016 = vmatmul.mubr.msk.f32.gmra.mrb[22].mxu1 %vm4745_vm1, %v14944_v30  ;;  %v12628_v30 = vpack.c.bf16 %v10214_v52, %v10213_v49  ;;  %v6895_v49 = vld [vmem:[#allocation3 + $0x113] sm:$0xff]  ;;  %v6896_v52 = vld [vmem:[#allocation3 + $0x11b] sm:$0xff] }
 0x4a5   : > { %12018 = vmatprep.mubr.msk.f32.mxu1 %vm4745_vm1, %v14948_v31  ;;  %12623 = vmatpush3.bf16.msra.mxu1 %v12620_v25  ;;  %v6864_v31 = vld [vmem:[#allocation3 + $0x1b] sm:$0xff]  ;;  %v6889_v25 = vld [vmem:[#allocation3 + $0xe3] sm:$0xff] }
 0x4a6   : > { %12625 = vmatprep.subr.bf16.mxu1 %v12624_v33 }
 0x4a7   : > { %v15111_v37 = vpop.f32.mrb[46].mxu0 }
 0x4a8   : > { %v15113_v58 = vpop.f32.mrb[47].mxu0  ;;  %12019 = vmatmul.mubr.msk.f32.gmra.mrb[24].mxu1 %vm4745_vm1, %v14952_v61  ;;  %v10215_v61 = vld [vmem:[%s15802_s7 + $0x160] sm:$0xff] }
 0x4a9   : > { %12021 = vmatprep.mubr.msk.f32.mxu1 %vm4745_vm1, %v14956_v34  ;;  %v10216_v34 = vld [vmem:[%s15802_s7 + $0x168] sm:$0xff] }
 0x4ab   : > { %v15119_v40 = vpop.f32.mrb[48].mxu0 }
 0x4ac   : > { %v15121_v59 = vpop.f32.mrb[49].mxu0  ;;  %12022 = vmatmul.mubr.msk.f32.gmra.mrb[26].mxu1 %vm4745_vm1, %v14960_v62  ;;  %v6865_v62 = vld [vmem:[#allocation3 + $0x23] sm:$0xff] }
 0x4ad   : > { %12024 = vmatprep.mubr.msk.f32.mxu1 %vm4745_vm1, %v14964_v38  ;;  %v12632_v38 = vpack.c.bf16 %v10216_v34, %v10215_v61  ;;  %v10258_v61 = vld [vmem:[%s15802_s7 + $0x198] sm:$0xff]  ;;  %v7297_v34 = vld [vmem:[#allocation3 + $0x14] sm:$0xff] }
 0x4af   : > { %v15127_v41 = vpop.f32.mrb[50].mxu0 }
 0x4b0   : > { %v15129_v11 = vpop.f32.mrb[51].mxu0  ;;  %12025 = vmatmul.mubr.msk.f32.gmra.mrb[28].mxu1 %vm4745_vm1, %v14968_v9  ;;  %v6866_v9 = vld [vmem:[#allocation3 + $0x2b] sm:$0xff] }
 0x4b1   : > { %12027 = vmatprep.mubr.msk.f32.mxu1 %vm4745_vm1, %v14972_v46  ;;  %v10217_v46 = vld [vmem:[%s15802_s7 + $0x170] sm:$0xff] }
 0x4b3   : > { %v15135_v3 = vpop.f32.mrb[52].mxu0 }
 0x4b4   : > { %v15137_v44 = vpop.f32.mrb[53].mxu0  ;;  %12028 = vmatmul.mubr.msk.f32.gmra.mrb[30].mxu1 %vm4745_vm1, %v14976_v10  ;;  %v10218_v10 = vld [vmem:[%s15802_s7 + $0x178] sm:$0xff] }
 0x4b5   : > { %12030 = vmatprep.mubr.msk.f32.mxu1 %vm4745_vm1, %v14980_v39  ;;  %v6867_v39 = vld [vmem:[#allocation3 + $0x33] sm:$0xff] }
 0x4b7   : > { %v15143_v45 = vpop.f32.mrb[54].mxu0 }
 0x4b8   : > { %v15145_v14 = vpop.f32.mrb[55].mxu0  ;;  %12031 = vmatmul.mubr.msk.f32.gmra.mrb[32].mxu1 %vm4745_vm1, %v14984_v47  ;;  %v12636_v47 = vpack.c.bf16 %v10218_v10, %v10217_v46  ;;  %v10260_v46 = vld [vmem:[%s15802_s7 + $0x1a8] sm:$0xff]  ;;  %v15260_v10 = vld [vmem:[#allocation3 + $0x24] sm:$0xff] }
 0x4b9   : > { %12033 = vmatprep.mubr.msk.f32.mxu1 %vm4745_vm1, %v14988_v35  ;;  %v6868_v35 = vld [vmem:[#allocation3 + $0x3b] sm:$0xff] }
 0x4bc   : > { %12034 = vmatmul.mubr.msk.f32.gmra.mrb[34].mxu1 %vm4745_vm1, %v14992_v42  ;;  %v10255_v42 = vld [vmem:[%s15802_s7 + $0x180] sm:$0xff] }
 0x4bd   : > { %12036 = vmatprep.mubr.msk.f32.mxu1 %vm4745_vm1, %v14996_v43  ;;  %v10256_v43 = vld [vmem:[%s15802_s7 + $0x188] sm:$0xff] }
 0x4c0   : > { %12037 = vmatmul.mubr.msk.f32.gmra.mrb[0].mxu1 %vm4745_vm1, %v15000_v32  ;;  %v6869_v32 = vld [vmem:[#allocation3 + $0x43] sm:$0xff] }
 0x4c1   : > { %12039 = vmatprep.mubr.msk.f32.mxu1 %vm4745_vm1, %v15004_v27  ;;  %v15214_v27 = vpack.c.bf16 %v10256_v43, %v10255_v42  ;;  %v10262_v42 = vld [vmem:[%s15802_s7 + $0x1b8] sm:$0xff]  ;;  %v15275_v43 = vld [vmem:[#allocation3 + $0x34] sm:$0xff] }
 0x4c4   : > { %12040 = vmatmul.mubr.msk.f32.gmra.mrb[2].mxu1 %vm4745_vm1, %v15008_v1  ;;  %v6870_v1 = vld [vmem:[#allocation3 + $0x4b] sm:$0xff] }
 0x4c5   : > { %12042 = vmatprep.mubr.msk.f32.mxu1 %vm4745_vm1, %v15012_v53  ;;  %v6871_v53 = vld [vmem:[#allocation3 + $0x53] sm:$0xff] }
 0x4c8   : > { %12043 = vmatmul.mubr.msk.f32.gmra.mrb[4].mxu1 %vm4745_vm1, %v15016_v18  ;;  %v6872_v18 = vld [vmem:[#allocation3 + $0x5b] sm:$0xff] }
 0x4c9   : > { %12045 = vmatprep.mubr.msk.f32.mxu1 %vm4745_vm1, %v15020_v56  ;;  %v6873_v56 = vld [vmem:[#allocation3 + $0x63] sm:$0xff] }
 0x4cc   : > { %12046 = vmatmul.mubr.msk.f32.gmra.mrb[6].mxu1 %vm4745_vm1, %v15024_v50  ;;  %v6874_v50 = vld [vmem:[#allocation3 + $0x6b] sm:$0xff] }
 0x4cd   : > { %12048 = vmatprep.mubr.msk.f32.mxu1 %vm4745_vm1, %v15028_v19  ;;  %v6875_v19 = vld [vmem:[#allocation3 + $0x73] sm:$0xff] }
 0x4d0   : > { %12049 = vmatmul.mubr.msk.f32.gmra.mrb[8].mxu1 %vm4745_vm1, %v15032_v51  ;;  %v6876_v51 = vld [vmem:[#allocation3 + $0x7b] sm:$0xff] }
 0x4d1   : > { %12051 = vmatprep.mubr.msk.f32.mxu1 %vm4745_vm1, %v15036_v23  ;;  %v6877_v23 = vld [vmem:[#allocation3 + $0x83] sm:$0xff] }
 0x4d4   : > { %12052 = vmatmul.mubr.msk.f32.gmra.mrb[10].mxu1 %vm4745_vm1, %v15040_v57  ;;  %v6878_v57 = vld [vmem:[#allocation3 + $0x8b] sm:$0xff] }
 0x4d5   : > { %12054 = vmatprep.mubr.msk.f32.mxu1 %vm4745_vm1, %v15044_v20  ;;  %v6879_v20 = vld [vmem:[#allocation3 + $0x93] sm:$0xff] }
 0x4d8   : > { %12055 = vmatmul.mubr.msk.f32.gmra.mrb[12].mxu1 %vm4745_vm1, %v15048_v7  ;;  %v6880_v7 = vld [vmem:[#allocation3 + $0x9b] sm:$0xff] }
 0x4d9   : > { %12057 = vmatprep.mubr.msk.f32.mxu1 %vm4745_vm1, %v6463_v48  ;;  %v6893_v48 = vld [vmem:[#allocation3 + $0x103] sm:$0xff] }
 0x4dc   : > { %12058 = vmatmul.mubr.msk.f32.gmra.mrb[14].mxu1 %vm4745_vm1, %v6464_v24  ;;  %v6894_v24 = vld [vmem:[#allocation3 + $0x10b] sm:$0xff] }
 0x4dd   : > { %12076 = vmatprep.mubr.msk.f32.mxu1 %vm4745_vm1, %v6863_v26  ;;  %v6897_v26 = vld [vmem:[#allocation3 + $0x123] sm:$0xff] }
 0x4e0   : > { %12077 = vmatmul.mubr.msk.f32.vlgmr.msra.gmra.mrb[16].mxu1 %vm4745_vm1, %v6864_v31  ;;  %v10257_v31 = vld [vmem:[%s15802_s7 + $0x190] sm:$0xff] }
 0x4e1   : > { %12627 = vmatpush3.bf16.msra.mxu1 %v12624_v33  ;;  %12079 = vmatprep.mubr.msk.f32.mxu1 %vm4745_vm1, %v6865_v62  ;;  %v6892_v33 = vld [vmem:[#allocation3 + $0xfb] sm:$0xff]  ;;  %v12644_v62 = vpack.c.bf16 %v10258_v61, %v10257_v31 }
 0x4e2   : > { %12629 = vmatprep.subr.bf16.mxu1 %v12628_v30  ;;  %v7329_v31 = vld [vmem:[#allocation3 + $0x114] sm:$0xff]  ;;  %v7330_v61 = vld [vmem:[#allocation3 + $0x11c] sm:$0xff] }
 0x4e4   : > { %12080 = vmatmul.mubr.msk.f32.gmra.mrb[18].mxu1 %vm4745_vm1, %v6866_v9  ;;  %v10259_v9 = vld [vmem:[%s15802_s7 + $0x1a0] sm:$0xff] }
 0x4e5   : > { %12082 = vmatprep.mubr.msk.f32.mxu1 %vm4745_vm1, %v6867_v39  ;;  %12631 = vmatpush3.bf16.msra.mxu1 %v12628_v30  ;;  %v6898_v30 = vld [vmem:[#allocation3 + $0x12b] sm:$0xff]  ;;  %v12648_v39 = vpack.c.bf16 %v10260_v46, %v10259_v9  ;;  %v10302_v9 = vld [vmem:[%s15802_s7 + $0x1d8] sm:$0xff] }
 0x4e6   : > { %12633 = vmatprep.subr.bf16.mxu1 %v12632_v38 }
 0x4e8   : > { %12083 = vmatmul.mubr.msk.f32.gmra.mrb[20].mxu1 %vm4745_vm1, %v6868_v35  ;;  %v10261_v35 = vld [vmem:[%s15802_s7 + $0x1b0] sm:$0xff] }
 0x4e9   : > { %12085 = vmatprep.mubr.msk.f32.mxu1 %vm4745_vm1, %v6869_v32  ;;  %12635 = vmatpush3.bf16.msra.mxu1 %v12632_v38  ;;  %v7298_v38 = vld [vmem:[#allocation3 + $0x1c] sm:$0xff]  ;;  %v12652_v32 = vpack.c.bf16 %v10262_v42, %v10261_v35  ;;  %v10304_v35 = vld [vmem:[%s15802_s7 + $0x1e8] sm:$0xff] }
 0x4ea   : > { %12637 = vmatprep.subr.bf16.mxu1 %v12636_v47 }
 0x4ec   : > { %12086 = vmatmul.mubr.msk.f32.gmra.mrb[22].mxu1 %vm4745_vm1, %v6870_v1  ;;  %v10299_v1 = vld [vmem:[%s15802_s7 + $0x1c0] sm:$0xff] }
 0x4ed   : > { %12088 = vmatprep.mubr.msk.f32.mxu1 %vm4745_vm1, %v6871_v53  ;;  %12639 = vmatpush3.bf16.msra.mxu1 %v12636_v47  ;;  %v15265_v47 = vld [vmem:[#allocation3 + $0x2c] sm:$0xff] }
 0x4ee   : > { %12641 = vmatprep.subr.bf16.mxu1 %v15214_v27  ;;  %v10300_v53 = vld [vmem:[%s15802_s7 + $0x1c8] sm:$0xff] }
 0x4f0   : > { %12089 = vmatmul.mubr.msk.f32.gmra.mrb[24].mxu1 %vm4745_vm1, %v6872_v18  ;;  %v15289_v18 = vld [vmem:[#allocation3 + $0x44] sm:$0xff] }
 0x4f1   : > { %12091 = vmatprep.mubr.msk.f32.mxu1 %vm4745_vm1, %v6873_v56  ;;  %v15293_v56 = vpack.c.bf16 %v10300_v53, %v10299_v1  ;;  %v10344_v1 = vld [vmem:[%s15802_s7 + $0x208] sm:$0xff] }
 0x4f2   : > { %v7765_v53 = vld [vmem:[#allocation3 + $0x134] sm:$0xff] }
 0x4f4   : > { %12092 = vmatmul.mubr.msk.f32.gmra.mrb[26].mxu1 %vm4745_vm1, %v6874_v50  ;;  %v15295_v50 = vld [vmem:[#allocation3 + $0x4c] sm:$0xff] }
 0x4f5   : > { %12094 = vmatprep.mubr.msk.f32.mxu1 %vm4745_vm1, %v6875_v19  ;;  %v15299_v19 = vld [vmem:[#allocation3 + $0x54] sm:$0xff] }
 0x4f8   : > { %12095 = vmatmul.mubr.msk.f32.gmra.mrb[28].mxu1 %vm4745_vm1, %v6876_v51  ;;  %v15304_v51 = vld [vmem:[#allocation3 + $0x5c] sm:$0xff] }
 0x4f9   : > { %12097 = vmatprep.mubr.msk.f32.mxu1 %vm4745_vm1, %v6877_v23  ;;  %v15308_v23 = vld [vmem:[#allocation3 + $0x64] sm:$0xff] }
 0x4fc   : > { %12098 = vmatmul.mubr.msk.f32.gmra.mrb[30].mxu1 %vm4745_vm1, %v6878_v57  ;;  %v15312_v57 = vld [vmem:[#allocation3 + $0x6c] sm:$0xff] }
 0x4fd   : > { %12100 = vmatprep.mubr.msk.f32.mxu1 %vm4745_vm1, %v6879_v20  ;;  %v15316_v20 = vld [vmem:[#allocation3 + $0x74] sm:$0xff] }
 0x500   : > { %12101 = vmatmul.mubr.msk.f32.gmra.mrb[32].mxu1 %vm4745_vm1, %v6880_v7  ;;  %v15320_v7 = vld [vmem:[#allocation3 + $0x7c] sm:$0xff] }
 0x501   : > { %12103 = vmatprep.mubr.msk.f32.mxu1 %vm4745_vm1, %v6881_v60  ;;  %v15324_v60 = vld [vmem:[#allocation3 + $0x84] sm:$0xff] }
 0x504   : > { %12104 = vmatmul.mubr.msk.f32.gmra.mrb[34].mxu1 %vm4745_vm1, %v6882_v5  ;;  %v15328_v5 = vld [vmem:[#allocation3 + $0x8c] sm:$0xff] }
 0x505   : > { %12106 = vmatprep.mubr.msk.f32.mxu1 %vm4745_vm1, %v6883_v63  ;;  %v15332_v63 = vld [vmem:[#allocation3 + $0x94] sm:$0xff] }
 0x508   : > { %12107 = vmatmul.mubr.msk.f32.gmra.mrb[0].mxu1 %vm4745_vm1, %v6884_v0  ;;  %v15336_v0 = vld [vmem:[#allocation3 + $0x9c] sm:$0xff] }
 0x509   : > { %12109 = vmatprep.mubr.msk.f32.mxu1 %vm4745_vm1, %v6885_v22  ;;  %v15340_v22 = vld [vmem:[#allocation3 + $0xa4] sm:$0xff] }
 0x50c   : > { %12110 = vmatmul.mubr.msk.f32.gmra.mrb[2].mxu1 %vm4745_vm1, %v6886_v54  ;;  %v15344_v54 = vld [vmem:[#allocation3 + $0xac] sm:$0xff] }
 0x50d   : > { %12112 = vmatprep.mubr.msk.f32.mxu1 %vm4745_vm1, %v6887_v13  ;;  %v15348_v13 = vld [vmem:[#allocation3 + $0xb4] sm:$0xff] }
 0x510   : > { %12113 = vmatmul.mubr.msk.f32.gmra.mrb[4].mxu1 %vm4745_vm1, %v6888_v16  ;;  %v15352_v16 = vld [vmem:[#allocation3 + $0xbc] sm:$0xff] }
 0x511   : > { %12115 = vmatprep.mubr.msk.f32.mxu1 %vm4745_vm1, %v6889_v25  ;;  %v15356_v25 = vld [vmem:[#allocation3 + $0xc4] sm:$0xff] }
 0x514   : > { %12116 = vmatmul.mubr.msk.f32.gmra.mrb[6].mxu1 %vm4745_vm1, %v6890_v12  ;;  %v15360_v12 = vld [vmem:[#allocation3 + $0xcc] sm:$0xff] }
 0x515   : > { %12118 = vmatprep.mubr.msk.f32.mxu1 %vm4745_vm1, %v6891_v29  ;;  %v15364_v29 = vld [vmem:[#allocation3 + $0xd4] sm:$0xff] }
 0x518   : > { %12119 = vmatmul.mubr.msk.f32.gmra.mrb[8].mxu1 %vm4745_vm1, %v6892_v33  ;;  %v15368_v33 = vld [vmem:[#allocation3 + $0xdc] sm:$0xff] }
 0x519   : > { %12121 = vmatprep.mubr.msk.f32.mxu1 %vm4745_vm1, %v6893_v48  ;;  %v15372_v48 = vld [vmem:[#allocation3 + $0xe4] sm:$0xff] }
 0x51c   : > { %12122 = vmatmul.mubr.msk.f32.gmra.mrb[10].mxu1 %vm4745_vm1, %v6894_v24  ;;  %v15376_v24 = vld [vmem:[#allocation3 + $0xec] sm:$0xff] }
 0x51d   : > { %12124 = vmatprep.mubr.msk.f32.mxu1 %vm4745_vm1, %v6895_v49  ;;  %v7325_v49 = vld [vmem:[#allocation3 + $0xf4] sm:$0xff] }
 0x520   : > { %12125 = vmatmul.mubr.msk.f32.gmra.mrb[12].mxu1 %vm4745_vm1, %v6896_v52  ;;  %v7326_v52 = vld [vmem:[#allocation3 + $0xfc] sm:$0xff] }
 0x521   : > { %12127 = vmatprep.mubr.msk.f32.mxu1 %vm4745_vm1, %v6897_v26  ;;  %v7327_v26 = vld [vmem:[#allocation3 + $0x104] sm:$0xff] }
 0x524   : > { %12128 = vmatmul.mubr.msk.f32.gmra.mrb[14].mxu1 %vm4745_vm1, %v6898_v30  ;;  %v7328_v30 = vld [vmem:[#allocation3 + $0x10c] sm:$0xff] }
 0x525   : > { %12146 = vmatprep.mubr.msk.f32.mxu1 %vm4745_vm1, %v7297_v34  ;;  %v7331_v34 = vld [vmem:[#allocation3 + $0x124] sm:$0xff] }
 0x528   : > { %12147 = vmatmul.mubr.msk.f32.vlgmr.msra.gmra.mrb[16].mxu1 %vm4745_vm1, %v7298_v38  ;;  %v10301_v38 = vld [vmem:[%s15802_s7 + $0x1d0] sm:$0xff] }
 0x529   : > { %12643 = vmatpush3.bf16.msra.mxu1 %v15214_v27  ;;  %12149 = vmatprep.mubr.msk.f32.mxu1 %vm4745_vm1, %v15260_v10  ;;  %v15279_v27 = vld [vmem:[#allocation3 + $0x3c] sm:$0xff]  ;;  %v12660_v46 = vpack.c.bf16 %v10302_v9, %v10301_v38 }
 0x52a   : > { %12645 = vmatprep.subr.bf16.mxu1 %v12644_v62  ;;  %v8183_v38 = vld [vmem:[#allocation3 + $0xb5] sm:$0xff]  ;;  %v8184_v9 = vld [vmem:[#allocation3 + $0xbd] sm:$0xff] }
 0x52c   : > { %12150 = vmatmul.mubr.msk.f32.gmra.mrb[18].mxu1 %vm4745_vm1, %v15265_v47 }
 0x52d   : > { %12152 = vmatprep.mubr.msk.f32.mxu1 %vm4745_vm1, %v15275_v43  ;;  %12647 = vmatpush3.bf16.msra.mxu1 %v12644_v62  ;;  %v7332_v62 = vld [vmem:[#allocation3 + $0x12c] sm:$0xff] }
 0x52e   : > { %12649 = vmatprep.subr.bf16.mxu1 %v12648_v39 }
 0x530   : > { %12153 = vmatmul.mubr.msk.f32.gmra.mrb[20].mxu1 %vm4745_vm1, %v15279_v27 }
 0x531   : > { %12155 = vmatprep.mubr.msk.f32.mxu1 %vm4745_vm1, %v15289_v18  ;;  %12651 = vmatpush3.bf16.msra.mxu1 %v12648_v39  ;;  %v10303_v39 = vld [vmem:[%s15802_s7 + $0x1e0] sm:$0xff] }
 0x532   : > { %12653 = vmatprep.subr.bf16.mxu1 %v12652_v32  ;;  %v12664_v42 = vpack.c.bf16 %v10304_v35, %v10303_v39  ;;  %v8186_v39 = vld [vmem:[#allocation3 + $0xcd] sm:$0xff]  ;;  %v8187_v35 = vld [vmem:[#allocation3 + $0xd5] sm:$0xff] }
 0x534   : > { %12156 = vmatmul.mubr.msk.f32.gmra.mrb[22].mxu1 %vm4745_vm1, %v15295_v50 }
 0x535   : > { %12158 = vmatprep.mubr.msk.f32.mxu1 %vm4745_vm1, %v15299_v19  ;;  %12655 = vmatpush3.bf16.msra.mxu1 %v12652_v32  ;;  %v10306_v32 = vld [vmem:[%s15802_s7 + $0x1f8] sm:$0xff] }
 0x536   : > { %12657 = vmatprep.subr.bf16.mxu1 %v15293_v56 }
 0x538   : > { %12159 = vmatmul.mubr.msk.f32.gmra.mrb[24].mxu1 %vm4745_vm1, %v15304_v51 }
 0x539   : > { %12161 = vmatprep.mubr.msk.f32.mxu1 %vm4745_vm1, %v15308_v23 }
 0x53c   : > { %12162 = vmatmul.mubr.msk.f32.gmra.mrb[26].mxu1 %vm4745_vm1, %v15312_v57 }
 0x53d   : > { %12164 = vmatprep.mubr.msk.f32.mxu1 %vm4745_vm1, %v15316_v20 }
 0x540   : > { %12165 = vmatmul.mubr.msk.f32.gmra.mrb[28].mxu1 %vm4745_vm1, %v15320_v7 }
 0x541   : > { %12167 = vmatprep.mubr.msk.f32.mxu1 %vm4745_vm1, %v15324_v60 }
 0x544   : > { %12168 = vmatmul.mubr.msk.f32.gmra.mrb[30].mxu1 %vm4745_vm1, %v15328_v5 }
 0x545   : > { %12170 = vmatprep.mubr.msk.f32.mxu1 %vm4745_vm1, %v15332_v63 }
 0x548   : > { %12171 = vmatmul.mubr.msk.f32.gmra.mrb[32].mxu1 %vm4745_vm1, %v15336_v0 }
 0x549   : > { %12173 = vmatprep.mubr.msk.f32.mxu1 %vm4745_vm1, %v15340_v22 }
 0x54c   : > { %12174 = vmatmul.mubr.msk.f32.gmra.mrb[34].mxu1 %vm4745_vm1, %v15344_v54 }
 0x54d   : > { %12176 = vmatprep.mubr.msk.f32.mxu1 %vm4745_vm1, %v15348_v13 }
 0x550   : > { %12177 = vmatmul.mubr.msk.f32.gmra.mrb[0].mxu1 %vm4745_vm1, %v15352_v16 }
 0x551   : > { %12179 = vmatprep.mubr.msk.f32.mxu1 %vm4745_vm1, %v15356_v25 }
 0x554   : > { %12180 = vmatmul.mubr.msk.f32.gmra.mrb[2].mxu1 %vm4745_vm1, %v15360_v12 }
 0x555   : > { %12182 = vmatprep.mubr.msk.f32.mxu1 %vm4745_vm1, %v15364_v29 }
 0x558   : > { %12183 = vmatmul.mubr.msk.f32.gmra.mrb[4].mxu1 %vm4745_vm1, %v15368_v33 }
 0x559   : > { %12185 = vmatprep.mubr.msk.f32.mxu1 %vm4745_vm1, %v15372_v48 }
 0x55c   : > { %12186 = vmatmul.mubr.msk.f32.gmra.mrb[6].mxu1 %vm4745_vm1, %v15376_v24 }
 0x55d   : > { %12188 = vmatprep.mubr.msk.f32.mxu1 %vm4745_vm1, %v7325_v49 }
 0x560   : > { %12189 = vmatmul.mubr.msk.f32.gmra.mrb[8].mxu1 %vm4745_vm1, %v7326_v52 }
 0x561   : > { %12191 = vmatprep.mubr.msk.f32.mxu1 %vm4745_vm1, %v7327_v26 }
 0x564   : > { %12192 = vmatmul.mubr.msk.f32.gmra.mrb[10].mxu1 %vm4745_vm1, %v7328_v30 }
 0x565   : > { %12194 = vmatprep.mubr.msk.f32.mxu1 %vm4745_vm1, %v7329_v31 }
 0x568   : > { %12195 = vmatmul.mubr.msk.f32.gmra.mrb[12].mxu1 %vm4745_vm1, %v7330_v61 }
 0x569   : > { %12197 = vmatprep.mubr.msk.f32.mxu1 %vm4745_vm1, %v7331_v34 }
 0x56c   : > { %12198 = vmatmul.mubr.msk.f32.gmra.mrb[14].mxu1 %vm4745_vm1, %v7332_v62 }
 0x56d   : > { %12216 = vmatprep.mubr.msk.f32.mxu1 %vm4745_vm1, %v15260_v10  ;;  %v10305_v10 = vld [vmem:[%s15802_s7 + $0x1f0] sm:$0xff] }
 0x570   : > { %12217 = vmatmul.mubr.msk.f32.vlgmr.msra.gmra.mrb[16].mxu1 %vm4745_vm1, %v15265_v47  ;;  %v12668_v47 = vpack.c.bf16 %v10306_v32, %v10305_v10  ;;  %v8189_v10 = vld [vmem:[#allocation3 + $0xe5] sm:$0xff]  ;;  %v8190_v32 = vld [vmem:[#allocation3 + $0xed] sm:$0xff] }
 0x571   : > { %12659 = vmatpush3.bf16.msra.mxu1 %v15293_v56  ;;  %12219 = vmatprep.mubr.msk.f32.mxu1 %vm4745_vm1, %v15275_v43  ;;  %v10343_v43 = vld [vmem:[%s15802_s7 + $0x200] sm:$0xff]  ;;  %v10345_v56 = vld [vmem:[%s15802_s7 + $0x210] sm:$0xff] }
 0x572   : > { %12661 = vmatprep.subr.bf16.mxu1 %v12660_v46 }
 0x574   : > { %12220 = vmatmul.mubr.msk.f32.gmra.mrb[18].mxu1 %vm4745_vm1, %v15279_v27  ;;  %v12672_v27 = vpack.c.bf16 %v10344_v1, %v10343_v43  ;;  %v8192_v43 = vld [vmem:[#allocation3 + $0xfd] sm:$0xff]  ;;  %v8193_v1 = vld [vmem:[#allocation3 + $0x105] sm:$0xff] }
 0x575   : > { %12222 = vmatprep.mubr.msk.f32.mxu1 %vm4745_vm1, %v15289_v18  ;;  %12663 = vmatpush3.bf16.msra.mxu1 %v12660_v46  ;;  %v7766_v18 = vld [vmem:[#allocation3 + $0x13c] sm:$0xff]  ;;  %v8185_v46 = vld [vmem:[#allocation3 + $0xc5] sm:$0xff] }
 0x576   : > { %12665 = vmatprep.subr.bf16.mxu1 %v12664_v42 }
 0x578   : > { %12223 = vmatmul.mubr.msk.f32.gmra.mrb[20].mxu1 %vm4745_vm1, %v15295_v50  ;;  %v10346_v50 = vld [vmem:[%s15802_s7 + $0x218] sm:$0xff] }
 0x579   : > { %12225 = vmatprep.mubr.msk.f32.mxu1 %vm4745_vm1, %v15299_v19  ;;  %12667 = vmatpush3.bf16.msra.mxu1 %v12664_v42  ;;  %v8165_v19 = vld [vmem:[#allocation3 + $0x25] sm:$0xff]  ;;  %v8188_v42 = vld [vmem:[#allocation3 + $0xdd] sm:$0xff] }
 0x57a   : > { %12669 = vmatprep.subr.bf16.mxu1 %v12668_v47 }
 0x57c   : > { %12226 = vmatmul.mubr.msk.f32.gmra.mrb[22].mxu1 %vm4745_vm1, %v15304_v51  ;;  %v12676_v51 = vpack.c.bf16 %v10346_v50, %v10345_v56  ;;  %v8197_v56 = vld [vmem:[#allocation3 + $0x125] sm:$0xff]  ;;  %v8199_v50 = vld [vmem:[#allocation3 + $0x135] sm:$0xff] }
 0x57d   : > { %12228 = vmatprep.mubr.msk.f32.mxu1 %vm4745_vm1, %v15308_v23  ;;  %12671 = vmatpush3.bf16.msra.mxu1 %v12668_v47  ;;  %v8166_v23 = vld [vmem:[#allocation3 + $0x2d] sm:$0xff]  ;;  %v8191_v47 = vld [vmem:[#allocation3 + $0xf5] sm:$0xff] }
 0x57e   : > { %12673 = vmatprep.subr.bf16.mxu1 %v12672_v27 }
 0x580   : > { %12229 = vmatmul.mubr.msk.f32.gmra.mrb[24].mxu1 %vm4745_vm1, %v15312_v57  ;;  %v10347_v57 = vld [vmem:[%s15802_s7 + $0x220] sm:$0xff] }
 0x581   : > { %12231 = vmatprep.mubr.msk.f32.mxu1 %vm4745_vm1, %v15316_v20  ;;  %v10348_v20 = vld [vmem:[%s15802_s7 + $0x228] sm:$0xff] }
 0x584   : > { %12232 = vmatmul.mubr.msk.f32.gmra.mrb[26].mxu1 %vm4745_vm1, %v15320_v7  ;;  %v8167_v7 = vld [vmem:[#allocation3 + $0x35] sm:$0xff] }
 0x585   : > { %12234 = vmatprep.mubr.msk.f32.mxu1 %vm4745_vm1, %v15324_v60  ;;  %v12680_v60 = vpack.c.bf16 %v10348_v20, %v10347_v57  ;;  %v9072_v57 = vld [vmem:[%s15803_s8 + $0x18] sm:$0xff] }
 0x586   : > { %v8599_v20 = vld [vmem:[#allocation3 + $0x26] sm:$0xff] }
 0x588   : > { %12235 = vmatmul.mubr.msk.f32.gmra.mrb[28].mxu1 %vm4745_vm1, %v15328_v5  ;;  %v8168_v5 = vld [vmem:[#allocation3 + $0x3d] sm:$0xff] }
 0x589   : > { %12237 = vmatprep.mubr.msk.f32.mxu1 %vm4745_vm1, %v15332_v63  ;;  %v10349_v63 = vld [vmem:[%s15802_s7 + $0x230] sm:$0xff] }
 0x58c   : > { %12238 = vmatmul.mubr.msk.f32.gmra.mrb[30].mxu1 %vm4745_vm1, %v15336_v0  ;;  %v10350_v0 = vld [vmem:[%s15802_s7 + $0x238] sm:$0xff] }
 0x58d   : > { %12240 = vmatprep.mubr.msk.f32.mxu1 %vm4745_vm1, %v15340_v22  ;;  %v8169_v22 = vld [vmem:[#allocation3 + $0x45] sm:$0xff] }
 0x590   : > { %12241 = vmatmul.mubr.msk.f32.gmra.mrb[32].mxu1 %vm4745_vm1, %v15344_v54  ;;  %v12684_v54 = vpack.c.bf16 %v10350_v0, %v10349_v63  ;;  %v8602_v63 = vld [vmem:[#allocation3 + $0x3e] sm:$0xff]  ;;  %v8603_v0 = vld [vmem:[#allocation3 + $0x46] sm:$0xff] }
 0x591   : > { %12243 = vmatprep.mubr.msk.f32.mxu1 %vm4745_vm1, %v15348_v13  ;;  %v8170_v13 = vld [vmem:[#allocation3 + $0x4d] sm:$0xff] }
 0x594   : > { %12244 = vmatmul.mubr.msk.f32.gmra.mrb[34].mxu1 %vm4745_vm1, %v15352_v16  ;;  %v9069_v16 = vld [vmem:[%s15803_s8] sm:$0xff] }
 0x595   : > { %12246 = vmatprep.mubr.msk.f32.mxu1 %vm4745_vm1, %v15356_v25  ;;  %v9070_v25 = vld [vmem:[%s15803_s8 + $0x8] sm:$0xff] }
 0x598   : > { %12247 = vmatmul.mubr.msk.f32.gmra.mrb[0].mxu1 %vm4745_vm1, %v15360_v12  ;;  %v8171_v12 = vld [vmem:[#allocation3 + $0x55] sm:$0xff] }
 0x599   : > { %12249 = vmatprep.mubr.msk.f32.mxu1 %vm4745_vm1, %v15364_v29  ;;  %v15506_v29 = vpack.c.bf16 %v9070_v25, %v9069_v16  ;;  %v8607_v16 = vld [vmem:[#allocation3 + $0x66] sm:$0xff]  ;;  %v8608_v25 = vld [vmem:[#allocation3 + $0x6e] sm:$0xff] }
 0x59c   : > { %12250 = vmatmul.mubr.msk.f32.gmra.mrb[2].mxu1 %vm4745_vm1, %v15368_v33  ;;  %v8172_v33 = vld [vmem:[#allocation3 + $0x5d] sm:$0xff] }
 0x59d   : > { %12252 = vmatprep.mubr.msk.f32.mxu1 %vm4745_vm1, %v15372_v48  ;;  %v8173_v48 = vld [vmem:[#allocation3 + $0x65] sm:$0xff] }
 0x5a0   : > { %12253 = vmatmul.mubr.msk.f32.gmra.mrb[4].mxu1 %vm4745_vm1, %v15376_v24  ;;  %v8174_v24 = vld [vmem:[#allocation3 + $0x6d] sm:$0xff] }
 0x5a1   : > { %12255 = vmatprep.mubr.msk.f32.mxu1 %vm4745_vm1, %v7325_v49  ;;  %v8175_v49 = vld [vmem:[#allocation3 + $0x75] sm:$0xff] }
 0x5a4   : > { %12256 = vmatmul.mubr.msk.f32.gmra.mrb[6].mxu1 %vm4745_vm1, %v7326_v52  ;;  %v8176_v52 = vld [vmem:[#allocation3 + $0x7d] sm:$0xff] }
 0x5a5   : > { %12258 = vmatprep.mubr.msk.f32.mxu1 %vm4745_vm1, %v7327_v26  ;;  %v8177_v26 = vld [vmem:[#allocation3 + $0x85] sm:$0xff] }
 0x5a8   : > { %12259 = vmatmul.mubr.msk.f32.gmra.mrb[8].mxu1 %vm4745_vm1, %v7328_v30  ;;  %v8178_v30 = vld [vmem:[#allocation3 + $0x8d] sm:$0xff] }
 0x5a9   : > { %12261 = vmatprep.mubr.msk.f32.mxu1 %vm4745_vm1, %v7329_v31  ;;  %v8179_v31 = vld [vmem:[#allocation3 + $0x95] sm:$0xff] }
 0x5ac   : > { %12262 = vmatmul.mubr.msk.f32.gmra.mrb[10].mxu1 %vm4745_vm1, %v7330_v61  ;;  %v8180_v61 = vld [vmem:[#allocation3 + $0x9d] sm:$0xff] }
 0x5ad   : > { %12264 = vmatprep.mubr.msk.f32.mxu1 %vm4745_vm1, %v7331_v34  ;;  %v8181_v34 = vld [vmem:[#allocation3 + $0xa5] sm:$0xff] }
 0x5b0   : > { %12265 = vmatmul.mubr.msk.f32.gmra.mrb[12].mxu1 %vm4745_vm1, %v7332_v62  ;;  %v8182_v62 = vld [vmem:[#allocation3 + $0xad] sm:$0xff] }
 0x5b1   : > { %12267 = vmatprep.mubr.msk.f32.mxu1 %vm4745_vm1, %v7765_v53  ;;  %v8195_v53 = vld [vmem:[#allocation3 + $0x115] sm:$0xff] }
 0x5b4   : > { %12268 = vmatmul.mubr.msk.f32.gmra.mrb[14].mxu1 %vm4745_vm1, %v7766_v18  ;;  %v8196_v18 = vld [vmem:[#allocation3 + $0x11d] sm:$0xff] }
 0x5b5   : > { %12286 = vmatprep.mubr.msk.f32.mxu1 %vm4745_vm1, %v8165_v19  ;;  %v8198_v19 = vld [vmem:[#allocation3 + $0x12d] sm:$0xff] }
 0x5b8   : > { %12287 = vmatmul.mubr.msk.f32.vlgmr.msra.gmra.mrb[16].mxu1 %vm4745_vm1, %v8166_v23  ;;  %v9071_v23 = vld [vmem:[%s15803_s8 + $0x10] sm:$0xff] }
 0x5b9   : > { %12675 = vmatpush3.bf16.msra.mxu1 %v12672_v27  ;;  %12289 = vmatprep.mubr.msk.f32.mxu1 %vm4745_vm1, %v8167_v7  ;;  %v8194_v27 = vld [vmem:[#allocation3 + $0x10d] sm:$0xff]  ;;  %v12692_v7 = vpack.c.bf16 %v9072_v57, %v9071_v23  ;;  %v9038_v23 = vld [vmem:[%s13646_s20 + $0x3b] sm:$0xff] }
 0x5ba   : > { %12677 = vmatprep.subr.bf16.mxu1 %v12676_v51  ;;  %v9039_v57 = vld [vmem:[%s13646_s20 + $0x43] sm:$0xff] }
 0x5bc   : > { %12290 = vmatmul.mubr.msk.f32.gmra.mrb[18].mxu1 %vm4745_vm1, %v8168_v5  ;;  %v8601_v5 = vld [vmem:[#allocation3 + $0x36] sm:$0xff] }
 0x5bd   : > { %12292 = vmatprep.mubr.msk.f32.mxu1 %vm4745_vm1, %v8169_v22  ;;  %12679 = vmatpush3.bf16.msra.mxu1 %v12676_v51  ;;  %v8200_v51 = vld [vmem:[#allocation3 + $0x13d] sm:$0xff]  ;;  %v8604_v22 = vld [vmem:[#allocation3 + $0x4e] sm:$0xff] }
 0x5be   : > { %12681 = vmatprep.subr.bf16.mxu1 %v12680_v60 }
 0x5c0   : > { %12293 = vmatmul.mubr.msk.f32.gmra.mrb[20].mxu1 %vm4745_vm1, %v8170_v13  ;;  %v8606_v13 = vld [vmem:[#allocation3 + $0x5e] sm:$0xff] }
 0x5c1   : > { %12295 = vmatprep.mubr.msk.f32.mxu1 %vm4745_vm1, %v8171_v12  ;;  %12683 = vmatpush3.bf16.msra.mxu1 %v12680_v60  ;;  %v8600_v60 = vld [vmem:[#allocation3 + $0x2e] sm:$0xff]  ;;  %v8609_v12 = vld [vmem:[#allocation3 + $0x76] sm:$0xff] }
 0x5c2   : > { %12685 = vmatprep.subr.bf16.mxu1 %v12684_v54 }
 0x5c4   : > { %12296 = vmatmul.mubr.msk.f32.gmra.mrb[22].mxu1 %vm4745_vm1, %v8172_v33  ;;  %v8611_v33 = vld [vmem:[#allocation3 + $0x86] sm:$0xff] }
 0x5c5   : > { %12298 = vmatprep.mubr.msk.f32.mxu1 %vm4745_vm1, %v8173_v48  ;;  %12687 = vmatpush3.bf16.msra.mxu1 %v12684_v54  ;;  %v8605_v54 = vld [vmem:[#allocation3 + $0x56] sm:$0xff]  ;;  %v8612_v48 = vld [vmem:[#allocation3 + $0x8e] sm:$0xff] }
 0x5c6   : > { %12689 = vmatprep.subr.bf16.mxu1 %v15506_v29 }
 0x5c8   : > { %12299 = vmatmul.mubr.msk.f32.gmra.mrb[24].mxu1 %vm4745_vm1, %v8174_v24  ;;  %v8613_v24 = vld [vmem:[#allocation3 + $0x96] sm:$0xff] }
 0x5c9   : > { %12301 = vmatprep.mubr.msk.f32.mxu1 %vm4745_vm1, %v8175_v49  ;;  %v8614_v49 = vld [vmem:[#allocation3 + $0x9e] sm:$0xff] }
 0x5cc   : > { %12302 = vmatmul.mubr.msk.f32.gmra.mrb[26].mxu1 %vm4745_vm1, %v8176_v52  ;;  %v8615_v52 = vld [vmem:[#allocation3 + $0xa6] sm:$0xff] }
 0x5cd   : > { %12304 = vmatprep.mubr.msk.f32.mxu1 %vm4745_vm1, %v8177_v26  ;;  %v8616_v26 = vld [vmem:[#allocation3 + $0xae] sm:$0xff] }
 0x5d0   : > { %12305 = vmatmul.mubr.msk.f32.gmra.mrb[28].mxu1 %vm4745_vm1, %v8178_v30  ;;  %v8617_v30 = vld [vmem:[#allocation3 + $0xb6] sm:$0xff] }
 0x5d1   : > { %12307 = vmatprep.mubr.msk.f32.mxu1 %vm4745_vm1, %v8179_v31  ;;  %v8618_v31 = vld [vmem:[#allocation3 + $0xbe] sm:$0xff] }
 0x5d4   : > { %12308 = vmatmul.mubr.msk.f32.gmra.mrb[30].mxu1 %vm4745_vm1, %v8180_v61  ;;  %v8619_v61 = vld [vmem:[#allocation3 + $0xc6] sm:$0xff] }
 0x5d5   : > { %12310 = vmatprep.mubr.msk.f32.mxu1 %vm4745_vm1, %v8181_v34  ;;  %v8620_v34 = vld [vmem:[#allocation3 + $0xce] sm:$0xff] }
 0x5d8   : > { %12311 = vmatmul.mubr.msk.f32.gmra.mrb[32].mxu1 %vm4745_vm1, %v8182_v62  ;;  %v8621_v62 = vld [vmem:[#allocation3 + $0xd6] sm:$0xff] }
 0x5d9   : > { %12313 = vmatprep.mubr.msk.f32.mxu1 %vm4745_vm1, %v8183_v38  ;;  %v8622_v38 = vld [vmem:[#allocation3 + $0xde] sm:$0xff] }
 0x5dc   : > { %12314 = vmatmul.mubr.msk.f32.gmra.mrb[34].mxu1 %vm4745_vm1, %v8184_v9  ;;  %v8623_v9 = vld [vmem:[#allocation3 + $0xe6] sm:$0xff] }
 0x5dd   : > { %12316 = vmatprep.mubr.msk.f32.mxu1 %vm4745_vm1, %v8185_v46  ;;  %v8624_v46 = vld [vmem:[#allocation3 + $0xee] sm:$0xff] }
 0x5e0   : > { %12317 = vmatmul.mubr.msk.f32.gmra.mrb[0].mxu1 %vm4745_vm1, %v8186_v39  ;;  %v8625_v39 = vld [vmem:[#allocation3 + $0xf6] sm:$0xff] }
 0x5e1   : > { %12319 = vmatprep.mubr.msk.f32.mxu1 %vm4745_vm1, %v8187_v35  ;;  %v8626_v35 = vld [vmem:[#allocation3 + $0xfe] sm:$0xff] }
 0x5e4   : > { %12320 = vmatmul.mubr.msk.f32.gmra.mrb[2].mxu1 %vm4745_vm1, %v8188_v42  ;;  %v8627_v42 = vld [vmem:[#allocation3 + $0x106] sm:$0xff] }
 0x5e5   : > { %12322 = vmatprep.mubr.msk.f32.mxu1 %vm4745_vm1, %v8189_v10  ;;  %v8628_v10 = vld [vmem:[#allocation3 + $0x10e] sm:$0xff] }
 0x5e8   : > { %12323 = vmatmul.mubr.msk.f32.gmra.mrb[4].mxu1 %vm4745_vm1, %v8190_v32  ;;  %v8629_v32 = vld [vmem:[#allocation3 + $0x116] sm:$0xff] }
 0x5e9   : > { %12325 = vmatprep.mubr.msk.f32.mxu1 %vm4745_vm1, %v8191_v47  ;;  %v8630_v47 = vld [vmem:[#allocation3 + $0x11e] sm:$0xff] }
 0x5ec   : > { %12326 = vmatmul.mubr.msk.f32.gmra.mrb[6].mxu1 %vm4745_vm1, %v8192_v43  ;;  %v8631_v43 = vld [vmem:[#allocation3 + $0x126] sm:$0xff] }
 0x5ed   : > { %12328 = vmatprep.mubr.msk.f32.mxu1 %vm4745_vm1, %v8193_v1  ;;  %v8633_v1 = vld [vmem:[#allocation3 + $0x136] sm:$0xff] }
 0x5f0   : > { %12329 = vmatmul.mubr.msk.f32.gmra.mrb[8].mxu1 %vm4745_vm1, %v8194_v27  ;;  %v8632_v27 = vld [vmem:[#allocation3 + $0x12e] sm:$0xff] }
 0x5f1   : > { %12331 = vmatprep.mubr.msk.f32.mxu1 %vm4745_vm1, %v8195_v53  ;;  %v8634_v53 = vld [vmem:[#allocation3 + $0x13e] sm:$0xff] }
 0x5f4   : > { %12332 = vmatmul.mubr.msk.f32.gmra.mrb[10].mxu1 %vm4745_vm1, %v8196_v18  ;;  %v9033_v18 = vld [vmem:[%s13646_s20 + $0x13] sm:$0xff] }
 0x5f5   : > { %12334 = vmatprep.mubr.msk.f32.mxu1 %vm4745_vm1, %v8197_v56  ;;  %v9034_v56 = vld [vmem:[%s13646_s20 + $0x1b] sm:$0xff] }
 0x5f8   : > { %12335 = vmatmul.mubr.msk.f32.gmra.mrb[12].mxu1 %vm4745_vm1, %v8198_v19  ;;  %v9036_v19 = vld [vmem:[%s13646_s20 + $0x2b] sm:$0xff] }
 0x5f9   : > { %12337 = vmatprep.mubr.msk.f32.mxu1 %vm4745_vm1, %v8199_v50  ;;  %v9035_v50 = vld [vmem:[%s13646_s20 + $0x23] sm:$0xff] }
 0x5fc   : > { %12338 = vmatmul.mubr.msk.f32.gmra.mrb[14].mxu1 %vm4745_vm1, %v8200_v51  ;;  %v9037_v51 = vld [vmem:[%s13646_s20 + $0x33] sm:$0xff] }
 0x5fd   : > { %12356 = vmatprep.mubr.msk.f32.mxu1 %vm4745_vm1, %v8599_v20  ;;  %v9040_v20 = vld [vmem:[%s13646_s20 + $0x4b] sm:$0xff] }
 0x600   : > { %12357 = vmatmul.mubr.msk.f32.vlgmr.msra.gmra.mrb[16].mxu1 %vm4745_vm1, %v8600_v60  ;;  %v9042_v60 = vld [vmem:[%s13646_s20 + $0x5b] sm:$0xff] }
 0x601   : > { %12691 = vmatpush3.bf16.msra.mxu1 %v15506_v29  ;;  %12359 = vmatprep.mubr.msk.f32.mxu1 %vm4745_vm1, %v8601_v5  ;;  %v8610_v29 = vld [vmem:[#allocation3 + $0x7e] sm:$0xff]  ;;  %v9043_v5 = vld [vmem:[%s13646_s20 + $0x63] sm:$0xff] }
 0x602   : > { %12693 = vmatprep.subr.bf16.mxu1 %v12692_v7 }
 0x604   : > { %12360 = vmatmul.mubr.msk.f32.gmra.mrb[18].mxu1 %vm4745_vm1, %v8602_v63  ;;  %v9044_v63 = vld [vmem:[%s13646_s20 + $0x6b] sm:$0xff] }
 0x605   : > { %12362 = vmatprep.mubr.msk.f32.mxu1 %vm4745_vm1, %v8603_v0  ;;  %12695 = vmatpush3.bf16.msra.mxu1 %v12692_v7  ;;  %v9041_v7 = vld [vmem:[%s13646_s20 + $0x53] sm:$0xff] }
 0x606   : > { %v9045_v0 = vld [vmem:[%s13646_s20 + $0x73] sm:$0xff] }
 0x608   : > { %12363 = vmatmul.mubr.msk.f32.gmra.mrb[20].mxu1 %vm4745_vm1, %v8604_v22  ;;  %v9046_v22 = vld [vmem:[%s13646_s20 + $0x7b] sm:$0xff] }
 0x609   : > { %12365 = vmatprep.mubr.msk.f32.mxu1 %vm4745_vm1, %v8605_v54  ;;  %v9047_v54 = vld [vmem:[%s13646_s20 + $0x83] sm:$0xff] }
 0x60c   : > { %12366 = vmatmul.mubr.msk.f32.gmra.mrb[22].mxu1 %vm4745_vm1, %v8606_v13  ;;  %v9048_v13 = vld [vmem:[%s13646_s20 + $0x8b] sm:$0xff] }
 0x60d   : > { %12368 = vmatprep.mubr.msk.f32.mxu1 %vm4745_vm1, %v8607_v16  ;;  %v9049_v16 = vld [vmem:[%s13646_s20 + $0x93] sm:$0xff] }
 0x610   : > { %12369 = vmatmul.mubr.msk.f32.gmra.mrb[24].mxu1 %vm4745_vm1, %v8608_v25  ;;  %v9050_v25 = vld [vmem:[%s13646_s20 + $0x9b] sm:$0xff] }
 0x611   : > { %12371 = vmatprep.mubr.msk.f32.mxu1 %vm4745_vm1, %v8609_v12  ;;  %v9051_v12 = vld [vmem:[%s13646_s20 + $0xa3] sm:$0xff] }
 0x614   : > { %12372 = vmatmul.mubr.msk.f32.gmra.mrb[26].mxu1 %vm4745_vm1, %v8610_v29  ;;  %v9052_v29 = vld [vmem:[%s13646_s20 + $0xab] sm:$0xff] }
 0x615   : > { %12374 = vmatprep.mubr.msk.f32.mxu1 %vm4745_vm1, %v8611_v33  ;;  %v9053_v33 = vld [vmem:[%s13646_s20 + $0xb3] sm:$0xff] }
 0x618   : > { %12375 = vmatmul.mubr.msk.f32.gmra.mrb[28].mxu1 %vm4745_vm1, %v8612_v48  ;;  %v9054_v48 = vld [vmem:[%s13646_s20 + $0xbb] sm:$0xff] }
 0x619   : > { %12377 = vmatprep.mubr.msk.f32.mxu1 %vm4745_vm1, %v8613_v24  ;;  %v9055_v24 = vld [vmem:[%s13646_s20 + $0xc3] sm:$0xff] }
 0x61c   : > { %12378 = vmatmul.mubr.msk.f32.gmra.mrb[30].mxu1 %vm4745_vm1, %v8614_v49  ;;  %v9056_v49 = vld [vmem:[%s13646_s20 + $0xcb] sm:$0xff] }
 0x61d   : > { %12380 = vmatprep.mubr.msk.f32.mxu1 %vm4745_vm1, %v8615_v52  ;;  %v9057_v52 = vld [vmem:[%s13646_s20 + $0xd3] sm:$0xff] }
 0x620   : > { %12381 = vmatmul.mubr.msk.f32.gmra.mrb[32].mxu1 %vm4745_vm1, %v8616_v26  ;;  %v9058_v26 = vld [vmem:[%s13646_s20 + $0xdb] sm:$0xff] }
 0x621   : > { %12383 = vmatprep.mubr.msk.f32.mxu1 %vm4745_vm1, %v8617_v30  ;;  %v9059_v30 = vld [vmem:[%s13646_s20 + $0xe3] sm:$0xff] }
 0x624   : > { %12384 = vmatmul.mubr.msk.f32.gmra.mrb[34].mxu1 %vm4745_vm1, %v8618_v31  ;;  %v9060_v31 = vld [vmem:[%s13646_s20 + $0xeb] sm:$0xff] }
 0x625   : > { %12386 = vmatprep.mubr.msk.f32.mxu1 %vm4745_vm1, %v8619_v61  ;;  %v9061_v61 = vld [vmem:[%s13646_s20 + $0xf3] sm:$0xff] }
 0x628   : > { %12387 = vmatmul.mubr.msk.f32.gmra.mrb[0].mxu1 %vm4745_vm1, %v8620_v34  ;;  %v9062_v34 = vld [vmem:[%s13646_s20 + $0xfb] sm:$0xff] }
 0x629   : > { %12389 = vmatprep.mubr.msk.f32.mxu1 %vm4745_vm1, %v8621_v62  ;;  %v9063_v62 = vld [vmem:[%s13646_s20 + $0x103] sm:$0xff] }
 0x62c   : > { %12390 = vmatmul.mubr.msk.f32.gmra.mrb[2].mxu1 %vm4745_vm1, %v8622_v38  ;;  %v9064_v38 = vld [vmem:[%s13646_s20 + $0x10b] sm:$0xff] }
 0x62d   : > { %12392 = vmatprep.mubr.msk.f32.mxu1 %vm4745_vm1, %v8623_v9  ;;  %v9065_v9 = vld [vmem:[%s13646_s20 + $0x113] sm:$0xff] }
 0x630   : > { %12393 = vmatmul.mubr.msk.f32.gmra.mrb[4].mxu1 %vm4745_vm1, %v8624_v46  ;;  %v9066_v46 = vld [vmem:[%s13646_s20 + $0x11b] sm:$0xff] }
 0x631   : > { %12395 = vmatprep.mubr.msk.f32.mxu1 %vm4745_vm1, %v8625_v39  ;;  %v9067_v39 = vld [vmem:[%s13646_s20 + $0x123] sm:$0xff] }
 0x634   : > { %12396 = vmatmul.mubr.msk.f32.gmra.mrb[6].mxu1 %vm4745_vm1, %v8626_v35  ;;  %v9068_v35 = vld [vmem:[%s13646_s20 + $0x12b] sm:$0xff] }
 0x635   : > { %12398 = vmatprep.mubr.msk.f32.mxu1 %vm4745_vm1, %v8627_v42 }
 0x638   : > { %12399 = vmatmul.mubr.msk.f32.gmra.mrb[8].mxu1 %vm4745_vm1, %v8628_v10  ;;  %v15657_v10 = vld [vmem:[%s15804_s9] ss:$0 sm:$0xff] }
 0x639   : > { %12401 = vmatprep.mubr.msk.f32.mxu1 %vm4745_vm1, %v8629_v32 }
 0x63c   : > { %12402 = vmatmul.mubr.msk.f32.gmra.mrb[10].mxu1 %vm4745_vm1, %v8630_v47 }
 0x63d   : > { %12404 = vmatprep.mubr.msk.f32.mxu1 %vm4745_vm1, %v8631_v43 }
 0x640   : > { %12405 = vmatmul.mubr.msk.f32.gmra.mrb[12].mxu1 %vm4745_vm1, %v8632_v27 }
 0x641   : > { %12407 = vmatprep.mubr.msk.f32.mxu1 %vm4745_vm1, %v8633_v1 }
 0x644   : > { %12408 = vmatmul.mubr.msk.f32.gmra.mrb[14].mxu1 %vm4745_vm1, %v8634_v53 }
 0x645   : > { %12418 = vmatprep.mubr.msk.f32.mxu1 %vm903_vm0, %v9033_v18 }
 0x648   : > { %12419 = vmatmul.mubr.msk.f32.vlgmr.msra.gmra.mrb[16].mxu1 %vm903_vm0, %v9034_v56 }
 0x649   : > { %12421 = vmatprep.mubr.msk.f32.mxu1 %vm903_vm0, %v9035_v50 }
 0x64c   : > { %12422 = vmatmul.mubr.msk.f32.gmra.mrb[18].mxu1 %vm903_vm0, %v9036_v19 }
 0x64d   : > { %12424 = vmatprep.mubr.msk.f32.mxu1 %vm903_vm0, %v9037_v51 }
 0x650   : > { %12425 = vmatmul.mubr.msk.f32.gmra.mrb[20].mxu1 %vm903_vm0, %v9038_v23 }
 0x651   : > { %12427 = vmatprep.mubr.msk.f32.mxu1 %vm903_vm0, %v9039_v57 }
 0x654   : > { %12428 = vmatmul.mubr.msk.f32.gmra.mrb[22].mxu1 %vm903_vm0, %v9040_v20 }
 0x655   : > { %12430 = vmatprep.mubr.msk.f32.mxu1 %vm903_vm0, %v9041_v7 }
 0x658   : > { %12431 = vmatmul.mubr.msk.f32.gmra.mrb[24].mxu1 %vm903_vm0, %v9042_v60 }
 0x659   : > { %12433 = vmatprep.mubr.msk.f32.mxu1 %vm903_vm0, %v9043_v5 }
 0x65c   : > { %12434 = vmatmul.mubr.msk.f32.gmra.mrb[26].mxu1 %vm903_vm0, %v9044_v63 }
 0x65d   : > { %12436 = vmatprep.mubr.msk.f32.mxu1 %vm903_vm0, %v9045_v0 }
 0x660   : > { %12437 = vmatmul.mubr.msk.f32.gmra.mrb[28].mxu1 %vm903_vm0, %v9046_v22 }
 0x661   : > { %12439 = vmatprep.mubr.msk.f32.mxu1 %vm903_vm0, %v9047_v54 }
 0x664   : > { %12440 = vmatmul.mubr.msk.f32.gmra.mrb[30].mxu1 %vm903_vm0, %v9048_v13 }
 0x665   : > { %12442 = vmatprep.mubr.msk.f32.mxu1 %vm903_vm0, %v9049_v16 }
 0x668   : > { %12443 = vmatmul.mubr.msk.f32.gmra.mrb[32].mxu1 %vm903_vm0, %v9050_v25 }
 0x669   : > { %12445 = vmatprep.mubr.msk.f32.mxu1 %vm903_vm0, %v9051_v12 }
 0x66c   : > { %12446 = vmatmul.mubr.msk.f32.gmra.mrb[34].mxu1 %vm903_vm0, %v9052_v29 }
 0x66d   : > { %12448 = vmatprep.mubr.msk.f32.mxu1 %vm903_vm0, %v9053_v33 }
 0x670   : > { %12449 = vmatmul.mubr.msk.f32.gmra.mrb[0].mxu1 %vm903_vm0, %v9054_v48 }
 0x671   : > { %12451 = vmatprep.mubr.msk.f32.mxu1 %vm903_vm0, %v9055_v24 }
 0x674   : > { %12452 = vmatmul.mubr.msk.f32.gmra.mrb[2].mxu1 %vm903_vm0, %v9056_v49 }
 0x675   : > { %12454 = vmatprep.mubr.msk.f32.mxu1 %vm903_vm0, %v9057_v52 }
 0x678   : > { %12455 = vmatmul.mubr.msk.f32.gmra.mrb[4].mxu1 %vm903_vm0, %v9058_v26 }
 0x679   : > { %12457 = vmatprep.mubr.msk.f32.mxu1 %vm903_vm0, %v9059_v30 }
 0x67c   : > { %12458 = vmatmul.mubr.msk.f32.gmra.mrb[6].mxu1 %vm903_vm0, %v9060_v31 }
 0x67d   : > { %12460 = vmatprep.mubr.msk.f32.mxu1 %vm903_vm0, %v9061_v61 }
 0x680   : > { %12461 = vmatmul.mubr.msk.f32.gmra.mrb[8].mxu1 %vm903_vm0, %v9062_v34 }
 0x681   : > { %12463 = vmatprep.mubr.msk.f32.mxu1 %vm903_vm0, %v9063_v62 }
 0x684   : > { %12464 = vmatmul.mubr.msk.f32.gmra.mrb[10].mxu1 %vm903_vm0, %v9064_v38 }
 0x685   : > { %12466 = vmatprep.mubr.msk.f32.mxu1 %vm903_vm0, %v9065_v9 }
 0x688   : > { %12467 = vmatmul.mubr.msk.f32.gmra.mrb[12].mxu1 %vm903_vm0, %v9066_v46 }
 0x689   : > { %12469 = vmatprep.mubr.msk.f32.mxu1 %vm903_vm0, %v9067_v39 }
 0x68c   : > { %12470 = vmatmul.mubr.msk.f32.gmra.mrb[14].mxu1 %vm903_vm0, %v9068_v35 }
 0x71b   : > { %v12420_v42 = vpop.f32.mrb[16].mxu1 }
 0x71c   : > { %v12704_v32 = vadd.f32 %v12420_v42, %v14859_v17  ;;  %v9247_v47 = vpop.f32.mrb[17].mxu1 }
 0x71d   : > { %v12706_v43 = vadd.f32 %v9247_v47, %v14861_v2 }
 0x71e   : > { %v12705_v1 = vadd.f32 %v12704_v32, %v15657_v10 }
 0x71f   : > { %v12707_v27 = vadd.f32 %v12706_v43, %v15657_v10  ;;  %v12423_v53 = vpop.f32.mrb[18].mxu1 }
 0x720   : > { %9506 = vst.msk [vmem:[%s15663_s19 + $0x8] sm:$0xff] %vm4745_vm1, %v12705_v1  ;;  %v12708_v17 = vadd.f32 %v12423_v53, %v15060_v6  ;;  %v9257_v18 = vpop.f32.mrb[19].mxu1 }
 0x721   : > { %9505 = vst.msk [vmem:[%s15663_s19] sm:$0xff] %vm4745_vm1, %v12707_v27  ;;  %v12710_v56 = vadd.f32 %v9257_v18, %v15068_v8 }
 0x722   : > { %v12709_v50 = vadd.f32 %v12708_v17, %v15657_v10 }
 0x723   : > { %v12711_v2 = vadd.f32 %v12710_v56, %v15657_v10  ;;  %v12426_v19 = vpop.f32.mrb[20].mxu1 }
 0x724   : > { %9508 = vst.msk [vmem:[%s15663_s19 + $0x18] sm:$0xff] %vm4745_vm1, %v12709_v50  ;;  %v12712_v51 = vadd.f32 %v12426_v19, %v15075_v55  ;;  %v9267_v23 = vpop.f32.mrb[21].mxu1 }
 0x725   : > { %9507 = vst.msk [vmem:[%s15663_s19 + $0x10] sm:$0xff] %vm4745_vm1, %v12711_v2  ;;  %v12714_v6 = vadd.f32 %v9267_v23, %v15083_v21 }
 0x726   : > { %v12713_v57 = vadd.f32 %v12712_v51, %v15657_v10 }
 0x727   : > { %v12715_v8 = vadd.f32 %v12714_v6, %v15657_v10  ;;  %v12429_v20 = vpop.f32.mrb[22].mxu1 }
 0x728   : > { %9510 = vst.msk [vmem:[%s15663_s19 + $0x28] sm:$0xff] %vm4745_vm1, %v12713_v57  ;;  %v12716_v7 = vadd.f32 %v12429_v20, %v15089_v28  ;;  %v9277_v60 = vpop.f32.mrb[23].mxu1 }
 0x729   : > { %9509 = vst.msk [vmem:[%s15663_s19 + $0x20] sm:$0xff] %vm4745_vm1, %v12715_v8  ;;  %v12718_v55 = vadd.f32 %v9277_v60, %v15097_v15 }
 0x72a   : > { %v12717_v5 = vadd.f32 %v12716_v7, %v15657_v10 }
 0x72b   : > { %v12719_v21 = vadd.f32 %v12718_v55, %v15657_v10  ;;  %v12432_v63 = vpop.f32.mrb[24].mxu1 }
 0x72c   : > { %9512 = vst.msk [vmem:[%s15663_s19 + $0x38] sm:$0xff] %vm4745_vm1, %v12717_v5  ;;  %v12720_v0 = vadd.f32 %v12432_v63, %v15103_v36  ;;  %v9287_v22 = vpop.f32.mrb[25].mxu1 }
 0x72d   : > { %9511 = vst.msk [vmem:[%s15663_s19 + $0x30] sm:$0xff] %vm4745_vm1, %v12719_v21  ;;  %v12722_v28 = vadd.f32 %v9287_v22, %v15105_v4 }
 0x72e   : > { %v12721_v54 = vadd.f32 %v12720_v0, %v15657_v10 }
 0x72f   : > { %v12723_v15 = vadd.f32 %v12722_v28, %v15657_v10  ;;  %v12435_v13 = vpop.f32.mrb[26].mxu1 }
 0x730   : > { %9514 = vst.msk [vmem:[%s15663_s19 + $0x48] sm:$0xff] %vm4745_vm1, %v12721_v54  ;;  %v12724_v16 = vadd.f32 %v12435_v13, %v15111_v37  ;;  %v9297_v25 = vpop.f32.mrb[27].mxu1 }
 0x731   : > { %9513 = vst.msk [vmem:[%s15663_s19 + $0x40] sm:$0xff] %vm4745_vm1, %v12723_v15  ;;  %v12726_v36 = vadd.f32 %v9297_v25, %v15113_v58 }
 0x732   : > { %v12725_v12 = vadd.f32 %v12724_v16, %v15657_v10 }
 0x733   : > { %v12727_v4 = vadd.f32 %v12726_v36, %v15657_v10  ;;  %v12438_v29 = vpop.f32.mrb[28].mxu1 }
 0x734   : > { %9516 = vst.msk [vmem:[%s15663_s19 + $0x58] sm:$0xff] %vm4745_vm1, %v12725_v12  ;;  %v12728_v33 = vadd.f32 %v12438_v29, %v15119_v40  ;;  %v9307_v48 = vpop.f32.mrb[29].mxu1 }
 0x735   : > { %9515 = vst.msk [vmem:[%s15663_s19 + $0x50] sm:$0xff] %vm4745_vm1, %v12727_v4  ;;  %v12730_v37 = vadd.f32 %v9307_v48, %v15121_v59 }
 0x736   : > { %v12729_v24 = vadd.f32 %v12728_v33, %v15657_v10 }
 0x737   : > { %v12731_v58 = vadd.f32 %v12730_v37, %v15657_v10  ;;  %v12441_v49 = vpop.f32.mrb[30].mxu1 }
 0x738   : > { %9518 = vst.msk [vmem:[%s15663_s19 + $0x68] sm:$0xff] %vm4745_vm1, %v12729_v24  ;;  %v12732_v52 = vadd.f32 %v12441_v49, %v15127_v41  ;;  %v9317_v26 = vpop.f32.mrb[31].mxu1 }
 0x739   : > { %9517 = vst.msk [vmem:[%s15663_s19 + $0x60] sm:$0xff] %vm4745_vm1, %v12731_v58  ;;  %v12734_v40 = vadd.f32 %v9317_v26, %v15129_v11 }
 0x73a   : > { %v12733_v30 = vadd.f32 %v12732_v52, %v15657_v10 }
 0x73b   : > { %v12735_v59 = vadd.f32 %v12734_v40, %v15657_v10  ;;  %v12444_v31 = vpop.f32.mrb[32].mxu1 }
 0x73c   : > { %9520 = vst.msk [vmem:[%s15663_s19 + $0x78] sm:$0xff] %vm4745_vm1, %v12733_v30  ;;  %v12736_v61 = vadd.f32 %v12444_v31, %v15135_v3  ;;  %v9327_v34 = vpop.f32.mrb[33].mxu1 }
 0x73d   : > { %9519 = vst.msk [vmem:[%s15663_s19 + $0x70] sm:$0xff] %vm4745_vm1, %v12735_v59  ;;  %v12738_v41 = vadd.f32 %v9327_v34, %v15137_v44 }
 0x73e   : > { %v12737_v62 = vadd.f32 %v12736_v61, %v15657_v10 }
 0x73f   : > { %v12739_v11 = vadd.f32 %v12738_v41, %v15657_v10  ;;  %v12447_v38 = vpop.f32.mrb[34].mxu1 }
 0x740   : > { %9522 = vst.msk [vmem:[%s15663_s19 + $0x88] sm:$0xff] %vm4745_vm1, %v12737_v62  ;;  %v12740_v9 = vadd.f32 %v12447_v38, %v15143_v45  ;;  %v9337_v46 = vpop.f32.mrb[35].mxu1 }
 0x741   : > { %9521 = vst.msk [vmem:[%s15663_s19 + $0x80] sm:$0xff] %vm4745_vm1, %v12739_v11  ;;  %v12742_v3 = vadd.f32 %v9337_v46, %v15145_v14 }
 0x742   : > { %v12741_v44 = vadd.f32 %v12740_v9, %v15657_v10 }
 0x743   : > { %v12743_v39 = vadd.f32 %v12742_v3, %v15657_v10  ;;  %v12450_v35 = vpop.f32.mrb[0].mxu1 }
 0x744   : > { %9524 = vst.msk [vmem:[%s15663_s19 + $0x98] sm:$0xff] %vm4745_vm1, %v12741_v44  ;;  %v12744_v42 = vadd.f32 %v12450_v35, %v15657_v10  ;;  %v9347_v32 = vpop.f32.mrb[1].mxu1 }
 0x745   : > { %9523 = vst.msk [vmem:[%s15663_s19 + $0x90] sm:$0xff] %vm4745_vm1, %v12743_v39  ;;  %v12745_v45 = vadd.f32 %v15657_v10, %v9347_v32 }
 0x746   : > { %9526 = vst.msk [vmem:[%s15663_s19 + $0xa8] sm:$0xff] %vm4745_vm1, %v12744_v42 }
 0x747   : > { %9525 = vst.msk [vmem:[%s15663_s19 + $0xa0] sm:$0xff] %vm4745_vm1, %v12745_v45  ;;  %v12453_v14 = vpop.f32.mrb[2].mxu1 }
 0x748   : > { %v12746_v47 = vadd.f32 %v12453_v14, %v15657_v10  ;;  %v9357_v43 = vpop.f32.mrb[3].mxu1 }
 0x749   : > { %v12747_v1 = vadd.f32 %v15657_v10, %v9357_v43 }
 0x74a   : > { %9528 = vst.msk [vmem:[%s15663_s19 + $0xb8] sm:$0xff] %vm4745_vm1, %v12746_v47 }
 0x74b   : > { %9527 = vst.msk [vmem:[%s15663_s19 + $0xb0] sm:$0xff] %vm4745_vm1, %v12747_v1  ;;  %v12456_v27 = vpop.f32.mrb[4].mxu1 }
 0x74c   : > { %v12748_v53 = vadd.f32 %v12456_v27, %v15657_v10  ;;  %v9367_v17 = vpop.f32.mrb[5].mxu1 }
 0x74d   : > { %v12749_v18 = vadd.f32 %v15657_v10, %v9367_v17 }
 0x74e   : > { %9530 = vst.msk [vmem:[%s15663_s19 + $0xc8] sm:$0xff] %vm4745_vm1, %v12748_v53 }
 0x74f   : > { %9529 = vst.msk [vmem:[%s15663_s19 + $0xc0] sm:$0xff] %vm4745_vm1, %v12749_v18  ;;  %v12459_v56 = vpop.f32.mrb[6].mxu1 }
 0x750   : > { %v12750_v50 = vadd.f32 %v12459_v56, %v15657_v10  ;;  %v9377_v2 = vpop.f32.mrb[7].mxu1 }
 0x751   : > { %v12751_v19 = vadd.f32 %v15657_v10, %v9377_v2 }
 0x752   : > { %9532 = vst.msk [vmem:[%s15663_s19 + $0xd8] sm:$0xff] %vm4745_vm1, %v12750_v50 }
 0x753   : > { %9531 = vst.msk [vmem:[%s15663_s19 + $0xd0] sm:$0xff] %vm4745_vm1, %v12751_v19  ;;  %v12462_v51 = vpop.f32.mrb[8].mxu1 }
 0x754   : > { %v12752_v23 = vadd.f32 %v12462_v51, %v15657_v10  ;;  %v9387_v6 = vpop.f32.mrb[9].mxu1 }
 0x755   : > { %v12753_v57 = vadd.f32 %v15657_v10, %v9387_v6 }
 0x756   : > { %9534 = vst.msk [vmem:[%s15663_s19 + $0xe8] sm:$0xff] %vm4745_vm1, %v12752_v23 }
 0x757   : > { %9533 = vst.msk [vmem:[%s15663_s19 + $0xe0] sm:$0xff] %vm4745_vm1, %v12753_v57  ;;  %v12465_v8 = vpop.f32.mrb[10].mxu1 }
 0x758   : > { %v12754_v20 = vadd.f32 %v12465_v8, %v15657_v10  ;;  %v9397_v7 = vpop.f32.mrb[11].mxu1 }
 0x759   : > { %v12755_v60 = vadd.f32 %v15657_v10, %v9397_v7 }
 0x75a   : > { %9536 = vst.msk [vmem:[%s15663_s19 + $0xf8] sm:$0xff] %vm4745_vm1, %v12754_v20 }
 0x75b   : > { %9535 = vst.msk [vmem:[%s15663_s19 + $0xf0] sm:$0xff] %vm4745_vm1, %v12755_v60  ;;  %v12468_v55 = vpop.f32.mrb[12].mxu1 }
 0x75c   : > { %v12756_v5 = vadd.f32 %v12468_v55, %v15657_v10  ;;  %v9407_v21 = vpop.f32.mrb[13].mxu1 }
 0x75d   : > { %v12757_v63 = vadd.f32 %v15657_v10, %v9407_v21 }
 0x75e   : > { %9538 = vst.msk [vmem:[%s15663_s19 + $0x108] sm:$0xff] %vm4745_vm1, %v12756_v5 }
 0x75f   : > { %9537 = vst.msk [vmem:[%s15663_s19 + $0x100] sm:$0xff] %vm4745_vm1, %v12757_v63  ;;  %v12471_v0 = vpop.f32.mrb[14].mxu1 }
 0x760   : > { %v12758_v22 = vadd.f32 %v12471_v0, %v15657_v10  ;;  %v9417_v28 = vpop.f32.mrb[15].mxu1 }
 0x761   : > { %v12759_v54 = vadd.f32 %v15657_v10, %v9417_v28 }
 0x762   : > { %9540 = vst.msk [vmem:[%s15663_s19 + $0x118] sm:$0xff] %vm4745_vm1, %v12758_v22 }
 0x763   : > { %9539 = vst.msk [vmem:[%s15663_s19 + $0x110] sm:$0xff] %vm4745_vm1, %v12759_v54 }
 0x764 PF: > { %s20_s13 = sadd.s32 1, %s13374_s13  }
 0x765   : > { %p17_p4 = scmp.ge.s32.totalorder %s20_s13, 4  }
 0x767   :  { %19 = sbr.rel (!%p17_p4) target bundleno = 1 (0x1), region = 118 }

</bundles_post_ra>
